<compile_context>
chip_gen: v7x
topology: tpu7x:2x2x1
jax: 0.10.0
libtpu: 0.0.40
codegen_flags: <defaults>
</compile_context>

<pallas_src>
import functools
import math

import jax
import jax.numpy as jnp
from jax import lax
from jax.experimental import pallas as pl
from jax.experimental.pallas import tpu as pltpu


def _round_up(x, m):
    return (x + m - 1) // m * m


def _nbytes(shape, dtype):
    return math.prod(shape) * jnp.dtype(dtype).itemsize


def _vmem_limit(need_bytes, frac=0.8):
    """Generation-aware scoped-VMEM limit: need + headroom, capped at ~80% physical."""
    try:
        cap = int(pltpu.get_tpu_info().vmem_capacity_bytes * frac)
        if cap <= 0:
            cap = 100 << 20
    except Exception:
        cap = 100 << 20
    return int(min(max(need_bytes + (8 << 20), 32 << 20), cap))


# -----------------------------------------------------------------------------
# Kernel 1: multi-layer LSTM over the whole (time-major) sequence.
# -----------------------------------------------------------------------------
def _lstm_kernel(num_layers, Tc, NC, Bp, Hp,
                 emb_ref,    # [T*Bp, Ep]        bf16 (time-major, padded)
                 h0_ref,     # [L, Bp, Hp]       f32
                 c0_ref,     # [L, Bp, Hp]       f32
                 wih0_ref,   # [Ep, 4Hp]         bf16  layer-0 x@Wih (gates i,f,o,g)
                 wihr_ref,   # [max(L-1,1), Hp, 4Hp] bf16  layers>=1 x@Wih
                 whh_ref,    # [L, Hp, 4Hp]      bf16  h@Whh (gates i,f,o,g)
                 b_ref,      # [L, 1, 4Hp]       f32   b_ih + b_hh
                 hseq_ref,   # OUT [T*Bp, Hp]    bf16  last layer's hidden sequence
                 seq_ref,    # scratch [T*Bp, Hp] bf16  intermediate layers' hidden seq
                 gx_ref):    # scratch [Tc*Bp, 4Hp] f32  hoisted x@Wih + b (one chunk)
    chunk_rows = Tc * Bp
    unroll = True if Tc <= 16 else 4

    for layer in range(num_layers):               # static python loop, L is small
        last = layer == num_layers - 1
        in_ref = emb_ref if layer == 0 else seq_ref
        dst_ref = hseq_ref if last else seq_ref

        def chunk_body(ci, carry, layer=layer, in_ref=in_ref, dst_ref=dst_ref):
            h, c = carry                          # f32 [Bp, Hp]
            row0 = pl.multiple_of(ci * chunk_rows, Bp)
            # Hoisted input projection for the whole chunk (+ fused bias): one
            # big MXU matmul instead of Tc tiny ones on the serial chain.
            w_in = wih0_ref[...] if layer == 0 else wihr_ref[layer - 1]
            gx_ref[...] = (jnp.dot(in_ref[pl.ds(row0, chunk_rows), :], w_in,
                                   preferred_element_type=jnp.float32)
                           + b_ref[layer])        # [Tc*Bp, 4Hp] f32

            def step(t, hc):
                h, c = hc
                r = pl.multiple_of(t * Bp, Bp)
                # W_hh read from VMEM every step (cheap vld), not held in vregs.
                gates = (jnp.dot(h.astype(jnp.bfloat16), whh_ref[layer],
                                 preferred_element_type=jnp.float32)
                         + gx_ref[pl.ds(r, Bp), :])            # [Bp, 4Hp] f32
                # gate order (i, f, o, g): one wide sigmoid + one tanh (EUP).
                sig = jax.nn.sigmoid(gates[:, : 3 * Hp])
                g_g = jnp.tanh(gates[:, 3 * Hp:])
                i_g = sig[:, 0 * Hp:1 * Hp]
                f_g = sig[:, 1 * Hp:2 * Hp]
                o_g = sig[:, 2 * Hp:3 * Hp]
                c_new = f_g * c + i_g * g_g
                h_new = o_g * jnp.tanh(c_new)
                dst_ref[pl.ds(pl.multiple_of(row0 + r, Bp), Bp), :] = (
                    h_new.astype(jnp.bfloat16))
                return (h_new, c_new)

            return lax.fori_loop(0, Tc, step, (h, c), unroll=unroll)

        lax.fori_loop(0, NC, chunk_body, (h0_ref[layer], c0_ref[layer]))


def lstm_stack_pallas(emb2d, h0p, c0p, wih0, wihr, whh, bias,
                      *, T, Bp, Hp, num_layers, max_chunk_rows=1024):
    TB, Ep = emb2d.shape
    L = num_layers

    # Time chunking bounds the f32 gate scratch independent of T.
    tc = T
    if T * Bp > max_chunk_rows:
        limit = max(1, max_chunk_rows // Bp)
        tc = max(d for d in range(1, limit + 1) if T % d == 0)
    nc = T // tc

    need = (_nbytes((TB, Ep), jnp.bfloat16)
            + 2 * _nbytes((L, Bp, Hp), jnp.float32)
            + _nbytes(wih0.shape, jnp.bfloat16)
            + _nbytes(wihr.shape, jnp.bfloat16)
            + _nbytes(whh.shape, jnp.bfloat16)
            + _nbytes((L, 8, 4 * Hp), jnp.float32)
            + 2 * _nbytes((TB, Hp), jnp.bfloat16)          # out + seq scratch
            + _nbytes((tc * Bp, 4 * Hp), jnp.float32))     # gx scratch

    vmem_spec = pl.BlockSpec(memory_space=pltpu.MemorySpace.VMEM)
    kernel = functools.partial(_lstm_kernel, L, tc, nc, Bp, Hp)
    return pl.pallas_call(
        kernel,
        out_shape=jax.ShapeDtypeStruct((TB, Hp), jnp.bfloat16),
        in_specs=[vmem_spec] * 7,
        out_specs=vmem_spec,
        scratch_shapes=[pltpu.VMEM((TB, Hp), jnp.bfloat16),
                        pltpu.VMEM((tc * Bp, 4 * Hp), jnp.float32)],
        compiler_params=pltpu.CompilerParams(vmem_limit_bytes=_vmem_limit(need)),
    )(emb2d, h0p, c0p, wih0, wihr, whh, bias)


# -----------------------------------------------------------------------------
# Kernel 2: vocab projection, tiled over (row tiles, 256-wide vocab tiles).
# -----------------------------------------------------------------------------
def _proj_kernel(h_ref, w_ref, b_ref, o_ref):
    o_ref[...] = (jnp.dot(h_ref[...], w_ref[...],
                          preferred_element_type=jnp.float32)
                  + b_ref[...])


def vocab_projection_pallas(hseq, wout, bout, *, tv=256, max_tr=512):
    TB, Hp = hseq.shape
    Vp = wout.shape[1]
    assert Vp % tv == 0
    nv = Vp // tv
    tr = TB
    if TB > max_tr:
        tr = max(d for d in range(16, max_tr + 1, 16) if TB % d == 0)
    nr = TB // tr

    need = 2 * (_nbytes((tr, Hp), jnp.bfloat16)
                + _nbytes((Hp, tv), jnp.bfloat16)
                + _nbytes((8, tv), jnp.float32)
                + _nbytes((tr, tv), jnp.float32))

    return pl.pallas_call(
        _proj_kernel,
        out_shape=jax.ShapeDtypeStruct((TB, Vp), jnp.float32),
        grid=(nr, nv),
        in_specs=[pl.BlockSpec((tr, Hp), lambda r, v: (r, 0)),
                  pl.BlockSpec((Hp, tv), lambda r, v: (0, v)),
                  pl.BlockSpec((1, tv), lambda r, v: (0, v))],
        out_specs=pl.BlockSpec((tr, tv), lambda r, v: (r, v)),
        compiler_params=pltpu.CompilerParams(
            dimension_semantics=("parallel", "parallel"),
            vmem_limit_bytes=_vmem_limit(need)),
    )(hseq, wout, bout)


# -----------------------------------------------------------------------------
# Parameter containers: raw (PyTorch layout) + packed (kernel layout).
# -----------------------------------------------------------------------------
def init_params(key, num_embeddings, embedding_dim, hidden_size, num_layers):
    ks = jax.random.split(key, 3 + 4 * num_layers)
    k = 1.0 / jnp.sqrt(jnp.asarray(hidden_size, jnp.float32))

    emb_table = jax.random.normal(ks[0], (num_embeddings, embedding_dim),
                                  jnp.float32)
    emb_table = emb_table.at[3].set(0.0)     # padding_idx=3 row is zero at init

    w_ih, w_hh, b_ih, b_hh = [], [], [], []
    for l in range(num_layers):
        in_dim = embedding_dim if l == 0 else hidden_size
        w_ih.append(jax.random.uniform(ks[3 + 4 * l], (4 * hidden_size, in_dim),
                                       jnp.float32, -k, k))
        w_hh.append(jax.random.uniform(ks[4 + 4 * l],
                                       (4 * hidden_size, hidden_size),
                                       jnp.float32, -k, k))
        b_ih.append(jax.random.uniform(ks[5 + 4 * l], (4 * hidden_size,),
                                       jnp.float32, -k, k))
        b_hh.append(jax.random.uniform(ks[6 + 4 * l], (4 * hidden_size,),
                                       jnp.float32, -k, k))

    w_out = jax.random.uniform(ks[1], (num_embeddings, hidden_size),
                               jnp.float32, -k, k)
    b_out = jax.random.uniform(ks[2], (num_embeddings,), jnp.float32, -k, k)

    return {"embedding": emb_table, "w_ih": w_ih, "w_hh": w_hh,
            "b_ih": b_ih, "b_hh": b_hh, "w_out": w_out, "b_out": b_out}


def pack_params(raw, num_layers, tv=256):
    """PyTorch-layout params -> padded, gate-reordered (i,f,o,g), bf16 kernel params."""
    emb = raw["embedding"]
    V, E = emb.shape
    H = raw["w_hh"][0].shape[1]
    Hp = _round_up(H, 128)
    Ep = _round_up(E, 128)
    Vp = _round_up(V, tv)

    def gate_pack(w_t, in_dim, in_pad):
        # w_t: [in_dim, 4H] (PyTorch gate order i,f,g,o along the 4H axis).
        i = w_t[:, 0 * H:1 * H]
        f = w_t[:, 1 * H:2 * H]
        g = w_t[:, 2 * H:3 * H]
        o = w_t[:, 3 * H:4 * H]
        blocks = [jnp.pad(b, ((0, in_pad - in_dim), (0, Hp - H)))
                  for b in (i, f, o, g)]
        return jnp.concatenate(blocks, axis=1)             # [in_pad, 4Hp]

    wih0 = gate_pack(raw["w_ih"][0].T, E, Ep)                          # [Ep, 4Hp]
    wihr = [gate_pack(raw["w_ih"][l].T, H, Hp) for l in range(1, num_layers)]
    if not wihr:
        wihr = [jnp.zeros((Hp, 4 * Hp), jnp.float32)]                  # unused dummy
    whh = [gate_pack(raw["w_hh"][l].T, H, Hp) for l in range(num_layers)]
    bias = [gate_pack((raw["b_ih"][l] + raw["b_hh"][l])[None, :], 1, 1)
            for l in range(num_layers)]

    wout = jnp.pad(raw["w_out"].T, ((0, Hp - H), (0, Vp - V)))         # [Hp, Vp]
    bout = jnp.pad(raw["b_out"][None, :], ((0, 0), (0, Vp - V)))       # [1, Vp]

    return {
        "embedding": emb,                                    # f32, for the gather
        "wih0": wih0.astype(jnp.bfloat16),                   # [Ep, 4Hp]
        "wihr": jnp.stack(wihr).astype(jnp.bfloat16),        # [max(L-1,1), Hp, 4Hp]
        "whh": jnp.stack(whh).astype(jnp.bfloat16),          # [L, Hp, 4Hp]
        "bias": jnp.stack(bias).astype(jnp.float32),         # [L, 1, 4Hp]
        "wout": wout.astype(jnp.bfloat16),                   # [Hp, Vp]
        "bout": bout.astype(jnp.float32),                    # [1, Vp]
        "dims": {"E": E, "H": H, "V": V, "Ep": Ep, "Hp": Hp, "Vp": Vp,
                 "L": num_layers, "tv": tv},
    }


def seq2seq_decoder_forward(packed, x_tokens, decoder_hidden):
    """x_tokens: int32 [B, T]; decoder_hidden: (h0, c0) each [L, B, H] -> [B, T, V]."""
    d = packed["dims"]
    h0, c0 = decoder_hidden
    B, T = x_tokens.shape
    Bp = _round_up(max(B, 16), 16)            # >=16 sublanes (bf16-packed rows)

    embed = packed["embedding"][x_tokens]                 # [B, T, E] gather = glue
    emb_tbe = jnp.transpose(embed, (1, 0, 2))             # [T, B, E] time-major
    emb_tbe = jnp.pad(emb_tbe, ((0, 0), (0, Bp - B), (0, d["Ep"] - d["E"])))
    emb2d = emb_tbe.reshape(T * Bp, d["Ep"]).astype(jnp.bfloat16)

    h0p = jnp.pad(h0, ((0, 0), (0, Bp - B), (0, d["Hp"] - d["H"])))
    c0p = jnp.pad(c0, ((0, 0), (0, Bp - B), (0, d["Hp"] - d["H"])))

    hseq = lstm_stack_pallas(emb2d, h0p, c0p,
                             packed["wih0"], packed["wihr"],
                             packed["whh"], packed["bias"],
                             T=T, Bp=Bp, Hp=d["Hp"], num_layers=d["L"])

    logits2d = vocab_projection_pallas(hseq, packed["wout"], packed["bout"],
                                       tv=d["tv"])

    logits = logits2d.reshape(T, Bp, d["Vp"])[:, :B, :d["V"]]
    return jnp.transpose(logits, (1, 0, 2))               # [B, T, V]


# -----------------------------------------------------------------------------
# Pure-JAX reference (PyTorch math; matmul operands rounded to bf16 to mirror
# the kernel's mixed precision — elementwise/accumulation in f32).
# -----------------------------------------------------------------------------
def reference_forward(raw, x_tokens, decoder_hidden, num_layers):
    bf = lambda a: a.astype(jnp.bfloat16).astype(jnp.float32)
    h0, c0 = decoder_hidden
    H = h0.shape[2]
    embed = raw["embedding"][x_tokens]                    # [B, T, E]
    seq = jnp.transpose(embed, (1, 0, 2))                 # [T, B, E]
    T = seq.shape[0]
    for l in range(num_layers):
        w_ih, w_hh = raw["w_ih"][l], raw["w_hh"][l]
        b = raw["b_ih"][l] + raw["b_hh"][l]
        h, c = h0[l], c0[l]
        outs = []
        for t in range(T):
            gates = bf(seq[t]) @ bf(w_ih.T) + bf(h) @ bf(w_hh.T) + b
            i_g = jax.nn.sigmoid(gates[:, 0 * H:1 * H])
            f_g = jax.nn.sigmoid(gates[:, 1 * H:2 * H])
            g_g = jnp.tanh(gates[:, 2 * H:3 * H])
            o_g = jax.nn.sigmoid(gates[:, 3 * H:4 * H])
            c = f_g * c + i_g * g_g
            h = o_g * jnp.tanh(c)
            outs.append(h)
        seq = jnp.stack(outs)
    logits = bf(seq) @ bf(raw["w_out"].T) + raw["b_out"]  # [T, B, V]
    return jnp.transpose(logits, (1, 0, 2))


if __name__ == "__main__":
    # Small shapes consistent with the module's forward.
    B, T = 2, 8
    NUM_EMBEDDINGS = 64          # decoder_num_embeddings (vocab)
    EMBED_DIM = 32               # decoder_embedding_dim
    HIDDEN = 32                  # decoder_hidden_size
    NUM_LAYERS = 2               # decoder_num_layers

    key = jax.random.PRNGKey(0)
    k_par, k_tok, k_h, k_c = jax.random.split(key, 4)

    raw = init_params(k_par, NUM_EMBEDDINGS, EMBED_DIM, HIDDEN, NUM_LAYERS)
    packed = pack_params(raw, NUM_LAYERS)

    x_tokens = jax.random.randint(k_tok, (B, T), 0, NUM_EMBEDDINGS, jnp.int32)
    h0 = jax.random.normal(k_h, (NUM_LAYERS, B, HIDDEN), jnp.float32)
    c0 = jax.random.normal(k_c, (NUM_LAYERS, B, HIDDEN), jnp.float32)

    logits = seq2seq_decoder_forward(packed, x_tokens, (h0, c0))
    logits = jax.block_until_ready(logits)
    assert logits.shape == (B, T, NUM_EMBEDDINGS), logits.shape

    ref = reference_forward(raw, x_tokens, (h0, c0), NUM_LAYERS)
    max_err = float(jnp.max(jnp.abs(logits - ref)))
    assert jnp.allclose(logits, ref, atol=5e-3, rtol=5e-3), max_err

    print("KERNEL_OK")
</pallas_src>

<mosaic_0001>
module attributes {stable_mosaic.version = 11 : i64} {
  func.func @_lstm_kernel(%arg0: memref<128x128xbf16, #tpu.memory_space<vmem>>, %arg1: memref<2x16x128xf32, #tpu.memory_space<vmem>>, %arg2: memref<2x16x128xf32, #tpu.memory_space<vmem>>, %arg3: memref<128x512xbf16, #tpu.memory_space<vmem>>, %arg4: memref<1x128x512xbf16, #tpu.memory_space<vmem>>, %arg5: memref<2x128x512xbf16, #tpu.memory_space<vmem>>, %arg6: memref<2x1x512xf32, #tpu.memory_space<vmem>>, %arg7: memref<128x128xbf16, #tpu.memory_space<vmem>>, %arg8: memref<128x128xbf16, #tpu.memory_space<vmem>>, %arg9: memref<128x512xf32, #tpu.memory_space<vmem>>) attributes {dimension_semantics = [], scalar_prefetch = 0 : i64, scratch_operands = 2 : i64, tpu.core_type = #tpu.core_type<tc>} {
    %c0 = arith.constant 0 : index
    %c0_0 = arith.constant 0 : index
    %c0_1 = arith.constant 0 : index
    %0 = vector.load %arg1[%c0, %c0_0, %c0_1] : memref<2x16x128xf32, #tpu.memory_space<vmem>>, vector<1x16x128xf32>
    %1 = vector.shape_cast %0 : vector<1x16x128xf32> to vector<16x128xf32>
    %c0_2 = arith.constant 0 : index
    %c0_3 = arith.constant 0 : index
    %c0_4 = arith.constant 0 : index
    %2 = vector.load %arg2[%c0_2, %c0_3, %c0_4] : memref<2x16x128xf32, #tpu.memory_space<vmem>>, vector<1x16x128xf32>
    %3 = vector.shape_cast %2 : vector<1x16x128xf32> to vector<16x128xf32>
    %c0_i32 = arith.constant 0 : i32
    %c128_i32 = arith.constant 128 : i32
    %4 = arith.muli %c0_i32, %c128_i32 : i32
    %5 = tpu.assume_multiple %4, 16 : i32
    %c0_5 = arith.constant 0 : index
    %c0_6 = arith.constant 0 : index
    %6 = vector.load %arg3[%c0_5, %c0_6] : memref<128x512xbf16, #tpu.memory_space<vmem>>, vector<128x512xbf16>
    %7 = arith.index_cast %5 : i32 to index
    %c0_7 = arith.constant 0 : index
    %8 = vector.load %arg0[%7, %c0_7] : memref<128x128xbf16, #tpu.memory_space<vmem>>, vector<128x128xbf16>
    %cst = arith.constant dense<0.000000e+00> : vector<128x512xf32>
    %9 = tpu.matmul %8, %6, %cst {dimension_numbers = #tpu.dot_dimension_numbers<[1], [0], [0], [1], [0, 0, 1, 1], [], []>} : vector<128x128xbf16>, vector<128x512xbf16>, vector<128x512xf32> -> vector<128x512xf32>
    %c0_8 = arith.constant 0 : index
    %c0_9 = arith.constant 0 : index
    %c0_10 = arith.constant 0 : index
    %10 = vector.load %arg6[%c0_8, %c0_9, %c0_10] : memref<2x1x512xf32, #tpu.memory_space<vmem>>, vector<1x1x512xf32>
    %11 = vector.shape_cast %10 : vector<1x1x512xf32> to vector<1x512xf32>
    %12 = vector.broadcast %11 : vector<1x512xf32> to vector<128x512xf32>
    %13 = arith.addf %9, %12 : vector<128x512xf32>
    %c0_11 = arith.constant 0 : index
    %c0_12 = arith.constant 0 : index
    %14 = vector.load %arg9[%c0_11, %c0_12] : memref<128x512xf32, #tpu.memory_space<vmem>>, vector<128x512xf32>
    tpu.vector_store %arg9[%c0_11, %c0_12], %13 {strides = array<i32>} : memref<128x512xf32, #tpu.memory_space<vmem>>, vector<128x512xf32>,
    %c0_i32_13 = arith.constant 0 : i32
    %c16_i32 = arith.constant 16 : i32
    %15 = arith.muli %c0_i32_13, %c16_i32 : i32
    %16 = tpu.assume_multiple %15, 16 : i32
    %17 = arith.truncf %1 : vector<16x128xf32> to vector<16x128xbf16>
    %c0_14 = arith.constant 0 : index
    %c0_15 = arith.constant 0 : index
    %c0_16 = arith.constant 0 : index
    %18 = vector.load %arg5[%c0_14, %c0_15, %c0_16] : memref<2x128x512xbf16, #tpu.memory_space<vmem>>, vector<1x128x512xbf16>
    %19 = vector.shape_cast %18 : vector<1x128x512xbf16> to vector<128x512xbf16>
    %cst_17 = arith.constant dense<0.000000e+00> : vector<16x512xf32>
    %20 = tpu.matmul %17, %19, %cst_17 {dimension_numbers = #tpu.dot_dimension_numbers<[1], [0], [0], [1], [0, 0, 1, 1], [], []>} : vector<16x128xbf16>, vector<128x512xbf16>, vector<16x512xf32> -> vector<16x512xf32>
    %21 = arith.index_cast %16 : i32 to index
    %c0_18 = arith.constant 0 : index
    %22 = vector.load %arg9[%21, %c0_18] : memref<128x512xf32, #tpu.memory_space<vmem>>, vector<16x512xf32>
    %23 = arith.addf %20, %22 : vector<16x512xf32>
    %24 = vector.extract_strided_slice %23 {offsets = [0, 0], sizes = [16, 384], strides = [1, 1]} : vector<16x512xf32> to vector<16x384xf32>
    %25 = arith.negf %24 : vector<16x384xf32>
    %26 = math.exp %25 : vector<16x384xf32>
    %cst_19 = arith.constant 1.000000e+00 : f32
    %27 = vector.broadcast %cst_19 : f32 to vector<16x384xf32>
    %28 = arith.addf %27, %26 : vector<16x384xf32>
    %29 = arith.divf %27, %28 : vector<16x384xf32>
    %30 = vector.extract_strided_slice %23 {offsets = [0, 384], sizes = [16, 128], strides = [1, 1]} : vector<16x512xf32> to vector<16x128xf32>
    %31 = math.tanh %30 : vector<16x128xf32>
    %32 = vector.extract_strided_slice %29 {offsets = [0, 0], sizes = [16, 128], strides = [1, 1]} : vector<16x384xf32> to vector<16x128xf32>
    %33 = vector.extract_strided_slice %29 {offsets = [0, 128], sizes = [16, 128], strides = [1, 1]} : vector<16x384xf32> to vector<16x128xf32>
    %34 = vector.extract_strided_slice %29 {offsets = [0, 256], sizes = [16, 128], strides = [1, 1]} : vector<16x384xf32> to vector<16x128xf32>
    %35 = arith.mulf %33, %3 : vector<16x128xf32>
    %36 = arith.mulf %32, %31 : vector<16x128xf32>
    %37 = arith.addf %35, %36 : vector<16x128xf32>
    %38 = math.tanh %37 : vector<16x128xf32>
    %39 = arith.mulf %34, %38 : vector<16x128xf32>
    %40 = arith.truncf %39 : vector<16x128xf32> to vector<16x128xbf16>
    %41 = arith.addi %5, %16 : i32
    %42 = tpu.assume_multiple %41, 16 : i32
    %43 = arith.index_cast %42 : i32 to index
    %c0_20 = arith.constant 0 : index
    %44 = vector.load %arg8[%43, %c0_20] : memref<128x128xbf16, #tpu.memory_space<vmem>>, vector<16x128xbf16>
    tpu.vector_store %arg8[%43, %c0_20], %40 {strides = array<i32>} : memref<128x128xbf16, #tpu.memory_space<vmem>>, vector<16x128xbf16>,
    %c1_i32 = arith.constant 1 : i32
    %c16_i32_21 = arith.constant 16 : i32
    %45 = arith.muli %c1_i32, %c16_i32_21 : i32
    %46 = tpu.assume_multiple %45, 16 : i32
    %47 = arith.truncf %39 : vector<16x128xf32> to vector<16x128xbf16>
    %c0_22 = arith.constant 0 : index
    %c0_23 = arith.constant 0 : index
    %c0_24 = arith.constant 0 : index
    %48 = vector.load %arg5[%c0_22, %c0_23, %c0_24] : memref<2x128x512xbf16, #tpu.memory_space<vmem>>, vector<1x128x512xbf16>
    %49 = vector.shape_cast %48 : vector<1x128x512xbf16> to vector<128x512xbf16>
    %cst_25 = arith.constant dense<0.000000e+00> : vector<16x512xf32>
    %50 = tpu.matmul %47, %49, %cst_25 {dimension_numbers = #tpu.dot_dimension_numbers<[1], [0], [0], [1], [0, 0, 1, 1], [], []>} : vector<16x128xbf16>, vector<128x512xbf16>, vector<16x512xf32> -> vector<16x512xf32>
    %51 = arith.index_cast %46 : i32 to index
    %c0_26 = arith.constant 0 : index
    %52 = vector.load %arg9[%51, %c0_26] : memref<128x512xf32, #tpu.memory_space<vmem>>, vector<16x512xf32>
    %53 = arith.addf %50, %52 : vector<16x512xf32>
    %54 = vector.extract_strided_slice %53 {offsets = [0, 0], sizes = [16, 384], strides = [1, 1]} : vector<16x512xf32> to vector<16x384xf32>
    %55 = arith.negf %54 : vector<16x384xf32>
    %56 = math.exp %55 : vector<16x384xf32>
    %cst_27 = arith.constant 1.000000e+00 : f32
    %57 = vector.broadcast %cst_27 : f32 to vector<16x384xf32>
    %58 = arith.addf %57, %56 : vector<16x384xf32>
    %59 = arith.divf %57, %58 : vector<16x384xf32>
    %60 = vector.extract_strided_slice %53 {offsets = [0, 384], sizes = [16, 128], strides = [1, 1]} : vector<16x512xf32> to vector<16x128xf32>
    %61 = math.tanh %60 : vector<16x128xf32>
    %62 = vector.extract_strided_slice %59 {offsets = [0, 0], sizes = [16, 128], strides = [1, 1]} : vector<16x384xf32> to vector<16x128xf32>
    %63 = vector.extract_strided_slice %59 {offsets = [0, 128], sizes = [16, 128], strides = [1, 1]} : vector<16x384xf32> to vector<16x128xf32>
    %64 = vector.extract_strided_slice %59 {offsets = [0, 256], sizes = [16, 128], strides = [1, 1]} : vector<16x384xf32> to vector<16x128xf32>
    %65 = arith.mulf %63, %37 : vector<16x128xf32>
    %66 = arith.mulf %62, %61 : vector<16x128xf32>
    %67 = arith.addf %65, %66 : vector<16x128xf32>
    %68 = math.tanh %67 : vector<16x128xf32>
    %69 = arith.mulf %64, %68 : vector<16x128xf32>
    %70 = arith.truncf %69 : vector<16x128xf32> to vector<16x128xbf16>
    %71 = arith.addi %5, %46 : i32
    %72 = tpu.assume_multiple %71, 16 : i32
    %73 = arith.index_cast %72 : i32 to index
    %c0_28 = arith.constant 0 : index
    %74 = vector.load %arg8[%73, %c0_28] : memref<128x128xbf16, #tpu.memory_space<vmem>>, vector<16x128xbf16>
    tpu.vector_store %arg8[%73, %c0_28], %70 {strides = array<i32>} : memref<128x128xbf16, #tpu.memory_space<vmem>>, vector<16x128xbf16>,
    %c2_i32 = arith.constant 2 : i32
    %c16_i32_29 = arith.constant 16 : i32
    %75 = arith.muli %c2_i32, %c16_i32_29 : i32
    %76 = tpu.assume_multiple %75, 16 : i32
    %77 = arith.truncf %69 : vector<16x128xf32> to vector<16x128xbf16>
    %c0_30 = arith.constant 0 : index
    %c0_31 = arith.constant 0 : index
    %c0_32 = arith.constant 0 : index
    %78 = vector.load %arg5[%c0_30, %c0_31, %c0_32] : memref<2x128x512xbf16, #tpu.memory_space<vmem>>, vector<1x128x512xbf16>
    %79 = vector.shape_cast %78 : vector<1x128x512xbf16> to vector<128x512xbf16>
    %cst_33 = arith.constant dense<0.000000e+00> : vector<16x512xf32>
    %80 = tpu.matmul %77, %79, %cst_33 {dimension_numbers = #tpu.dot_dimension_numbers<[1], [0], [0], [1], [0, 0, 1, 1], [], []>} : vector<16x128xbf16>, vector<128x512xbf16>, vector<16x512xf32> -> vector<16x512xf32>
    %81 = arith.index_cast %76 : i32 to index
    %c0_34 = arith.constant 0 : index
    %82 = vector.load %arg9[%81, %c0_34] : memref<128x512xf32, #tpu.memory_space<vmem>>, vector<16x512xf32>
    %83 = arith.addf %80, %82 : vector<16x512xf32>
    %84 = vector.extract_strided_slice %83 {offsets = [0, 0], sizes = [16, 384], strides = [1, 1]} : vector<16x512xf32> to vector<16x384xf32>
    %85 = arith.negf %84 : vector<16x384xf32>
    %86 = math.exp %85 : vector<16x384xf32>
    %cst_35 = arith.constant 1.000000e+00 : f32
    %87 = vector.broadcast %cst_35 : f32 to vector<16x384xf32>
    %88 = arith.addf %87, %86 : vector<16x384xf32>
    %89 = arith.divf %87, %88 : vector<16x384xf32>
    %90 = vector.extract_strided_slice %83 {offsets = [0, 384], sizes = [16, 128], strides = [1, 1]} : vector<16x512xf32> to vector<16x128xf32>
    %91 = math.tanh %90 : vector<16x128xf32>
    %92 = vector.extract_strided_slice %89 {offsets = [0, 0], sizes = [16, 128], strides = [1, 1]} : vector<16x384xf32> to vector<16x128xf32>
    %93 = vector.extract_strided_slice %89 {offsets = [0, 128], sizes = [16, 128], strides = [1, 1]} : vector<16x384xf32> to vector<16x128xf32>
    %94 = vector.extract_strided_slice %89 {offsets = [0, 256], sizes = [16, 128], strides = [1, 1]} : vector<16x384xf32> to vector<16x128xf32>
    %95 = arith.mulf %93, %67 : vector<16x128xf32>
    %96 = arith.mulf %92, %91 : vector<16x128xf32>
    %97 = arith.addf %95, %96 : vector<16x128xf32>
    %98 = math.tanh %97 : vector<16x128xf32>
    %99 = arith.mulf %94, %98 : vector<16x128xf32>
    %100 = arith.truncf %99 : vector<16x128xf32> to vector<16x128xbf16>
    %101 = arith.addi %5, %76 : i32
    %102 = tpu.assume_multiple %101, 16 : i32
    %103 = arith.index_cast %102 : i32 to index
    %c0_36 = arith.constant 0 : index
    %104 = vector.load %arg8[%103, %c0_36] : memref<128x128xbf16, #tpu.memory_space<vmem>>, vector<16x128xbf16>
    tpu.vector_store %arg8[%103, %c0_36], %100 {strides = array<i32>} : memref<128x128xbf16, #tpu.memory_space<vmem>>, vector<16x128xbf16>,
    %c3_i32 = arith.constant 3 : i32
    %c16_i32_37 = arith.constant 16 : i32
    %105 = arith.muli %c3_i32, %c16_i32_37 : i32
    %106 = tpu.assume_multiple %105, 16 : i32
    %107 = arith.truncf %99 : vector<16x128xf32> to vector<16x128xbf16>
    %c0_38 = arith.constant 0 : index
    %c0_39 = arith.constant 0 : index
    %c0_40 = arith.constant 0 : index
    %108 = vector.load %arg5[%c0_38, %c0_39, %c0_40] : memref<2x128x512xbf16, #tpu.memory_space<vmem>>, vector<1x128x512xbf16>
    %109 = vector.shape_cast %108 : vector<1x128x512xbf16> to vector<128x512xbf16>
    %cst_41 = arith.constant dense<0.000000e+00> : vector<16x512xf32>
    %110 = tpu.matmul %107, %109, %cst_41 {dimension_numbers = #tpu.dot_dimension_numbers<[1], [0], [0], [1], [0, 0, 1, 1], [], []>} : vector<16x128xbf16>, vector<128x512xbf16>, vector<16x512xf32> -> vector<16x512xf32>
    %111 = arith.index_cast %106 : i32 to index
    %c0_42 = arith.constant 0 : index
    %112 = vector.load %arg9[%111, %c0_42] : memref<128x512xf32, #tpu.memory_space<vmem>>, vector<16x512xf32>
    %113 = arith.addf %110, %112 : vector<16x512xf32>
    %114 = vector.extract_strided_slice %113 {offsets = [0, 0], sizes = [16, 384], strides = [1, 1]} : vector<16x512xf32> to vector<16x384xf32>
    %115 = arith.negf %114 : vector<16x384xf32>
    %116 = math.exp %115 : vector<16x384xf32>
    %cst_43 = arith.constant 1.000000e+00 : f32
    %117 = vector.broadcast %cst_43 : f32 to vector<16x384xf32>
    %118 = arith.addf %117, %116 : vector<16x384xf32>
    %119 = arith.divf %117, %118 : vector<16x384xf32>
    %120 = vector.extract_strided_slice %113 {offsets = [0, 384], sizes = [16, 128], strides = [1, 1]} : vector<16x512xf32> to vector<16x128xf32>
    %121 = math.tanh %120 : vector<16x128xf32>
    %122 = vector.extract_strided_slice %119 {offsets = [0, 0], sizes = [16, 128], strides = [1, 1]} : vector<16x384xf32> to vector<16x128xf32>
    %123 = vector.extract_strided_slice %119 {offsets = [0, 128], sizes = [16, 128], strides = [1, 1]} : vector<16x384xf32> to vector<16x128xf32>
    %124 = vector.extract_strided_slice %119 {offsets = [0, 256], sizes = [16, 128], strides = [1, 1]} : vector<16x384xf32> to vector<16x128xf32>
    %125 = arith.mulf %123, %97 : vector<16x128xf32>
    %126 = arith.mulf %122, %121 : vector<16x128xf32>
    %127 = arith.addf %125, %126 : vector<16x128xf32>
    %128 = math.tanh %127 : vector<16x128xf32>
    %129 = arith.mulf %124, %128 : vector<16x128xf32>
    %130 = arith.truncf %129 : vector<16x128xf32> to vector<16x128xbf16>
    %131 = arith.addi %5, %106 : i32
    %132 = tpu.assume_multiple %131, 16 : i32
    %133 = arith.index_cast %132 : i32 to index
    %c0_44 = arith.constant 0 : index
    %134 = vector.load %arg8[%133, %c0_44] : memref<128x128xbf16, #tpu.memory_space<vmem>>, vector<16x128xbf16>
    tpu.vector_store %arg8[%133, %c0_44], %130 {strides = array<i32>} : memref<128x128xbf16, #tpu.memory_space<vmem>>, vector<16x128xbf16>,
    %c4_i32 = arith.constant 4 : i32
    %c16_i32_45 = arith.constant 16 : i32
    %135 = arith.muli %c4_i32, %c16_i32_45 : i32
    %136 = tpu.assume_multiple %135, 16 : i32
    %137 = arith.truncf %129 : vector<16x128xf32> to vector<16x128xbf16>
    %c0_46 = arith.constant 0 : index
    %c0_47 = arith.constant 0 : index
    %c0_48 = arith.constant 0 : index
    %138 = vector.load %arg5[%c0_46, %c0_47, %c0_48] : memref<2x128x512xbf16, #tpu.memory_space<vmem>>, vector<1x128x512xbf16>
    %139 = vector.shape_cast %138 : vector<1x128x512xbf16> to vector<128x512xbf16>
    %cst_49 = arith.constant dense<0.000000e+00> : vector<16x512xf32>
    %140 = tpu.matmul %137, %139, %cst_49 {dimension_numbers = #tpu.dot_dimension_numbers<[1], [0], [0], [1], [0, 0, 1, 1], [], []>} : vector<16x128xbf16>, vector<128x512xbf16>, vector<16x512xf32> -> vector<16x512xf32>
    %141 = arith.index_cast %136 : i32 to index
    %c0_50 = arith.constant 0 : index
    %142 = vector.load %arg9[%141, %c0_50] : memref<128x512xf32, #tpu.memory_space<vmem>>, vector<16x512xf32>
    %143 = arith.addf %140, %142 : vector<16x512xf32>
    %144 = vector.extract_strided_slice %143 {offsets = [0, 0], sizes = [16, 384], strides = [1, 1]} : vector<16x512xf32> to vector<16x384xf32>
    %145 = arith.negf %144 : vector<16x384xf32>
    %146 = math.exp %145 : vector<16x384xf32>
    %cst_51 = arith.constant 1.000000e+00 : f32
    %147 = vector.broadcast %cst_51 : f32 to vector<16x384xf32>
    %148 = arith.addf %147, %146 : vector<16x384xf32>
    %149 = arith.divf %147, %148 : vector<16x384xf32>
    %150 = vector.extract_strided_slice %143 {offsets = [0, 384], sizes = [16, 128], strides = [1, 1]} : vector<16x512xf32> to vector<16x128xf32>
    %151 = math.tanh %150 : vector<16x128xf32>
    %152 = vector.extract_strided_slice %149 {offsets = [0, 0], sizes = [16, 128], strides = [1, 1]} : vector<16x384xf32> to vector<16x128xf32>
    %153 = vector.extract_strided_slice %149 {offsets = [0, 128], sizes = [16, 128], strides = [1, 1]} : vector<16x384xf32> to vector<16x128xf32>
    %154 = vector.extract_strided_slice %149 {offsets = [0, 256], sizes = [16, 128], strides = [1, 1]} : vector<16x384xf32> to vector<16x128xf32>
    %155 = arith.mulf %153, %127 : vector<16x128xf32>
    %156 = arith.mulf %152, %151 : vector<16x128xf32>
    %157 = arith.addf %155, %156 : vector<16x128xf32>
    %158 = math.tanh %157 : vector<16x128xf32>
    %159 = arith.mulf %154, %158 : vector<16x128xf32>
    %160 = arith.truncf %159 : vector<16x128xf32> to vector<16x128xbf16>
    %161 = arith.addi %5, %136 : i32
    %162 = tpu.assume_multiple %161, 16 : i32
    %163 = arith.index_cast %162 : i32 to index
    %c0_52 = arith.constant 0 : index
    %164 = vector.load %arg8[%163, %c0_52] : memref<128x128xbf16, #tpu.memory_space<vmem>>, vector<16x128xbf16>
    tpu.vector_store %arg8[%163, %c0_52], %160 {strides = array<i32>} : memref<128x128xbf16, #tpu.memory_space<vmem>>, vector<16x128xbf16>,
    %c5_i32 = arith.constant 5 : i32
    %c16_i32_53 = arith.constant 16 : i32
    %165 = arith.muli %c5_i32, %c16_i32_53 : i32
    %166 = tpu.assume_multiple %165, 16 : i32
    %167 = arith.truncf %159 : vector<16x128xf32> to vector<16x128xbf16>
    %c0_54 = arith.constant 0 : index
    %c0_55 = arith.constant 0 : index
    %c0_56 = arith.constant 0 : index
    %168 = vector.load %arg5[%c0_54, %c0_55, %c0_56] : memref<2x128x512xbf16, #tpu.memory_space<vmem>>, vector<1x128x512xbf16>
    %169 = vector.shape_cast %168 : vector<1x128x512xbf16> to vector<128x512xbf16>
    %cst_57 = arith.constant dense<0.000000e+00> : vector<16x512xf32>
    %170 = tpu.matmul %167, %169, %cst_57 {dimension_numbers = #tpu.dot_dimension_numbers<[1], [0], [0], [1], [0, 0, 1, 1], [], []>} : vector<16x128xbf16>, vector<128x512xbf16>, vector<16x512xf32> -> vector<16x512xf32>
    %171 = arith.index_cast %166 : i32 to index
    %c0_58 = arith.constant 0 : index
    %172 = vector.load %arg9[%171, %c0_58] : memref<128x512xf32, #tpu.memory_space<vmem>>, vector<16x512xf32>
    %173 = arith.addf %170, %172 : vector<16x512xf32>
    %174 = vector.extract_strided_slice %173 {offsets = [0, 0], sizes = [16, 384], strides = [1, 1]} : vector<16x512xf32> to vector<16x384xf32>
    %175 = arith.negf %174 : vector<16x384xf32>
    %176 = math.exp %175 : vector<16x384xf32>
    %cst_59 = arith.constant 1.000000e+00 : f32
    %177 = vector.broadcast %cst_59 : f32 to vector<16x384xf32>
    %178 = arith.addf %177, %176 : vector<16x384xf32>
    %179 = arith.divf %177, %178 : vector<16x384xf32>
    %180 = vector.extract_strided_slice %173 {offsets = [0, 384], sizes = [16, 128], strides = [1, 1]} : vector<16x512xf32> to vector<16x128xf32>
    %181 = math.tanh %180 : vector<16x128xf32>
    %182 = vector.extract_strided_slice %179 {offsets = [0, 0], sizes = [16, 128], strides = [1, 1]} : vector<16x384xf32> to vector<16x128xf32>
    %183 = vector.extract_strided_slice %179 {offsets = [0, 128], sizes = [16, 128], strides = [1, 1]} : vector<16x384xf32> to vector<16x128xf32>
    %184 = vector.extract_strided_slice %179 {offsets = [0, 256], sizes = [16, 128], strides = [1, 1]} : vector<16x384xf32> to vector<16x128xf32>
    %185 = arith.mulf %183, %157 : vector<16x128xf32>
    %186 = arith.mulf %182, %181 : vector<16x128xf32>
    %187 = arith.addf %185, %186 : vector<16x128xf32>
    %188 = math.tanh %187 : vector<16x128xf32>
    %189 = arith.mulf %184, %188 : vector<16x128xf32>
    %190 = arith.truncf %189 : vector<16x128xf32> to vector<16x128xbf16>
    %191 = arith.addi %5, %166 : i32
    %192 = tpu.assume_multiple %191, 16 : i32
    %193 = arith.index_cast %192 : i32 to index
    %c0_60 = arith.constant 0 : index
    %194 = vector.load %arg8[%193, %c0_60] : memref<128x128xbf16, #tpu.memory_space<vmem>>, vector<16x128xbf16>
    tpu.vector_store %arg8[%193, %c0_60], %190 {strides = array<i32>} : memref<128x128xbf16, #tpu.memory_space<vmem>>, vector<16x128xbf16>,
    %c6_i32 = arith.constant 6 : i32
    %c16_i32_61 = arith.constant 16 : i32
    %195 = arith.muli %c6_i32, %c16_i32_61 : i32
    %196 = tpu.assume_multiple %195, 16 : i32
    %197 = arith.truncf %189 : vector<16x128xf32> to vector<16x128xbf16>
    %c0_62 = arith.constant 0 : index
    %c0_63 = arith.constant 0 : index
    %c0_64 = arith.constant 0 : index
    %198 = vector.load %arg5[%c0_62, %c0_63, %c0_64] : memref<2x128x512xbf16, #tpu.memory_space<vmem>>, vector<1x128x512xbf16>
    %199 = vector.shape_cast %198 : vector<1x128x512xbf16> to vector<128x512xbf16>
    %cst_65 = arith.constant dense<0.000000e+00> : vector<16x512xf32>
    %200 = tpu.matmul %197, %199, %cst_65 {dimension_numbers = #tpu.dot_dimension_numbers<[1], [0], [0], [1], [0, 0, 1, 1], [], []>} : vector<16x128xbf16>, vector<128x512xbf16>, vector<16x512xf32> -> vector<16x512xf32>
    %201 = arith.index_cast %196 : i32 to index
    %c0_66 = arith.constant 0 : index
    %202 = vector.load %arg9[%201, %c0_66] : memref<128x512xf32, #tpu.memory_space<vmem>>, vector<16x512xf32>
    %203 = arith.addf %200, %202 : vector<16x512xf32>
    %204 = vector.extract_strided_slice %203 {offsets = [0, 0], sizes = [16, 384], strides = [1, 1]} : vector<16x512xf32> to vector<16x384xf32>
    %205 = arith.negf %204 : vector<16x384xf32>
    %206 = math.exp %205 : vector<16x384xf32>
    %cst_67 = arith.constant 1.000000e+00 : f32
    %207 = vector.broadcast %cst_67 : f32 to vector<16x384xf32>
    %208 = arith.addf %207, %206 : vector<16x384xf32>
    %209 = arith.divf %207, %208 : vector<16x384xf32>
    %210 = vector.extract_strided_slice %203 {offsets = [0, 384], sizes = [16, 128], strides = [1, 1]} : vector<16x512xf32> to vector<16x128xf32>
    %211 = math.tanh %210 : vector<16x128xf32>
    %212 = vector.extract_strided_slice %209 {offsets = [0, 0], sizes = [16, 128], strides = [1, 1]} : vector<16x384xf32> to vector<16x128xf32>
    %213 = vector.extract_strided_slice %209 {offsets = [0, 128], sizes = [16, 128], strides = [1, 1]} : vector<16x384xf32> to vector<16x128xf32>
    %214 = vector.extract_strided_slice %209 {offsets = [0, 256], sizes = [16, 128], strides = [1, 1]} : vector<16x384xf32> to vector<16x128xf32>
    %215 = arith.mulf %213, %187 : vector<16x128xf32>
    %216 = arith.mulf %212, %211 : vector<16x128xf32>
    %217 = arith.addf %215, %216 : vector<16x128xf32>
    %218 = math.tanh %217 : vector<16x128xf32>
    %219 = arith.mulf %214, %218 : vector<16x128xf32>
    %220 = arith.truncf %219 : vector<16x128xf32> to vector<16x128xbf16>
    %221 = arith.addi %5, %196 : i32
    %222 = tpu.assume_multiple %221, 16 : i32
    %223 = arith.index_cast %222 : i32 to index
    %c0_68 = arith.constant 0 : index
    %224 = vector.load %arg8[%223, %c0_68] : memref<128x128xbf16, #tpu.memory_space<vmem>>, vector<16x128xbf16>
    tpu.vector_store %arg8[%223, %c0_68], %220 {strides = array<i32>} : memref<128x128xbf16, #tpu.memory_space<vmem>>, vector<16x128xbf16>,
    %c7_i32 = arith.constant 7 : i32
    %c16_i32_69 = arith.constant 16 : i32
    %225 = arith.muli %c7_i32, %c16_i32_69 : i32
    %226 = tpu.assume_multiple %225, 16 : i32
    %227 = arith.truncf %219 : vector<16x128xf32> to vector<16x128xbf16>
    %c0_70 = arith.constant 0 : index
    %c0_71 = arith.constant 0 : index
    %c0_72 = arith.constant 0 : index
    %228 = vector.load %arg5[%c0_70, %c0_71, %c0_72] : memref<2x128x512xbf16, #tpu.memory_space<vmem>>, vector<1x128x512xbf16>
    %229 = vector.shape_cast %228 : vector<1x128x512xbf16> to vector<128x512xbf16>
    %cst_73 = arith.constant dense<0.000000e+00> : vector<16x512xf32>
    %230 = tpu.matmul %227, %229, %cst_73 {dimension_numbers = #tpu.dot_dimension_numbers<[1], [0], [0], [1], [0, 0, 1, 1], [], []>} : vector<16x128xbf16>, vector<128x512xbf16>, vector<16x512xf32> -> vector<16x512xf32>
    %231 = arith.index_cast %226 : i32 to index
    %c0_74 = arith.constant 0 : index
    %232 = vector.load %arg9[%231, %c0_74] : memref<128x512xf32, #tpu.memory_space<vmem>>, vector<16x512xf32>
    %233 = arith.addf %230, %232 : vector<16x512xf32>
    %234 = vector.extract_strided_slice %233 {offsets = [0, 0], sizes = [16, 384], strides = [1, 1]} : vector<16x512xf32> to vector<16x384xf32>
    %235 = arith.negf %234 : vector<16x384xf32>
    %236 = math.exp %235 : vector<16x384xf32>
    %cst_75 = arith.constant 1.000000e+00 : f32
    %237 = vector.broadcast %cst_75 : f32 to vector<16x384xf32>
    %238 = arith.addf %237, %236 : vector<16x384xf32>
    %239 = arith.divf %237, %238 : vector<16x384xf32>
    %240 = vector.extract_strided_slice %233 {offsets = [0, 384], sizes = [16, 128], strides = [1, 1]} : vector<16x512xf32> to vector<16x128xf32>
    %241 = math.tanh %240 : vector<16x128xf32>
    %242 = vector.extract_strided_slice %239 {offsets = [0, 0], sizes = [16, 128], strides = [1, 1]} : vector<16x384xf32> to vector<16x128xf32>
    %243 = vector.extract_strided_slice %239 {offsets = [0, 128], sizes = [16, 128], strides = [1, 1]} : vector<16x384xf32> to vector<16x128xf32>
    %244 = vector.extract_strided_slice %239 {offsets = [0, 256], sizes = [16, 128], strides = [1, 1]} : vector<16x384xf32> to vector<16x128xf32>
    %245 = arith.mulf %243, %217 : vector<16x128xf32>
    %246 = arith.mulf %242, %241 : vector<16x128xf32>
    %247 = arith.addf %245, %246 : vector<16x128xf32>
    %248 = math.tanh %247 : vector<16x128xf32>
    %249 = arith.mulf %244, %248 : vector<16x128xf32>
    %250 = arith.truncf %249 : vector<16x128xf32> to vector<16x128xbf16>
    %251 = arith.addi %5, %226 : i32
    %252 = tpu.assume_multiple %251, 16 : i32
    %253 = arith.index_cast %252 : i32 to index
    %c0_76 = arith.constant 0 : index
    %254 = vector.load %arg8[%253, %c0_76] : memref<128x128xbf16, #tpu.memory_space<vmem>>, vector<16x128xbf16>
    tpu.vector_store %arg8[%253, %c0_76], %250 {strides = array<i32>} : memref<128x128xbf16, #tpu.memory_space<vmem>>, vector<16x128xbf16>,
    %c8_i32 = arith.constant 8 : i32
    %c1_i32_77 = arith.constant 1 : i32
    %c1 = arith.constant 1 : index
    %c0_78 = arith.constant 0 : index
    %c0_79 = arith.constant 0 : index
    %255 = vector.load %arg1[%c1, %c0_78, %c0_79] : memref<2x16x128xf32, #tpu.memory_space<vmem>>, vector<1x16x128xf32>
    %256 = vector.shape_cast %255 : vector<1x16x128xf32> to vector<16x128xf32>
    %c1_80 = arith.constant 1 : index
    %c0_81 = arith.constant 0 : index
    %c0_82 = arith.constant 0 : index
    %257 = vector.load %arg2[%c1_80, %c0_81, %c0_82] : memref<2x16x128xf32, #tpu.memory_space<vmem>>, vector<1x16x128xf32>
    %258 = vector.shape_cast %257 : vector<1x16x128xf32> to vector<16x128xf32>
    %c0_i32_83 = arith.constant 0 : i32
    %c128_i32_84 = arith.constant 128 : i32
    %259 = arith.muli %c0_i32_83, %c128_i32_84 : i32
    %260 = tpu.assume_multiple %259, 16 : i32
    %c0_85 = arith.constant 0 : index
    %c0_86 = arith.constant 0 : index
    %c0_87 = arith.constant 0 : index
    %261 = vector.load %arg4[%c0_85, %c0_86, %c0_87] : memref<1x128x512xbf16, #tpu.memory_space<vmem>>, vector<1x128x512xbf16>
    %262 = vector.shape_cast %261 : vector<1x128x512xbf16> to vector<128x512xbf16>
    %263 = arith.index_cast %260 : i32 to index
    %c0_88 = arith.constant 0 : index
    %264 = vector.load %arg8[%263, %c0_88] : memref<128x128xbf16, #tpu.memory_space<vmem>>, vector<128x128xbf16>
    %cst_89 = arith.constant dense<0.000000e+00> : vector<128x512xf32>
    %265 = tpu.matmul %264, %262, %cst_89 {dimension_numbers = #tpu.dot_dimension_numbers<[1], [0], [0], [1], [0, 0, 1, 1], [], []>} : vector<128x128xbf16>, vector<128x512xbf16>, vector<128x512xf32> -> vector<128x512xf32>
    %c1_90 = arith.constant 1 : index
    %c0_91 = arith.constant 0 : index
    %c0_92 = arith.constant 0 : index
    %266 = vector.load %arg6[%c1_90, %c0_91, %c0_92] : memref<2x1x512xf32, #tpu.memory_space<vmem>>, vector<1x1x512xf32>
    %267 = vector.shape_cast %266 : vector<1x1x512xf32> to vector<1x512xf32>
    %268 = vector.broadcast %267 : vector<1x512xf32> to vector<128x512xf32>
    %269 = arith.addf %265, %268 : vector<128x512xf32>
    %c0_93 = arith.constant 0 : index
    %c0_94 = arith.constant 0 : index
    %270 = vector.load %arg9[%c0_93, %c0_94] : memref<128x512xf32, #tpu.memory_space<vmem>>, vector<128x512xf32>
    tpu.vector_store %arg9[%c0_93, %c0_94], %269 {strides = array<i32>} : memref<128x512xf32, #tpu.memory_space<vmem>>, vector<128x512xf32>,
    %c0_i32_95 = arith.constant 0 : i32
    %c16_i32_96 = arith.constant 16 : i32
    %271 = arith.muli %c0_i32_95, %c16_i32_96 : i32
    %272 = tpu.assume_multiple %271, 16 : i32
    %273 = arith.truncf %256 : vector<16x128xf32> to vector<16x128xbf16>
    %c1_97 = arith.constant 1 : index
    %c0_98 = arith.constant 0 : index
    %c0_99 = arith.constant 0 : index
    %274 = vector.load %arg5[%c1_97, %c0_98, %c0_99] : memref<2x128x512xbf16, #tpu.memory_space<vmem>>, vector<1x128x512xbf16>
    %275 = vector.shape_cast %274 : vector<1x128x512xbf16> to vector<128x512xbf16>
    %cst_100 = arith.constant dense<0.000000e+00> : vector<16x512xf32>
    %276 = tpu.matmul %273, %275, %cst_100 {dimension_numbers = #tpu.dot_dimension_numbers<[1], [0], [0], [1], [0, 0, 1, 1], [], []>} : vector<16x128xbf16>, vector<128x512xbf16>, vector<16x512xf32> -> vector<16x512xf32>
    %277 = arith.index_cast %272 : i32 to index
    %c0_101 = arith.constant 0 : index
    %278 = vector.load %arg9[%277, %c0_101] : memref<128x512xf32, #tpu.memory_space<vmem>>, vector<16x512xf32>
    %279 = arith.addf %276, %278 : vector<16x512xf32>
    %280 = vector.extract_strided_slice %279 {offsets = [0, 0], sizes = [16, 384], strides = [1, 1]} : vector<16x512xf32> to vector<16x384xf32>
    %281 = arith.negf %280 : vector<16x384xf32>
    %282 = math.exp %281 : vector<16x384xf32>
    %cst_102 = arith.constant 1.000000e+00 : f32
    %283 = vector.broadcast %cst_102 : f32 to vector<16x384xf32>
    %284 = arith.addf %283, %282 : vector<16x384xf32>
    %285 = arith.divf %283, %284 : vector<16x384xf32>
    %286 = vector.extract_strided_slice %279 {offsets = [0, 384], sizes = [16, 128], strides = [1, 1]} : vector<16x512xf32> to vector<16x128xf32>
    %287 = math.tanh %286 : vector<16x128xf32>
    %288 = vector.extract_strided_slice %285 {offsets = [0, 0], sizes = [16, 128], strides = [1, 1]} : vector<16x384xf32> to vector<16x128xf32>
    %289 = vector.extract_strided_slice %285 {offsets = [0, 128], sizes = [16, 128], strides = [1, 1]} : vector<16x384xf32> to vector<16x128xf32>
    %290 = vector.extract_strided_slice %285 {offsets = [0, 256], sizes = [16, 128], strides = [1, 1]} : vector<16x384xf32> to vector<16x128xf32>
    %291 = arith.mulf %289, %258 : vector<16x128xf32>
    %292 = arith.mulf %288, %287 : vector<16x128xf32>
    %293 = arith.addf %291, %292 : vector<16x128xf32>
    %294 = math.tanh %293 : vector<16x128xf32>
    %295 = arith.mulf %290, %294 : vector<16x128xf32>
    %296 = arith.truncf %295 : vector<16x128xf32> to vector<16x128xbf16>
    %297 = arith.addi %260, %272 : i32
    %298 = tpu.assume_multiple %297, 16 : i32
    %299 = arith.index_cast %298 : i32 to index
    %c0_103 = arith.constant 0 : index
    %300 = vector.load %arg7[%299, %c0_103] : memref<128x128xbf16, #tpu.memory_space<vmem>>, vector<16x128xbf16>
    tpu.vector_store %arg7[%299, %c0_103], %296 {strides = array<i32>} : memref<128x128xbf16, #tpu.memory_space<vmem>>, vector<16x128xbf16>,
    %c1_i32_104 = arith.constant 1 : i32
    %c16_i32_105 = arith.constant 16 : i32
    %301 = arith.muli %c1_i32_104, %c16_i32_105 : i32
    %302 = tpu.assume_multiple %301, 16 : i32
    %303 = arith.truncf %295 : vector<16x128xf32> to vector<16x128xbf16>
    %c1_106 = arith.constant 1 : index
    %c0_107 = arith.constant 0 : index
    %c0_108 = arith.constant 0 : index
    %304 = vector.load %arg5[%c1_106, %c0_107, %c0_108] : memref<2x128x512xbf16, #tpu.memory_space<vmem>>, vector<1x128x512xbf16>
    %305 = vector.shape_cast %304 : vector<1x128x512xbf16> to vector<128x512xbf16>
    %cst_109 = arith.constant dense<0.000000e+00> : vector<16x512xf32>
    %306 = tpu.matmul %303, %305, %cst_109 {dimension_numbers = #tpu.dot_dimension_numbers<[1], [0], [0], [1], [0, 0, 1, 1], [], []>} : vector<16x128xbf16>, vector<128x512xbf16>, vector<16x512xf32> -> vector<16x512xf32>
    %307 = arith.index_cast %302 : i32 to index
    %c0_110 = arith.constant 0 : index
    %308 = vector.load %arg9[%307, %c0_110] : memref<128x512xf32, #tpu.memory_space<vmem>>, vector<16x512xf32>
    %309 = arith.addf %306, %308 : vector<16x512xf32>
    %310 = vector.extract_strided_slice %309 {offsets = [0, 0], sizes = [16, 384], strides = [1, 1]} : vector<16x512xf32> to vector<16x384xf32>
    %311 = arith.negf %310 : vector<16x384xf32>
    %312 = math.exp %311 : vector<16x384xf32>
    %cst_111 = arith.constant 1.000000e+00 : f32
    %313 = vector.broadcast %cst_111 : f32 to vector<16x384xf32>
    %314 = arith.addf %313, %312 : vector<16x384xf32>
    %315 = arith.divf %313, %314 : vector<16x384xf32>
    %316 = vector.extract_strided_slice %309 {offsets = [0, 384], sizes = [16, 128], strides = [1, 1]} : vector<16x512xf32> to vector<16x128xf32>
    %317 = math.tanh %316 : vector<16x128xf32>
    %318 = vector.extract_strided_slice %315 {offsets = [0, 0], sizes = [16, 128], strides = [1, 1]} : vector<16x384xf32> to vector<16x128xf32>
    %319 = vector.extract_strided_slice %315 {offsets = [0, 128], sizes = [16, 128], strides = [1, 1]} : vector<16x384xf32> to vector<16x128xf32>
    %320 = vector.extract_strided_slice %315 {offsets = [0, 256], sizes = [16, 128], strides = [1, 1]} : vector<16x384xf32> to vector<16x128xf32>
    %321 = arith.mulf %319, %293 : vector<16x128xf32>
    %322 = arith.mulf %318, %317 : vector<16x128xf32>
    %323 = arith.addf %321, %322 : vector<16x128xf32>
    %324 = math.tanh %323 : vector<16x128xf32>
    %325 = arith.mulf %320, %324 : vector<16x128xf32>
    %326 = arith.truncf %325 : vector<16x128xf32> to vector<16x128xbf16>
    %327 = arith.addi %260, %302 : i32
    %328 = tpu.assume_multiple %327, 16 : i32
    %329 = arith.index_cast %328 : i32 to index
    %c0_112 = arith.constant 0 : index
    %330 = vector.load %arg7[%329, %c0_112] : memref<128x128xbf16, #tpu.memory_space<vmem>>, vector<16x128xbf16>
    tpu.vector_store %arg7[%329, %c0_112], %326 {strides = array<i32>} : memref<128x128xbf16, #tpu.memory_space<vmem>>, vector<16x128xbf16>,
    %c2_i32_113 = arith.constant 2 : i32
    %c16_i32_114 = arith.constant 16 : i32
    %331 = arith.muli %c2_i32_113, %c16_i32_114 : i32
    %332 = tpu.assume_multiple %331, 16 : i32
    %333 = arith.truncf %325 : vector<16x128xf32> to vector<16x128xbf16>
    %c1_115 = arith.constant 1 : index
    %c0_116 = arith.constant 0 : index
    %c0_117 = arith.constant 0 : index
    %334 = vector.load %arg5[%c1_115, %c0_116, %c0_117] : memref<2x128x512xbf16, #tpu.memory_space<vmem>>, vector<1x128x512xbf16>
    %335 = vector.shape_cast %334 : vector<1x128x512xbf16> to vector<128x512xbf16>
    %cst_118 = arith.constant dense<0.000000e+00> : vector<16x512xf32>
    %336 = tpu.matmul %333, %335, %cst_118 {dimension_numbers = #tpu.dot_dimension_numbers<[1], [0], [0], [1], [0, 0, 1, 1], [], []>} : vector<16x128xbf16>, vector<128x512xbf16>, vector<16x512xf32> -> vector<16x512xf32>
    %337 = arith.index_cast %332 : i32 to index
    %c0_119 = arith.constant 0 : index
    %338 = vector.load %arg9[%337, %c0_119] : memref<128x512xf32, #tpu.memory_space<vmem>>, vector<16x512xf32>
    %339 = arith.addf %336, %338 : vector<16x512xf32>
    %340 = vector.extract_strided_slice %339 {offsets = [0, 0], sizes = [16, 384], strides = [1, 1]} : vector<16x512xf32> to vector<16x384xf32>
    %341 = arith.negf %340 : vector<16x384xf32>
    %342 = math.exp %341 : vector<16x384xf32>
    %cst_120 = arith.constant 1.000000e+00 : f32
    %343 = vector.broadcast %cst_120 : f32 to vector<16x384xf32>
    %344 = arith.addf %343, %342 : vector<16x384xf32>
    %345 = arith.divf %343, %344 : vector<16x384xf32>
    %346 = vector.extract_strided_slice %339 {offsets = [0, 384], sizes = [16, 128], strides = [1, 1]} : vector<16x512xf32> to vector<16x128xf32>
    %347 = math.tanh %346 : vector<16x128xf32>
    %348 = vector.extract_strided_slice %345 {offsets = [0, 0], sizes = [16, 128], strides = [1, 1]} : vector<16x384xf32> to vector<16x128xf32>
    %349 = vector.extract_strided_slice %345 {offsets = [0, 128], sizes = [16, 128], strides = [1, 1]} : vector<16x384xf32> to vector<16x128xf32>
    %350 = vector.extract_strided_slice %345 {offsets = [0, 256], sizes = [16, 128], strides = [1, 1]} : vector<16x384xf32> to vector<16x128xf32>
    %351 = arith.mulf %349, %323 : vector<16x128xf32>
    %352 = arith.mulf %348, %347 : vector<16x128xf32>
    %353 = arith.addf %351, %352 : vector<16x128xf32>
    %354 = math.tanh %353 : vector<16x128xf32>
    %355 = arith.mulf %350, %354 : vector<16x128xf32>
    %356 = arith.truncf %355 : vector<16x128xf32> to vector<16x128xbf16>
    %357 = arith.addi %260, %332 : i32
    %358 = tpu.assume_multiple %357, 16 : i32
    %359 = arith.index_cast %358 : i32 to index
    %c0_121 = arith.constant 0 : index
    %360 = vector.load %arg7[%359, %c0_121] : memref<128x128xbf16, #tpu.memory_space<vmem>>, vector<16x128xbf16>
    tpu.vector_store %arg7[%359, %c0_121], %356 {strides = array<i32>} : memref<128x128xbf16, #tpu.memory_space<vmem>>, vector<16x128xbf16>,
    %c3_i32_122 = arith.constant 3 : i32
    %c16_i32_123 = arith.constant 16 : i32
    %361 = arith.muli %c3_i32_122, %c16_i32_123 : i32
    %362 = tpu.assume_multiple %361, 16 : i32
    %363 = arith.truncf %355 : vector<16x128xf32> to vector<16x128xbf16>
    %c1_124 = arith.constant 1 : index
    %c0_125 = arith.constant 0 : index
    %c0_126 = arith.constant 0 : index
    %364 = vector.load %arg5[%c1_124, %c0_125, %c0_126] : memref<2x128x512xbf16, #tpu.memory_space<vmem>>, vector<1x128x512xbf16>
    %365 = vector.shape_cast %364 : vector<1x128x512xbf16> to vector<128x512xbf16>
    %cst_127 = arith.constant dense<0.000000e+00> : vector<16x512xf32>
    %366 = tpu.matmul %363, %365, %cst_127 {dimension_numbers = #tpu.dot_dimension_numbers<[1], [0], [0], [1], [0, 0, 1, 1], [], []>} : vector<16x128xbf16>, vector<128x512xbf16>, vector<16x512xf32> -> vector<16x512xf32>
    %367 = arith.index_cast %362 : i32 to index
    %c0_128 = arith.constant 0 : index
    %368 = vector.load %arg9[%367, %c0_128] : memref<128x512xf32, #tpu.memory_space<vmem>>, vector<16x512xf32>
    %369 = arith.addf %366, %368 : vector<16x512xf32>
    %370 = vector.extract_strided_slice %369 {offsets = [0, 0], sizes = [16, 384], strides = [1, 1]} : vector<16x512xf32> to vector<16x384xf32>
    %371 = arith.negf %370 : vector<16x384xf32>
    %372 = math.exp %371 : vector<16x384xf32>
    %cst_129 = arith.constant 1.000000e+00 : f32
    %373 = vector.broadcast %cst_129 : f32 to vector<16x384xf32>
    %374 = arith.addf %373, %372 : vector<16x384xf32>
    %375 = arith.divf %373, %374 : vector<16x384xf32>
    %376 = vector.extract_strided_slice %369 {offsets = [0, 384], sizes = [16, 128], strides = [1, 1]} : vector<16x512xf32> to vector<16x128xf32>
    %377 = math.tanh %376 : vector<16x128xf32>
    %378 = vector.extract_strided_slice %375 {offsets = [0, 0], sizes = [16, 128], strides = [1, 1]} : vector<16x384xf32> to vector<16x128xf32>
    %379 = vector.extract_strided_slice %375 {offsets = [0, 128], sizes = [16, 128], strides = [1, 1]} : vector<16x384xf32> to vector<16x128xf32>
    %380 = vector.extract_strided_slice %375 {offsets = [0, 256], sizes = [16, 128], strides = [1, 1]} : vector<16x384xf32> to vector<16x128xf32>
    %381 = arith.mulf %379, %353 : vector<16x128xf32>
    %382 = arith.mulf %378, %377 : vector<16x128xf32>
    %383 = arith.addf %381, %382 : vector<16x128xf32>
    %384 = math.tanh %383 : vector<16x128xf32>
    %385 = arith.mulf %380, %384 : vector<16x128xf32>
    %386 = arith.truncf %385 : vector<16x128xf32> to vector<16x128xbf16>
    %387 = arith.addi %260, %362 : i32
    %388 = tpu.assume_multiple %387, 16 : i32
    %389 = arith.index_cast %388 : i32 to index
    %c0_130 = arith.constant 0 : index
    %390 = vector.load %arg7[%389, %c0_130] : memref<128x128xbf16, #tpu.memory_space<vmem>>, vector<16x128xbf16>
    tpu.vector_store %arg7[%389, %c0_130], %386 {strides = array<i32>} : memref<128x128xbf16, #tpu.memory_space<vmem>>, vector<16x128xbf16>,
    %c4_i32_131 = arith.constant 4 : i32
    %c16_i32_132 = arith.constant 16 : i32
    %391 = arith.muli %c4_i32_131, %c16_i32_132 : i32
    %392 = tpu.assume_multiple %391, 16 : i32
    %393 = arith.truncf %385 : vector<16x128xf32> to vector<16x128xbf16>
    %c1_133 = arith.constant 1 : index
    %c0_134 = arith.constant 0 : index
    %c0_135 = arith.constant 0 : index
    %394 = vector.load %arg5[%c1_133, %c0_134, %c0_135] : memref<2x128x512xbf16, #tpu.memory_space<vmem>>, vector<1x128x512xbf16>
    %395 = vector.shape_cast %394 : vector<1x128x512xbf16> to vector<128x512xbf16>
    %cst_136 = arith.constant dense<0.000000e+00> : vector<16x512xf32>
    %396 = tpu.matmul %393, %395, %cst_136 {dimension_numbers = #tpu.dot_dimension_numbers<[1], [0], [0], [1], [0, 0, 1, 1], [], []>} : vector<16x128xbf16>, vector<128x512xbf16>, vector<16x512xf32> -> vector<16x512xf32>
    %397 = arith.index_cast %392 : i32 to index
    %c0_137 = arith.constant 0 : index
    %398 = vector.load %arg9[%397, %c0_137] : memref<128x512xf32, #tpu.memory_space<vmem>>, vector<16x512xf32>
    %399 = arith.addf %396, %398 : vector<16x512xf32>
    %400 = vector.extract_strided_slice %399 {offsets = [0, 0], sizes = [16, 384], strides = [1, 1]} : vector<16x512xf32> to vector<16x384xf32>
    %401 = arith.negf %400 : vector<16x384xf32>
    %402 = math.exp %401 : vector<16x384xf32>
    %cst_138 = arith.constant 1.000000e+00 : f32
    %403 = vector.broadcast %cst_138 : f32 to vector<16x384xf32>
    %404 = arith.addf %403, %402 : vector<16x384xf32>
    %405 = arith.divf %403, %404 : vector<16x384xf32>
    %406 = vector.extract_strided_slice %399 {offsets = [0, 384], sizes = [16, 128], strides = [1, 1]} : vector<16x512xf32> to vector<16x128xf32>
    %407 = math.tanh %406 : vector<16x128xf32>
    %408 = vector.extract_strided_slice %405 {offsets = [0, 0], sizes = [16, 128], strides = [1, 1]} : vector<16x384xf32> to vector<16x128xf32>
    %409 = vector.extract_strided_slice %405 {offsets = [0, 128], sizes = [16, 128], strides = [1, 1]} : vector<16x384xf32> to vector<16x128xf32>
    %410 = vector.extract_strided_slice %405 {offsets = [0, 256], sizes = [16, 128], strides = [1, 1]} : vector<16x384xf32> to vector<16x128xf32>
    %411 = arith.mulf %409, %383 : vector<16x128xf32>
    %412 = arith.mulf %408, %407 : vector<16x128xf32>
    %413 = arith.addf %411, %412 : vector<16x128xf32>
    %414 = math.tanh %413 : vector<16x128xf32>
    %415 = arith.mulf %410, %414 : vector<16x128xf32>
    %416 = arith.truncf %415 : vector<16x128xf32> to vector<16x128xbf16>
    %417 = arith.addi %260, %392 : i32
    %418 = tpu.assume_multiple %417, 16 : i32
    %419 = arith.index_cast %418 : i32 to index
    %c0_139 = arith.constant 0 : index
    %420 = vector.load %arg7[%419, %c0_139] : memref<128x128xbf16, #tpu.memory_space<vmem>>, vector<16x128xbf16>
    tpu.vector_store %arg7[%419, %c0_139], %416 {strides = array<i32>} : memref<128x128xbf16, #tpu.memory_space<vmem>>, vector<16x128xbf16>,
    %c5_i32_140 = arith.constant 5 : i32
    %c16_i32_141 = arith.constant 16 : i32
    %421 = arith.muli %c5_i32_140, %c16_i32_141 : i32
    %422 = tpu.assume_multiple %421, 16 : i32
    %423 = arith.truncf %415 : vector<16x128xf32> to vector<16x128xbf16>
    %c1_142 = arith.constant 1 : index
    %c0_143 = arith.constant 0 : index
    %c0_144 = arith.constant 0 : index
    %424 = vector.load %arg5[%c1_142, %c0_143, %c0_144] : memref<2x128x512xbf16, #tpu.memory_space<vmem>>, vector<1x128x512xbf16>
    %425 = vector.shape_cast %424 : vector<1x128x512xbf16> to vector<128x512xbf16>
    %cst_145 = arith.constant dense<0.000000e+00> : vector<16x512xf32>
    %426 = tpu.matmul %423, %425, %cst_145 {dimension_numbers = #tpu.dot_dimension_numbers<[1], [0], [0], [1], [0, 0, 1, 1], [], []>} : vector<16x128xbf16>, vector<128x512xbf16>, vector<16x512xf32> -> vector<16x512xf32>
    %427 = arith.index_cast %422 : i32 to index
    %c0_146 = arith.constant 0 : index
    %428 = vector.load %arg9[%427, %c0_146] : memref<128x512xf32, #tpu.memory_space<vmem>>, vector<16x512xf32>
    %429 = arith.addf %426, %428 : vector<16x512xf32>
    %430 = vector.extract_strided_slice %429 {offsets = [0, 0], sizes = [16, 384], strides = [1, 1]} : vector<16x512xf32> to vector<16x384xf32>
    %431 = arith.negf %430 : vector<16x384xf32>
    %432 = math.exp %431 : vector<16x384xf32>
    %cst_147 = arith.constant 1.000000e+00 : f32
    %433 = vector.broadcast %cst_147 : f32 to vector<16x384xf32>
    %434 = arith.addf %433, %432 : vector<16x384xf32>
    %435 = arith.divf %433, %434 : vector<16x384xf32>
    %436 = vector.extract_strided_slice %429 {offsets = [0, 384], sizes = [16, 128], strides = [1, 1]} : vector<16x512xf32> to vector<16x128xf32>
    %437 = math.tanh %436 : vector<16x128xf32>
    %438 = vector.extract_strided_slice %435 {offsets = [0, 0], sizes = [16, 128], strides = [1, 1]} : vector<16x384xf32> to vector<16x128xf32>
    %439 = vector.extract_strided_slice %435 {offsets = [0, 128], sizes = [16, 128], strides = [1, 1]} : vector<16x384xf32> to vector<16x128xf32>
    %440 = vector.extract_strided_slice %435 {offsets = [0, 256], sizes = [16, 128], strides = [1, 1]} : vector<16x384xf32> to vector<16x128xf32>
    %441 = arith.mulf %439, %413 : vector<16x128xf32>
    %442 = arith.mulf %438, %437 : vector<16x128xf32>
    %443 = arith.addf %441, %442 : vector<16x128xf32>
    %444 = math.tanh %443 : vector<16x128xf32>
    %445 = arith.mulf %440, %444 : vector<16x128xf32>
    %446 = arith.truncf %445 : vector<16x128xf32> to vector<16x128xbf16>
    %447 = arith.addi %260, %422 : i32
    %448 = tpu.assume_multiple %447, 16 : i32
    %449 = arith.index_cast %448 : i32 to index
    %c0_148 = arith.constant 0 : index
    %450 = vector.load %arg7[%449, %c0_148] : memref<128x128xbf16, #tpu.memory_space<vmem>>, vector<16x128xbf16>
    tpu.vector_store %arg7[%449, %c0_148], %446 {strides = array<i32>} : memref<128x128xbf16, #tpu.memory_space<vmem>>, vector<16x128xbf16>,
    %c6_i32_149 = arith.constant 6 : i32
    %c16_i32_150 = arith.constant 16 : i32
    %451 = arith.muli %c6_i32_149, %c16_i32_150 : i32
    %452 = tpu.assume_multiple %451, 16 : i32
    %453 = arith.truncf %445 : vector<16x128xf32> to vector<16x128xbf16>
    %c1_151 = arith.constant 1 : index
    %c0_152 = arith.constant 0 : index
    %c0_153 = arith.constant 0 : index
    %454 = vector.load %arg5[%c1_151, %c0_152, %c0_153] : memref<2x128x512xbf16, #tpu.memory_space<vmem>>, vector<1x128x512xbf16>
    %455 = vector.shape_cast %454 : vector<1x128x512xbf16> to vector<128x512xbf16>
    %cst_154 = arith.constant dense<0.000000e+00> : vector<16x512xf32>
    %456 = tpu.matmul %453, %455, %cst_154 {dimension_numbers = #tpu.dot_dimension_numbers<[1], [0], [0], [1], [0, 0, 1, 1], [], []>} : vector<16x128xbf16>, vector<128x512xbf16>, vector<16x512xf32> -> vector<16x512xf32>
    %457 = arith.index_cast %452 : i32 to index
    %c0_155 = arith.constant 0 : index
    %458 = vector.load %arg9[%457, %c0_155] : memref<128x512xf32, #tpu.memory_space<vmem>>, vector<16x512xf32>
    %459 = arith.addf %456, %458 : vector<16x512xf32>
    %460 = vector.extract_strided_slice %459 {offsets = [0, 0], sizes = [16, 384], strides = [1, 1]} : vector<16x512xf32> to vector<16x384xf32>
    %461 = arith.negf %460 : vector<16x384xf32>
    %462 = math.exp %461 : vector<16x384xf32>
    %cst_156 = arith.constant 1.000000e+00 : f32
    %463 = vector.broadcast %cst_156 : f32 to vector<16x384xf32>
    %464 = arith.addf %463, %462 : vector<16x384xf32>
    %465 = arith.divf %463, %464 : vector<16x384xf32>
    %466 = vector.extract_strided_slice %459 {offsets = [0, 384], sizes = [16, 128], strides = [1, 1]} : vector<16x512xf32> to vector<16x128xf32>
    %467 = math.tanh %466 : vector<16x128xf32>
    %468 = vector.extract_strided_slice %465 {offsets = [0, 0], sizes = [16, 128], strides = [1, 1]} : vector<16x384xf32> to vector<16x128xf32>
    %469 = vector.extract_strided_slice %465 {offsets = [0, 128], sizes = [16, 128], strides = [1, 1]} : vector<16x384xf32> to vector<16x128xf32>
    %470 = vector.extract_strided_slice %465 {offsets = [0, 256], sizes = [16, 128], strides = [1, 1]} : vector<16x384xf32> to vector<16x128xf32>
    %471 = arith.mulf %469, %443 : vector<16x128xf32>
    %472 = arith.mulf %468, %467 : vector<16x128xf32>
    %473 = arith.addf %471, %472 : vector<16x128xf32>
    %474 = math.tanh %473 : vector<16x128xf32>
    %475 = arith.mulf %470, %474 : vector<16x128xf32>
    %476 = arith.truncf %475 : vector<16x128xf32> to vector<16x128xbf16>
    %477 = arith.addi %260, %452 : i32
    %478 = tpu.assume_multiple %477, 16 : i32
    %479 = arith.index_cast %478 : i32 to index
    %c0_157 = arith.constant 0 : index
    %480 = vector.load %arg7[%479, %c0_157] : memref<128x128xbf16, #tpu.memory_space<vmem>>, vector<16x128xbf16>
    tpu.vector_store %arg7[%479, %c0_157], %476 {strides = array<i32>} : memref<128x128xbf16, #tpu.memory_space<vmem>>, vector<16x128xbf16>,
    %c7_i32_158 = arith.constant 7 : i32
    %c16_i32_159 = arith.constant 16 : i32
    %481 = arith.muli %c7_i32_158, %c16_i32_159 : i32
    %482 = tpu.assume_multiple %481, 16 : i32
    %483 = arith.truncf %475 : vector<16x128xf32> to vector<16x128xbf16>
    %c1_160 = arith.constant 1 : index
    %c0_161 = arith.constant 0 : index
    %c0_162 = arith.constant 0 : index
    %484 = vector.load %arg5[%c1_160, %c0_161, %c0_162] : memref<2x128x512xbf16, #tpu.memory_space<vmem>>, vector<1x128x512xbf16>
    %485 = vector.shape_cast %484 : vector<1x128x512xbf16> to vector<128x512xbf16>
    %cst_163 = arith.constant dense<0.000000e+00> : vector<16x512xf32>
    %486 = tpu.matmul %483, %485, %cst_163 {dimension_numbers = #tpu.dot_dimension_numbers<[1], [0], [0], [1], [0, 0, 1, 1], [], []>} : vector<16x128xbf16>, vector<128x512xbf16>, vector<16x512xf32> -> vector<16x512xf32>
    %487 = arith.index_cast %482 : i32 to index
    %c0_164 = arith.constant 0 : index
    %488 = vector.load %arg9[%487, %c0_164] : memref<128x512xf32, #tpu.memory_space<vmem>>, vector<16x512xf32>
    %489 = arith.addf %486, %488 : vector<16x512xf32>
    %490 = vector.extract_strided_slice %489 {offsets = [0, 0], sizes = [16, 384], strides = [1, 1]} : vector<16x512xf32> to vector<16x384xf32>
    %491 = arith.negf %490 : vector<16x384xf32>
    %492 = math.exp %491 : vector<16x384xf32>
    %cst_165 = arith.constant 1.000000e+00 : f32
    %493 = vector.broadcast %cst_165 : f32 to vector<16x384xf32>
    %494 = arith.addf %493, %492 : vector<16x384xf32>
    %495 = arith.divf %493, %494 : vector<16x384xf32>
    %496 = vector.extract_strided_slice %489 {offsets = [0, 384], sizes = [16, 128], strides = [1, 1]} : vector<16x512xf32> to vector<16x128xf32>
    %497 = math.tanh %496 : vector<16x128xf32>
    %498 = vector.extract_strided_slice %495 {offsets = [0, 0], sizes = [16, 128], strides = [1, 1]} : vector<16x384xf32> to vector<16x128xf32>
    %499 = vector.extract_strided_slice %495 {offsets = [0, 128], sizes = [16, 128], strides = [1, 1]} : vector<16x384xf32> to vector<16x128xf32>
    %500 = vector.extract_strided_slice %495 {offsets = [0, 256], sizes = [16, 128], strides = [1, 1]} : vector<16x384xf32> to vector<16x128xf32>
    %501 = arith.mulf %499, %473 : vector<16x128xf32>
    %502 = arith.mulf %498, %497 : vector<16x128xf32>
    %503 = arith.addf %501, %502 : vector<16x128xf32>
    %504 = math.tanh %503 : vector<16x128xf32>
    %505 = arith.mulf %500, %504 : vector<16x128xf32>
    %506 = arith.truncf %505 : vector<16x128xf32> to vector<16x128xbf16>
    %507 = arith.addi %260, %482 : i32
    %508 = tpu.assume_multiple %507, 16 : i32
    %509 = arith.index_cast %508 : i32 to index
    %c0_166 = arith.constant 0 : index
    %510 = vector.load %arg7[%509, %c0_166] : memref<128x128xbf16, #tpu.memory_space<vmem>>, vector<16x128xbf16>
    tpu.vector_store %arg7[%509, %c0_166], %506 {strides = array<i32>} : memref<128x128xbf16, #tpu.memory_space<vmem>>, vector<16x128xbf16>,
    %c8_i32_167 = arith.constant 8 : i32
    %c1_i32_168 = arith.constant 1 : i32
    return
  }
}

</mosaic_0001>

<bundles_post_ra>
// kernel: tpu_custom_call.1
= control target key start
LH: loop header
LB: loop body
LE: loop exit
PB: predicated region body
PF: predicated region fallthrough
CT: control target
= control target key end

     0   :  { %12 = vsyncpa [#allocation5], 0  ;;  %s10115_s0 = inlined_call_operand.hbm [shape: bf16[128,128], index: 0, kind: input, shape index: {}]   ;;  %s10116_s1 = inlined_call_operand.hbm [shape: f32[2,16,128], index: 1, kind: input, shape index: {}]   ;;  %s10117_s2 = inlined_call_operand.hbm [shape: f32[2,16,128], index: 2, kind: input, shape index: {}]   ;;  %s10118_s3 = inlined_call_operand.hbm [shape: bf16[128,512], index: 3, kind: input, shape index: {}]   ;;  %s10119_s4 = inlined_call_operand.hbm [shape: bf16[1,128,512], index: 4, kind: input, shape index: {}]   ;;  %s10120_s5 = inlined_call_operand.hbm [shape: bf16[2,128,512], index: 5, kind: input, shape index: {}]   ;;  %s10121_s6 = inlined_call_operand.vmem [shape: f32[2,1,512], index: 6, kind: input, shape index: {}]   ;;  %s10122_s7 = inlined_call_operand.hbm [shape: bf16[128,128], index: 7, kind: output, shape index: {}]  }
   0x1   :  { %13 = vsyncpa [#allocation8], 0 }
   0x2   :  { %14 = vsyncpa [#allocation11], 0 }
   0x3   :  { %15 = vsyncpa [#allocation14], 0 }
   0x4   :  { %16 = vsyncpa [#allocation6], 0  ;;  %s8806_s24 = smov [#allocation7]   ;;  %s8642_s28 = scalar_lea.hbm %s10116_s1, 512 }
   0x5   :  { %s34_s25 = sshll.u32 %s8806_s24, 4  ;;  %p8643_p0 = scmp.ne.s32.totalorder %s10116_s1, %s8642_s28  ;;  %s35_s25 = int_to_ptr.vmem [resolvable:$true] %s34_s25 }
   0x6   :  { %p8646_p1 = scmp.lt.u32.totalorder %s8642_s28, %s10116_s1 }
   0x8   :  { %p8648_p2 = pnand %p8646_p1, %p8643_p0 }
   0xa   :  { %8651 = shalt.err (!%p8648_p2)
}
   0xb   :  { %s8652_s10 = scalar_lea.vmem %s35_s25, 512  ;;  %p8657_p4 = scmp.lt.s32.totalorder %s35_s25, %s35_s25 }
   0xc   :  { %p8653_p3 = scmp.ne.s32.totalorder %s35_s25, %s8652_s10  ;;  %p8658_p5 = scmp.lt.s32.totalorder %s8652_s10, %s8652_s10 }
   0xe   :  { %p8659_p6 = por %p8658_p5, %p8657_p4 }
  0x10   :  { %p8660_p7 = pnand %p8659_p6, %p8653_p3 }
  0x12   :  { %8663 = shalt.err (!%p8660_p7)
}
  0x13   :  { %s8807_s11 = smov 128   ;;  %s8808_s12 = smov 8  }
  0x14   :  { %40 = dma.hbm_to_vmem [thread:$0]  %s10116_s1, 512, %s35_s25, [#allocation8], %s8807_s11, %s8807_s11, %s8808_s12  }
  0x15   :  { %s8809_s15 = smov [#allocation10]   ;;  %s8664_s19 = scalar_lea.hbm %s10118_s3, 4096 }
  0x16   :  { %s58_s16 = sshll.u32 %s8809_s15, 4  ;;  %p8665_p8 = scmp.ne.s32.totalorder %s10118_s3, %s8664_s19  ;;  %s59_s16 = int_to_ptr.vmem [resolvable:$true] %s58_s16 }
  0x17   :  { %p8668_p9 = scmp.lt.u32.totalorder %s8664_s19, %s10118_s3 }
  0x19   :  { %p8670_p10 = pnand %p8668_p9, %p8665_p8 }
  0x1b   :  { %8673 = shalt.err (!%p8670_p10)
}
  0x1c   :  { %s8674_s24 = scalar_lea.vmem %s59_s16, 4096  ;;  %p8679_p12 = scmp.lt.s32.totalorder %s59_s16, %s59_s16 }
  0x1d   :  { %p8675_p11 = scmp.ne.s32.totalorder %s59_s16, %s8674_s24  ;;  %p8680_p13 = scmp.lt.s32.totalorder %s8674_s24, %s8674_s24 }
  0x1f   :  { %p8681_p0 = por %p8680_p13, %p8679_p12 }
  0x21   :  { %p8682_p1 = pnand %p8681_p0, %p8675_p11 }
  0x23   :  { %8685 = shalt.err (!%p8682_p1)
}
  0x24   :  { %s8810_s1 = smov 256   ;;  %s8811_s25 = smov 16  }
  0x25   :  { %64 = dma.hbm_to_vmem [thread:$0]  %s10118_s3, 4096, %s59_s16, [#allocation11], %s8810_s1, %s8810_s1, %s8811_s25  }
  0x26   :  { %s8812_s28 = smov [#allocation4]   ;;  %s8686_s9 = scalar_lea.hbm %s10115_s0, 1024 }
  0x27   :  { %s22_s29 = sshll.u32 %s8812_s28, 4  ;;  %p8687_p2 = scmp.ne.s32.totalorder %s10115_s0, %s8686_s9  ;;  %s23_s29 = int_to_ptr.vmem [resolvable:$true] %s22_s29 }
  0x28   :  { %p8690_p3 = scmp.lt.u32.totalorder %s8686_s9, %s10115_s0 }
  0x2a   :  { %p8692_p4 = pnand %p8690_p3, %p8687_p2 }
  0x2c   :  { %8695 = shalt.err (!%p8692_p4)
}
  0x2d   :  { %s8696_s17 = scalar_lea.vmem %s23_s29, 1024  ;;  %p8701_p6 = scmp.lt.s32.totalorder %s23_s29, %s23_s29 }
  0x2e   :  { %p8697_p5 = scmp.ne.s32.totalorder %s23_s29, %s8696_s17  ;;  %p8702_p7 = scmp.lt.s32.totalorder %s8696_s17, %s8696_s17 }
  0x30   :  { %p8703_p8 = por %p8702_p7, %p8701_p6 }
  0x32   :  { %p8704_p9 = pnand %p8703_p8, %p8697_p5 }
  0x34   :  { %8707 = shalt.err (!%p8704_p9)
}
  0x35   :  { %s8813_s3 = smov 64   ;;  %s8814_s16 = smov 4  }
  0x36   :  { %28 = dma.hbm_to_vmem [thread:$0]  %s10115_s0, 1024, %s23_s29, [#allocation5], %s8813_s3, %s8813_s3, %s8814_s16  }
  0x37   :  { %s8815_s20 = smov [#allocation9]   ;;  %s8816_s22 = smov [#allocation12]  }
  0x38   :  { %s46_s21 = sshll.u32 %s8815_s20, 4  ;;  %s70_s23 = sshll.u32 %s8816_s22, 4  ;;  %s47_s21 = int_to_ptr.vmem [resolvable:$true] %s46_s21  ;;  %s71_s23 = int_to_ptr.vmem [resolvable:$true] %s70_s23 }
  0x39   :  { %s8708_s27 = scalar_lea.hbm %s10117_s2, 512 }
  0x3a   :  { %p8709_p10 = scmp.ne.s32.totalorder %s10117_s2, %s8708_s27  ;;  %p8712_p11 = scmp.lt.u32.totalorder %s8708_s27, %s10117_s2 }
  0x3c   :  { %p8714_p12 = pnand %p8712_p11, %p8709_p10 }
  0x3e   :  { %8717 = shalt.err (!%p8714_p12)
}
  0x3f   :  { %s8718_s0 = scalar_lea.vmem %s47_s21, 512  ;;  %p8723_p0 = scmp.lt.s32.totalorder %s47_s21, %s47_s21 }
  0x40   :  { %p8719_p13 = scmp.ne.s32.totalorder %s47_s21, %s8718_s0  ;;  %p8724_p1 = scmp.lt.s32.totalorder %s8718_s0, %s8718_s0 }
  0x42   :  { %p8725_p2 = por %p8724_p1, %p8723_p0 }
  0x44   :  { %p8726_p3 = pnand %p8725_p2, %p8719_p13 }
  0x46   :  { %8729 = shalt.err (!%p8726_p3)
}
  0x47   :  { %52 = dma.hbm_to_vmem [thread:$0]  %s10117_s2, 512, %s47_s21, [#allocation8], %s8807_s11, %s8807_s11, %s8808_s12  }
  0x48   :  { %s8730_s15 = scalar_lea.hbm %s10119_s4, 4096 }
  0x49   :  { %p8731_p4 = scmp.ne.s32.totalorder %s10119_s4, %s8730_s15  ;;  %p8734_p5 = scmp.lt.u32.totalorder %s8730_s15, %s10119_s4 }
  0x4b   :  { %p8736_p6 = pnand %p8734_p5, %p8731_p4 }
  0x4d   :  { %8739 = shalt.err (!%p8736_p6)
}
  0x4e   :  { %s8740_s22 = scalar_lea.vmem %s71_s23, 4096  ;;  %p8745_p8 = scmp.lt.s32.totalorder %s71_s23, %s71_s23 }
  0x4f   :  { %p8741_p7 = scmp.ne.s32.totalorder %s71_s23, %s8740_s22  ;;  %p8746_p9 = scmp.lt.s32.totalorder %s8740_s22, %s8740_s22 }
  0x51   :  { %p8747_p10 = por %p8746_p9, %p8745_p8 }
  0x53   :  { %p8748_p11 = pnand %p8747_p10, %p8741_p7 }
  0x55   :  { %8751 = shalt.err (!%p8748_p11)
}
  0x56   :  { %76 = dma.hbm_to_vmem [thread:$0]  %s10119_s4, 4096, %s71_s23, [#allocation11], %s8810_s1, %s8810_s1, %s8811_s25  }
  0x57   :  { %s8817_s12 = smov [#allocation13]   ;;  %s8752_s27 = scalar_lea.hbm %s10120_s5, 8192 }
  0x58   :  { %s82_s21 = sshll.u32 %s8817_s12, 4  ;;  %p8753_p12 = scmp.ne.s32.totalorder %s10120_s5, %s8752_s27  ;;  %s83_s21 = int_to_ptr.vmem [resolvable:$true] %s82_s21 }
  0x59   :  { %p8756_p13 = scmp.lt.u32.totalorder %s8752_s27, %s10120_s5 }
  0x5b   :  { %p8758_p0 = pnand %p8756_p13, %p8753_p12 }
  0x5d   :  { %8761 = shalt.err (!%p8758_p0)
}
  0x5e   :  { %s8762_s0 = scalar_lea.vmem %s83_s21, 8192  ;;  %p8767_p2 = scmp.lt.s32.totalorder %s83_s21, %s83_s21 }
  0x5f   :  { %p8763_p1 = scmp.ne.s32.totalorder %s83_s21, %s8762_s0  ;;  %p8768_p3 = scmp.lt.s32.totalorder %s8762_s0, %s8762_s0 }
  0x61   :  { %p8769_p4 = por %p8768_p3, %p8767_p2 }
  0x63   :  { %p8770_p5 = pnand %p8769_p4, %p8763_p1 }
  0x65   :  { %8773 = shalt.err (!%p8770_p5)
}
  0x66   :  { %88 = dma.hbm_to_vmem [thread:$0]  %s10120_s5, 8192, %s83_s21, [#allocation14], %s8810_s1, %s8810_s1, %s8811_s25  }
  0x67   :  { %8796 = dma.done.wait [#allocation5], 1024  }
  0x68   :  { %8797 = vsyncadd [#allocation5], 4294966272 }
  0x69   :  { %8798 = dma.done.wait [#allocation8], 1024  }
  0x6a   :  { %8799 = vsyncadd [#allocation8], 4294966272 }
  0x6b   :  { %8800 = dma.done.wait [#allocation11], 8192  }
  0x6c   :  { %8801 = vsyncadd [#allocation11], 4294959104 }
  0x6d   :  { %8802 = dma.done.wait [#allocation14], 8192  }
  0x6e   :  { %8803 = vsyncadd [#allocation14], 4294959104  ;;  %v8818_v0 = vmov 0   ;;  %v7822_v1 = vld [vmem:[#allocation10 + $0x4] ss:$16 sps:$4 sm:$0xff]   ;;  %v7874_v43 = vld [vmem:[#allocation4 + $0x8] sm:$0xff]  }
  0x6f   :  { %424 = vmatprep.mubr.bf16.mxu0 %v8818_v0  ;;  %537 = vmatprep.mubr.bf16.mxu1 %v8818_v0  ;;  %v7824_v2 = vld [vmem:[#allocation10 + $0xc] ss:$16 sps:$4 sm:$0xff]   ;;  %v7826_v3 = vld [vmem:[#allocation10] ss:$16 sps:$4 sm:$0xff]   ;;  %v7827_v4 = vld [vmem:[#allocation10 + $0x8] ss:$16 sps:$4 sm:$0xff]  }
  0x70   :  { %392 = vmatprep.subr.bf16.mxu0 %v7822_v1  ;;  %505 = vmatprep.subr.bf16.mxu1 %v7824_v2  ;;  %v7828_v5 = vld [vmem:[#allocation10 + $0x24] ss:$16 sps:$4 sm:$0xff]   ;;  %v7830_v6 = vld [vmem:[#allocation10 + $0x2c] ss:$16 sps:$4 sm:$0xff]   ;;  %v7832_v7 = vld [vmem:[#allocation10 + $0x20] ss:$16 sps:$4 sm:$0xff]  }
  0x71   :  { %393 = vmatpush1.bf16.msra.mxu0 %v7826_v3  ;;  %506 = vmatpush1.bf16.msra.mxu1 %v7827_v4  ;;  %v7833_v8 = vld [vmem:[#allocation10 + $0x28] ss:$16 sps:$4 sm:$0xff]   ;;  %v7834_v9 = vld [vmem:[#allocation10 + $0x44] ss:$16 sps:$4 sm:$0xff]   ;;  %v7836_v10 = vld [vmem:[#allocation10 + $0x4c] ss:$16 sps:$4 sm:$0xff]  }
  0x72   :  { %394 = vmatprep.subr.bf16.mxu0 %v7828_v5  ;;  %507 = vmatprep.subr.bf16.mxu1 %v7830_v6  ;;  %v7838_v11 = vld [vmem:[#allocation10 + $0x40] ss:$16 sps:$4 sm:$0xff]   ;;  %v7839_v12 = vld [vmem:[#allocation10 + $0x48] ss:$16 sps:$4 sm:$0xff]   ;;  %v7840_v13 = vld [vmem:[#allocation10 + $0x64] ss:$16 sps:$4 sm:$0xff]  }
  0x73   :  { %v7842_v14 = vld [vmem:[#allocation10 + $0x6c] ss:$16 sps:$4 sm:$0xff]   ;;  %v7844_v15 = vld [vmem:[#allocation10 + $0x60] ss:$16 sps:$4 sm:$0xff]   ;;  %v7845_v16 = vld [vmem:[#allocation10 + $0x68] ss:$16 sps:$4 sm:$0xff]  }
  0x74   :  { %v7846_v17 = vld [vmem:[#allocation10 + $0x84] ss:$16 sps:$4 sm:$0xff]   ;;  %v7848_v18 = vld [vmem:[#allocation10 + $0x8c] ss:$16 sps:$4 sm:$0xff]   ;;  %v7850_v19 = vld [vmem:[#allocation10 + $0x80] ss:$16 sps:$4 sm:$0xff]  }
  0x75   :  { %395 = vmatpush1.bf16.msra.mxu0 %v7832_v7  ;;  %508 = vmatpush1.bf16.msra.mxu1 %v7833_v8  ;;  %v7851_v20 = vld [vmem:[#allocation10 + $0x88] ss:$16 sps:$4 sm:$0xff]   ;;  %v7852_v21 = vld [vmem:[#allocation10 + $0xa4] ss:$16 sps:$4 sm:$0xff]   ;;  %v7854_v22 = vld [vmem:[#allocation10 + $0xac] ss:$16 sps:$4 sm:$0xff]  }
  0x76   :  { %396 = vmatprep.subr.bf16.mxu0 %v7834_v9  ;;  %509 = vmatprep.subr.bf16.mxu1 %v7836_v10  ;;  %v7856_v23 = vld [vmem:[#allocation10 + $0xa0] ss:$16 sps:$4 sm:$0xff]   ;;  %v7857_v24 = vld [vmem:[#allocation10 + $0xa8] ss:$16 sps:$4 sm:$0xff]   ;;  %v7858_v25 = vld [vmem:[#allocation10 + $0xc4] ss:$16 sps:$4 sm:$0xff]  }
  0x77   :  { %v7860_v26 = vld [vmem:[#allocation10 + $0xcc] ss:$16 sps:$4 sm:$0xff]   ;;  %v7862_v27 = vld [vmem:[#allocation10 + $0xc0] ss:$16 sps:$4 sm:$0xff]   ;;  %v7863_v28 = vld [vmem:[#allocation10 + $0xc8] ss:$16 sps:$4 sm:$0xff]  }
  0x78   :  { %v7864_v29 = vld [vmem:[#allocation10 + $0xe4] ss:$16 sps:$4 sm:$0xff]   ;;  %v7866_v30 = vld [vmem:[#allocation10 + $0xec] ss:$16 sps:$4 sm:$0xff]   ;;  %v7868_v31 = vld [vmem:[#allocation10 + $0xe0] ss:$16 sps:$4 sm:$0xff]  }
  0x79   :  { %397 = vmatpush1.bf16.msra.mxu0 %v7838_v11  ;;  %510 = vmatpush1.bf16.msra.mxu1 %v7839_v12  ;;  %v7869_v32 = vld [vmem:[#allocation10 + $0xe8] ss:$16 sps:$4 sm:$0xff]   ;;  %v8952_v33 = vld [vmem:[#allocation13 + $0x4] ss:$16 sps:$4 sm:$0xff]   ;;  %v8954_v34 = vld [vmem:[#allocation13 + $0xc] ss:$16 sps:$4 sm:$0xff]  }
  0x7a   :  { %398 = vmatprep.subr.bf16.mxu0 %v7840_v13  ;;  %511 = vmatprep.subr.bf16.mxu1 %v7842_v14  ;;  %v7870_v35 = vld [vmem:[#allocation4] sm:$0xff]   ;;  %v8962_v38 = vld [vmem:[#allocation13 + $0x8] ss:$16 sps:$4 sm:$0xff]   ;;  %v8964_v39 = vld [vmem:[#allocation13 + $0x2c] ss:$16 sps:$4 sm:$0xff]   ;;  %v164_v13 = vlaneseq }
  0x7b   :  { %v8956_v36 = vld [vmem:[#allocation13] ss:$16 sps:$4 sm:$0xff]   ;;  %v8959_v37 = vld [vmem:[#allocation13 + $0x24] ss:$16 sps:$4 sm:$0xff]   ;;  %v8975_v42 = vld [vmem:[#allocation13 + $0x28] ss:$16 sps:$4 sm:$0xff]  }
  0x7c   :  { %v8968_v40 = vld [vmem:[#allocation13 + $0x20] ss:$16 sps:$4 sm:$0xff]   ;;  %v8972_v41 = vld [vmem:[#allocation13 + $0x44] ss:$16 sps:$4 sm:$0xff]   ;;  %v8984_v46 = vld [vmem:[#allocation13 + $0x4c] ss:$16 sps:$4 sm:$0xff]  }
  0x7d   :  { %399 = vmatpush1.bf16.msra.mxu0 %v7844_v15  ;;  %512 = vmatpush1.bf16.msra.mxu1 %v7845_v16  ;;  %v8979_v44 = vld [vmem:[#allocation13 + $0x40] ss:$16 sps:$4 sm:$0xff]   ;;  %v8982_v45 = vld [vmem:[#allocation13 + $0x64] ss:$16 sps:$4 sm:$0xff]   ;;  %v8987_v47 = vld [vmem:[#allocation13 + $0x48] ss:$16 sps:$4 sm:$0xff]  }
  0x7e   :  { %400 = vmatprep.subr.bf16.mxu0 %v7846_v17  ;;  %513 = vmatprep.subr.bf16.mxu1 %v7848_v18  ;;  %v8989_v48 = vld [vmem:[#allocation13 + $0x6c] ss:$16 sps:$4 sm:$0xff]   ;;  %v8994_v49 = vld [vmem:[#allocation13 + $0x60] ss:$16 sps:$4 sm:$0xff]   ;;  %v8997_v50 = vld [vmem:[#allocation13 + $0x84] ss:$16 sps:$4 sm:$0xff]  }
  0x7f   :  { %v9001_v51 = vld [vmem:[#allocation13 + $0x68] ss:$16 sps:$4 sm:$0xff]   ;;  %v7881_v52 = vld [vmem:[#allocation4 + $0x10] sm:$0xff]   ;;  %v9007_v54 = vld [vmem:[#allocation13 + $0x8c] ss:$16 sps:$4 sm:$0xff]   ;;  %v9100_v14 = vshrl.u32 %v164_v13, 7 }
  0x80   :  { %v9004_v53 = vld [vmem:[#allocation13 + $0x80] ss:$16 sps:$4 sm:$0xff]   ;;  %v9010_v55 = vld [vmem:[#allocation13 + $0xa4] ss:$16 sps:$4 sm:$0xff]   ;;  %v9013_v56 = vld [vmem:[#allocation13 + $0x88] ss:$16 sps:$4 sm:$0xff]  }
  0x81   :  { %401 = vmatpush1.bf16.msra.mxu0 %v7850_v19  ;;  %514 = vmatpush1.bf16.msra.mxu1 %v7851_v20  ;;  %v9015_v57 = vld [vmem:[#allocation13 + $0xa0] ss:$16 sps:$4 sm:$0xff]   ;;  %v9017_v58 = vld [vmem:[#allocation13 + $0xac] ss:$16 sps:$4 sm:$0xff]   ;;  %v9021_v59 = vld [vmem:[#allocation13 + $0xc4] ss:$16 sps:$4 sm:$0xff]  }
  0x82   :  { %402 = vmatprep.subr.bf16.mxu0 %v7852_v21  ;;  %515 = vmatprep.subr.bf16.mxu1 %v7854_v22  ;;  %v9023_v60 = vld [vmem:[#allocation13 + $0xa8] ss:$16 sps:$4 sm:$0xff]   ;;  %v9029_v62 = vld [vmem:[#allocation13 + $0xc0] ss:$16 sps:$4 sm:$0xff]   ;;  %v9032_v63 = vld [vmem:[#allocation13 + $0xcc] ss:$16 sps:$4 sm:$0xff]  }
  0x83   :  { %v7888_v61 = vld [vmem:[#allocation4 + $0x18] sm:$0xff]   ;;  %v9034_v1 = vld [vmem:[#allocation13 + $0xe4] ss:$16 sps:$4 sm:$0xff]   ;;  %v9043_v4 = vld [vmem:[#allocation13 + $0xe0] ss:$16 sps:$4 sm:$0xff]   ;;  %v166_v15 = vsub.s32 0, %v9100_v14 }
  0x84   :  { %v9036_v2 = vld [vmem:[#allocation13 + $0xc8] ss:$16 sps:$4 sm:$0xff]   ;;  %v9039_v3 = vld [vmem:[#allocation13 + $0xec] ss:$16 sps:$4 sm:$0xff]   ;;  %v7895_v6 = vld [vmem:[#allocation4 + $0x20] sm:$0xff]   ;;  %v170_v17 = vsub.s32 1, %v9100_v14 }
  0x85   :  { %403 = vmatpush1.bf16.msra.mxu0 %v7856_v23  ;;  %516 = vmatpush1.bf16.msra.mxu1 %v7857_v24  ;;  %v9047_v5 = vld [vmem:[#allocation13 + $0xe8] ss:$16 sps:$4 sm:$0xff]   ;;  %v7909_v8 = vld [vmem:[#allocation4 + $0x30] sm:$0xff]   ;;  %v110_v10 = vld [vmem:[#allocation7] sm:$0xff]  ;;  %v10124_v21 = vsub.s32 2, %v9100_v14 }
  0x86   :  { %404 = vmatprep.subr.bf16.mxu0 %v7858_v25  ;;  %517 = vmatprep.subr.bf16.mxu1 %v7860_v26  ;;  %v7902_v7 = vld [vmem:[#allocation4 + $0x28] sm:$0xff]   ;;  %v7916_v9 = vld [vmem:[#allocation4 + $0x38] sm:$0xff]   ;;  %v162_v16 = vld [vmem:[%s10121_s6] sm:$0xf] }
  0x87   :  { %v111_v11 = vld [vmem:[#allocation7 + $0x8] sm:$0xff]  ;;  %v9109_v18 = vrot.slane %v162_v16, %v166_v15  ;;  %v9113_v19 = vrot.slane %v162_v16, %v170_v17 }
  0x88   :  { %v682_v12 = vpack.c.bf16 %v111_v11, %v110_v10 }
  0x89   :  { %405 = vmatpush1.bf16.msra.mxu0 %v7862_v27  ;;  %518 = vmatpush1.bf16.msra.mxu1 %v7863_v28 }
  0x8a   :  { %406 = vmatprep.subr.bf16.mxu0 %v7864_v29  ;;  %519 = vmatprep.subr.bf16.mxu1 %v7866_v30  ;;  %v10123_v30 = vsub.s32 3, %v9100_v14 }
  0x8d   :  { %407 = vmatpush1.bf16.msra.mxu0 %v7868_v31  ;;  %520 = vmatpush1.bf16.msra.mxu1 %v7869_v32 }
  0x8e   :  { %886 = vmatprep.subr.bf16.mxu0 %v8952_v33  ;;  %929 = vmatprep.subr.bf16.mxu1 %v8954_v34 }
  0x90   :  { %425 = vmatmul.mubr.bf16.vlgmr.msra.gmra.mrb[0].mxu0 %v7870_v35  ;;  %538 = vmatmul.mubr.bf16.vlgmr.msra.gmra.mrb[0].mxu1 %v7870_v35  ;;  %v9122_v35 = vrot.slane %v162_v16, %v10124_v21 }
  0x91   :  { %887 = vmatpush1.bf16.msra.mxu0 %v8956_v36  ;;  %434 = vmatprep.mubr.bf16.mxu0 %v8818_v0 }
  0x92   :  { %547 = vmatprep.mubr.bf16.mxu1 %v8818_v0  ;;  %888 = vmatprep.subr.bf16.mxu0 %v8959_v37 }
  0x93   :  { %930 = vmatpush1.bf16.msra.mxu1 %v8962_v38 }
  0x94   :  { %931 = vmatprep.subr.bf16.mxu1 %v8964_v39 }
  0x95   :  { %889 = vmatpush1.bf16.msra.mxu0 %v8968_v40 }
  0x96   :  { %890 = vmatprep.subr.bf16.mxu0 %v8972_v41 }
  0x97   :  { %932 = vmatpush1.bf16.msra.mxu1 %v8975_v42 }
  0x98   :  { %435 = vmatmul.mubr.bf16.gmra.mrb[4].mxu0 %v7874_v43  ;;  %548 = vmatmul.mubr.bf16.gmra.mrb[4].mxu1 %v7874_v43 }
  0x99   :  { %444 = vmatprep.mubr.bf16.mxu0 %v8818_v0  ;;  %557 = vmatprep.mubr.bf16.mxu1 %v8818_v0 }
  0x9a   :  { %891 = vmatpush1.bf16.msra.mxu0 %v8979_v44  ;;  %933 = vmatprep.subr.bf16.mxu1 %v8984_v46 }
  0x9b   :  { %892 = vmatprep.subr.bf16.mxu0 %v8982_v45  ;;  %934 = vmatpush1.bf16.msra.mxu1 %v8987_v47 }
  0x9c   :  { %935 = vmatprep.subr.bf16.mxu1 %v8989_v48 }
  0x9e   :  { %893 = vmatpush1.bf16.msra.mxu0 %v8994_v49 }
  0x9f   :  { %894 = vmatprep.subr.bf16.mxu0 %v8997_v50  ;;  %936 = vmatpush1.bf16.msra.mxu1 %v9001_v51 }
  0xa0   :  { %445 = vmatmul.mubr.bf16.gmra.mrb[8].mxu0 %v7881_v52  ;;  %558 = vmatmul.mubr.bf16.gmra.mrb[8].mxu1 %v7881_v52 }
  0xa1   :  { %454 = vmatprep.mubr.bf16.mxu0 %v8818_v0  ;;  %567 = vmatprep.mubr.bf16.mxu1 %v8818_v0 }
  0xa2   :  { %895 = vmatpush1.bf16.msra.mxu0 %v9004_v53  ;;  %937 = vmatprep.subr.bf16.mxu1 %v9007_v54 }
  0xa3   :  { %896 = vmatprep.subr.bf16.mxu0 %v9010_v55  ;;  %938 = vmatpush1.bf16.msra.mxu1 %v9013_v56 }
  0xa4   :  { %939 = vmatprep.subr.bf16.mxu1 %v9017_v58 }
  0xa6   :  { %897 = vmatpush1.bf16.msra.mxu0 %v9015_v57 }
  0xa7   :  { %898 = vmatprep.subr.bf16.mxu0 %v9021_v59  ;;  %940 = vmatpush1.bf16.msra.mxu1 %v9023_v60 }
  0xa8   :  { %455 = vmatmul.mubr.bf16.gmra.mrb[12].mxu0 %v7888_v61  ;;  %568 = vmatmul.mubr.bf16.gmra.mrb[12].mxu1 %v7888_v61 }
  0xa9   :  { %464 = vmatprep.mubr.bf16.mxu0 %v8818_v0  ;;  %577 = vmatprep.mubr.bf16.mxu1 %v8818_v0 }
  0xaa   :  { %899 = vmatpush1.bf16.msra.mxu0 %v9029_v62  ;;  %941 = vmatprep.subr.bf16.mxu1 %v9032_v63 }
  0xab   :  { %900 = vmatprep.subr.bf16.mxu0 %v9034_v1  ;;  %942 = vmatpush1.bf16.msra.mxu1 %v9036_v2 }
  0xac   :  { %943 = vmatprep.subr.bf16.mxu1 %v9039_v3 }
  0xae   :  { %901 = vmatpush1.bf16.msra.mxu0 %v9043_v4 }
  0xaf   :  { %944 = vmatpush1.bf16.msra.mxu1 %v9047_v5  ;;  %1230 = vmatprep.subr.bf16.mxu0 %v8952_v33 }
  0xb0   :  { %465 = vmatmul.mubr.bf16.gmra.mrb[16].mxu0 %v7895_v6  ;;  %578 = vmatmul.mubr.bf16.gmra.mrb[16].mxu1 %v7895_v6 }
  0xb1   :  { %474 = vmatprep.mubr.bf16.mxu0 %v8818_v0  ;;  %587 = vmatprep.mubr.bf16.mxu1 %v8818_v0 }
  0xb2   :  { %1273 = vmatprep.subr.bf16.mxu1 %v8954_v34 }
  0xb8   :  { %475 = vmatmul.mubr.bf16.gmra.mrb[20].mxu0 %v7902_v7  ;;  %588 = vmatmul.mubr.bf16.gmra.mrb[20].mxu1 %v7902_v7  ;;  %v9127_v7 = vrot.slane %v162_v16, %v10123_v30 }
  0xb9   :  { %484 = vmatprep.mubr.bf16.mxu0 %v8818_v0  ;;  %597 = vmatprep.mubr.bf16.mxu1 %v8818_v0 }
  0xc0   :  { %485 = vmatmul.mubr.bf16.gmra.mrb[24].mxu0 %v7909_v8  ;;  %598 = vmatmul.mubr.bf16.gmra.mrb[24].mxu1 %v7909_v8 }
  0xc1   :  { %494 = vmatprep.mubr.bf16.mxu0 %v8818_v0  ;;  %607 = vmatprep.mubr.bf16.mxu1 %v8818_v0 }
  0xc8   :  { %495 = vmatmul.mubr.bf16.gmra.mrb[28].mxu0 %v7916_v9  ;;  %608 = vmatmul.mubr.bf16.gmra.mrb[28].mxu1 %v7916_v9 }
  0xc9   :  { %918 = vmatprep.mubr.bf16.mxu0 %v8818_v0  ;;  %961 = vmatprep.mubr.bf16.mxu1 %v8818_v0 }
  0xd0   :  { %919 = vmatmul.mubr.bf16.vlgmr.msra.gmra.mrb[0].mxu0 %v682_v12  ;;  %962 = vmatmul.mubr.bf16.vlgmr.msra.gmra.mrb[0].mxu1 %v682_v12 }
  0xd1   :  { %1231 = vmatpush1.bf16.msra.mxu0 %v8956_v36  ;;  %1274 = vmatpush1.bf16.msra.mxu1 %v8962_v38 }
  0xd2   :  { %1232 = vmatprep.subr.bf16.mxu0 %v8959_v37  ;;  %1275 = vmatprep.subr.bf16.mxu1 %v8964_v39 }
  0xd3   :  { %1262 = vmatprep.mubr.bf16.mxu0 %v8818_v0  ;;  %1305 = vmatprep.mubr.bf16.mxu1 %v8818_v0 }
  0xd5   :  { %1233 = vmatpush1.bf16.msra.mxu0 %v8968_v40  ;;  %1276 = vmatpush1.bf16.msra.mxu1 %v8975_v42 }
  0xd6   :  { %1234 = vmatprep.subr.bf16.mxu0 %v8972_v41  ;;  %1277 = vmatprep.subr.bf16.mxu1 %v8984_v46 }
  0xd9   :  { %1235 = vmatpush1.bf16.msra.mxu0 %v8979_v44  ;;  %1278 = vmatpush1.bf16.msra.mxu1 %v8987_v47 }
  0xda   :  { %1236 = vmatprep.subr.bf16.mxu0 %v8982_v45  ;;  %1279 = vmatprep.subr.bf16.mxu1 %v8989_v48 }
  0xdd   :  { %1237 = vmatpush1.bf16.msra.mxu0 %v8994_v49  ;;  %1280 = vmatpush1.bf16.msra.mxu1 %v9001_v51 }
  0xde   :  { %1238 = vmatprep.subr.bf16.mxu0 %v8997_v50  ;;  %1281 = vmatprep.subr.bf16.mxu1 %v9007_v54 }
  0xe1   :  { %1239 = vmatpush1.bf16.msra.mxu0 %v9004_v53  ;;  %1282 = vmatpush1.bf16.msra.mxu1 %v9013_v56 }
  0xe2   :  { %1240 = vmatprep.subr.bf16.mxu0 %v9010_v55  ;;  %1283 = vmatprep.subr.bf16.mxu1 %v9017_v58 }
  0xe5   :  { %1241 = vmatpush1.bf16.msra.mxu0 %v9015_v57  ;;  %1284 = vmatpush1.bf16.msra.mxu1 %v9023_v60 }
  0xe6   :  { %1242 = vmatprep.subr.bf16.mxu0 %v9021_v59  ;;  %1285 = vmatprep.subr.bf16.mxu1 %v9032_v63 }
  0xe9   :  { %1243 = vmatpush1.bf16.msra.mxu0 %v9029_v62  ;;  %1286 = vmatpush1.bf16.msra.mxu1 %v9036_v2 }
  0xea   :  { %1244 = vmatprep.subr.bf16.mxu0 %v9034_v1  ;;  %1287 = vmatprep.subr.bf16.mxu1 %v9039_v3 }
  0xed   :  { %1245 = vmatpush1.bf16.msra.mxu0 %v9043_v4  ;;  %1288 = vmatpush1.bf16.msra.mxu1 %v9047_v5 }
  0xee   :  { %1574 = vmatprep.subr.bf16.mxu0 %v8952_v33  ;;  %1617 = vmatprep.subr.bf16.mxu1 %v8954_v34 }
 0x1a3   :  { %v920_v20 = vpop.f32.mrb[0].mxu0  ;;  %v963_v22 = vpop.f32.mrb[0].mxu1 }
 0x1a4   :  { %v7552_v23 = vadd.f32 %v920_v20, %v9109_v18  ;;  %v922_v24 = vpop.f32.mrb[1].mxu0  ;;  %v965_v25 = vpop.f32.mrb[1].mxu1  ;;  %v7584_v8 = vadd.f32 %v963_v22, %v9122_v35 }
 0x1a5   :  { %v7553_v26 = vadd.f32 %v922_v24, %v9113_v19  ;;  %v924_v27 = vpop.f32.mrb[2].mxu0  ;;  %v967_v28 = vpop.f32.mrb[2].mxu1  ;;  %v7585_v10 = vadd.f32 %v965_v25, %v9127_v7 }
 0x1a6   :  { %v6871_v29 = vmul.f32 -1.442695, %v7552_v23  ;;  %v7554_v31 = vadd.f32 %v924_v27, %v9109_v18  ;;  %v926_v32 = vpop.f32.mrb[3].mxu0  ;;  %v969_v33 = vpop.f32.mrb[3].mxu1  ;;  %v7586_v9 = vadd.f32 %v967_v28, %v9122_v35  ;;  %v6873_v11 = vmul.f32 -1.442695, %v7584_v8 }
 0x1a7   :  { %v6872_v43 = vmul.f32 -1.442695, %v7553_v26  ;;  %v7555_v52 = vadd.f32 %v926_v32, %v9113_v19  ;;  %v7587_v20 = vadd.f32 %v969_v33, %v9127_v7 }
 0x1a8   :  { %8130 = vpow2.f32 %v6871_v29  ;;  %v6874_v61 = vmul.f32 -1.442695, %v7554_v31  ;;  %v6876_v12 = vmul.f32 -1.442695, %v7586_v9 }
 0x1a9   :  { %v6875_v6 = vmul.f32 -1.442695, %v7555_v52  ;;  %8132 = vpow2.f32 %v6872_v43  ;;  %v112_v43 = vld [vmem:[#allocation9] sm:$0xff] }
 0x1aa   :  { %8134 = vpow2.f32 %v6874_v61 }
 0x1ab   :  { %8136 = vpow2.f32 %v6875_v6 }
 0x1ac   :  { %8138 = vtanh.f32 %v7585_v10  ;;  %v113_v10 = vld [vmem:[#allocation9 + $0x8] sm:$0xff] }
 0x1ad   :  { %8140 = vpow2.f32 %v6873_v11 }
 0x1ae   :  { %8142 = vpow2.f32 %v6876_v12 }
 0x1b2   :  { %v8131_v13 = vpop.eup %8130 }
 0x1b3   :  { %v990_v23 = vadd.f32 1.0, %v8131_v13  ;;  %v8133_v24 = vpop.eup %8132 }
 0x1b4   :  { %v8135_v16 = vpop.eup %8134  ;;  %v991_v26 = vadd.f32 1.0, %v8133_v24 }
 0x1b5   :  { %8144 = vrcp.f32 %v990_v23  ;;  %v993_v22 = vadd.f32 1.0, %v8135_v16  ;;  %v8137_v27 = vpop.eup %8136 }
 0x1b6   :  { %8146 = vtanh.f32 %v7587_v20  ;;  %v994_v28 = vadd.f32 1.0, %v8137_v27  ;;  %v8139_v25 = vpop.eup %8138 }
 0x1b7   :  { %8148 = vrcp.f32 %v991_v26  ;;  %v8141_v29 = vpop.eup %8140 }
 0x1b8   :  { %8150 = vrcp.f32 %v993_v22  ;;  %v8143_v31 = vpop.eup %8142  ;;  %v992_v8 = vadd.f32 1.0, %v8141_v29 }
 0x1b9   :  { %8152 = vrcp.f32 %v994_v28  ;;  %v995_v20 = vadd.f32 1.0, %v8143_v31 }
 0x1ba   :  { %8154 = vrcp.f32 %v992_v8 }
 0x1bf   :  { %v8145_v32 = vpop.eup %8144 }
 0x1c0   :  { %v8147_v33 = vpop.eup %8146  ;;  %v1012_v52 = vmul.f32 %v8145_v32, %v8139_v25 }
 0x1c1   :  { %v8149_v61 = vpop.eup %8148 }
 0x1c2   :  { %v8151_v6 = vpop.eup %8150  ;;  %v1010_v9 = vmul.f32 %v8149_v61, %v112_v43 }
 0x1c3   :  { %v1013_v11 = vmul.f32 %v8151_v6, %v8147_v33  ;;  %v8153_v12 = vpop.eup %8152 }
 0x1c4   :  { %v9133_v13 = vadd.f32 %v1012_v52, %v1010_v9  ;;  %v1011_v23 = vmul.f32 %v8153_v12, %v113_v10  ;;  %v8155_v16 = vpop.eup %8154 }
 0x1c6   :  { %8156 = vtanh.f32 %v9133_v13  ;;  %v9136_v24 = vadd.f32 %v1013_v11, %v1011_v23 }
 0x1c7   :  { %8158 = vrcp.f32 %v995_v20 }
 0x1c8   :  { %8160 = vtanh.f32 %v9136_v24 }
 0x1d0   :  { %v8157_v26 = vpop.eup %8156 }
 0x1d1   :  { %v8159_v22 = vpop.eup %8158  ;;  %v1018_v28 = vmul.f32 %v8157_v26, %v8155_v16 }
 0x1d2   :  { %v8161_v27 = vpop.eup %8160 }
 0x1d3   :  { %v1019_v25 = vmul.f32 %v8161_v27, %v8159_v22 }
 0x1d5   :  { %v9139_v29 = vpack.c.bf16 %v1019_v25, %v1018_v28 }
 0x1d7   :  { %1263 = vmatmul.mubr.bf16.vlgmr.msra.gmra.mrb[4].mxu0 %v9139_v29  ;;  %1306 = vmatmul.mubr.bf16.vlgmr.msra.gmra.mrb[4].mxu1 %v9139_v29 }
 0x1d8   :  { %1575 = vmatpush1.bf16.msra.mxu0 %v8956_v36  ;;  %1618 = vmatpush1.bf16.msra.mxu1 %v8962_v38 }
 0x1d9   :  { %1576 = vmatprep.subr.bf16.mxu0 %v8959_v37  ;;  %1619 = vmatprep.subr.bf16.mxu1 %v8964_v39 }
 0x1da   :  { %1606 = vmatprep.mubr.bf16.mxu0 %v8818_v0  ;;  %1649 = vmatprep.mubr.bf16.mxu1 %v8818_v0 }
 0x1dc   :  { %1577 = vmatpush1.bf16.msra.mxu0 %v8968_v40  ;;  %1620 = vmatpush1.bf16.msra.mxu1 %v8975_v42 }
 0x1dd   :  { %1578 = vmatprep.subr.bf16.mxu0 %v8972_v41  ;;  %1621 = vmatprep.subr.bf16.mxu1 %v8984_v46 }
 0x1e0   :  { %1579 = vmatpush1.bf16.msra.mxu0 %v8979_v44  ;;  %1622 = vmatpush1.bf16.msra.mxu1 %v8987_v47 }
 0x1e1   :  { %1580 = vmatprep.subr.bf16.mxu0 %v8982_v45  ;;  %1623 = vmatprep.subr.bf16.mxu1 %v8989_v48 }
 0x1e4   :  { %1581 = vmatpush1.bf16.msra.mxu0 %v8994_v49  ;;  %1624 = vmatpush1.bf16.msra.mxu1 %v9001_v51 }
 0x1e5   :  { %1582 = vmatprep.subr.bf16.mxu0 %v8997_v50  ;;  %1625 = vmatprep.subr.bf16.mxu1 %v9007_v54 }
 0x1e8   :  { %1583 = vmatpush1.bf16.msra.mxu0 %v9004_v53  ;;  %1626 = vmatpush1.bf16.msra.mxu1 %v9013_v56 }
 0x1e9   :  { %1584 = vmatprep.subr.bf16.mxu0 %v9010_v55  ;;  %1627 = vmatprep.subr.bf16.mxu1 %v9017_v58 }
 0x1ec   :  { %1585 = vmatpush1.bf16.msra.mxu0 %v9015_v57  ;;  %1628 = vmatpush1.bf16.msra.mxu1 %v9023_v60 }
 0x1ed   :  { %1586 = vmatprep.subr.bf16.mxu0 %v9021_v59  ;;  %1629 = vmatprep.subr.bf16.mxu1 %v9032_v63 }
 0x1f0   :  { %1587 = vmatpush1.bf16.msra.mxu0 %v9029_v62  ;;  %1630 = vmatpush1.bf16.msra.mxu1 %v9036_v2 }
 0x1f1   :  { %1588 = vmatprep.subr.bf16.mxu0 %v9034_v1  ;;  %1631 = vmatprep.subr.bf16.mxu1 %v9039_v3 }
 0x1f4   :  { %1589 = vmatpush1.bf16.msra.mxu0 %v9043_v4  ;;  %1632 = vmatpush1.bf16.msra.mxu1 %v9047_v5 }
 0x1f5   :  { %1961 = vmatprep.subr.bf16.mxu1 %v8954_v34 }
 0x2aa   :  { %v1264_v36 = vpop.f32.mrb[4].mxu0  ;;  %v1307_v37 = vpop.f32.mrb[4].mxu1 }
 0x2ab   :  { %v7556_v40 = vadd.f32 %v1264_v36, %v9109_v18  ;;  %v1266_v41 = vpop.f32.mrb[5].mxu0  ;;  %v1309_v44 = vpop.f32.mrb[5].mxu1  ;;  %v7588_v11 = vadd.f32 %v1307_v37, %v9122_v35 }
 0x2ac   :  { %v7557_v31 = vadd.f32 %v1266_v41, %v9113_v19  ;;  %v1268_v32 = vpop.f32.mrb[6].mxu0  ;;  %v1311_v43 = vpop.f32.mrb[6].mxu1  ;;  %v7589_v20 = vadd.f32 %v1309_v44, %v9127_v7 }
 0x2ad   :  { %v6909_v33 = vmul.f32 -1.442695, %v7556_v40  ;;  %v7558_v52 = vadd.f32 %v1268_v32, %v9109_v18  ;;  %v1270_v61 = vpop.f32.mrb[7].mxu0  ;;  %v1313_v6 = vpop.f32.mrb[7].mxu1  ;;  %v7590_v12 = vadd.f32 %v1311_v43, %v9122_v35  ;;  %v6911_v23 = vmul.f32 -1.442695, %v7588_v11 }
 0x2ae   :  { %v6910_v8 = vmul.f32 -1.442695, %v7557_v31  ;;  %v7559_v9 = vadd.f32 %v1270_v61, %v9113_v19  ;;  %v7591_v22 = vadd.f32 %v1313_v6, %v9127_v7 }
 0x2af   :  { %8162 = vpow2.f32 %v6909_v33  ;;  %v6912_v34 = vmul.f32 -1.442695, %v7558_v52  ;;  %v6914_v16 = vmul.f32 -1.442695, %v7590_v12 }
 0x2b0   :  { %v6913_v10 = vmul.f32 -1.442695, %v7559_v9  ;;  %8164 = vpow2.f32 %v6910_v8 }
 0x2b1   :  { %8166 = vpow2.f32 %v6912_v34 }
 0x2b2   :  { %8168 = vpow2.f32 %v6913_v10 }
 0x2b3   :  { %8170 = vtanh.f32 %v7589_v20 }
 0x2b4   :  { %8172 = vpow2.f32 %v6911_v23 }
 0x2b5   :  { %8174 = vpow2.f32 %v6914_v16 }
 0x2b9   :  { %v8163_v26 = vpop.eup %8162 }
 0x2ba   :  { %v1334_v27 = vadd.f32 1.0, %v8163_v26  ;;  %v8165_v28 = vpop.eup %8164 }
 0x2bb   :  { %v8167_v25 = vpop.eup %8166  ;;  %v1335_v36 = vadd.f32 1.0, %v8165_v28 }
 0x2bc   :  { %8176 = vrcp.f32 %v1334_v27  ;;  %v1337_v37 = vadd.f32 1.0, %v8167_v25  ;;  %v8169_v40 = vpop.eup %8168 }
 0x2bd   :  { %8178 = vtanh.f32 %v7591_v22  ;;  %v1338_v41 = vadd.f32 1.0, %v8169_v40  ;;  %v8171_v44 = vpop.eup %8170 }
 0x2be   :  { %8180 = vrcp.f32 %v1335_v36  ;;  %v8173_v31 = vpop.eup %8172 }
 0x2bf   :  { %8182 = vrcp.f32 %v1337_v37  ;;  %v8175_v32 = vpop.eup %8174  ;;  %v1336_v8 = vadd.f32 1.0, %v8173_v31 }
 0x2c0   :  { %8184 = vrcp.f32 %v1338_v41  ;;  %v1339_v12 = vadd.f32 1.0, %v8175_v32 }
 0x2c1   :  { %8186 = vrcp.f32 %v1336_v8 }
 0x2c6   :  { %v8177_v43 = vpop.eup %8176 }
 0x2c7   :  { %v8179_v33 = vpop.eup %8178  ;;  %v1356_v52 = vmul.f32 %v8177_v43, %v8171_v44 }
 0x2c8   :  { %v8181_v61 = vpop.eup %8180 }
 0x2c9   :  { %v8183_v6 = vpop.eup %8182  ;;  %v1354_v9 = vmul.f32 %v8181_v61, %v9133_v13 }
 0x2ca   :  { %v1357_v34 = vmul.f32 %v8183_v6, %v8179_v33  ;;  %v8185_v10 = vpop.eup %8184 }
 0x2cb   :  { %v9185_v11 = vadd.f32 %v1356_v52, %v1354_v9  ;;  %v1355_v20 = vmul.f32 %v8185_v10, %v9136_v24  ;;  %v8187_v16 = vpop.eup %8186 }
 0x2cd   :  { %8188 = vtanh.f32 %v9185_v11  ;;  %v9189_v23 = vadd.f32 %v1357_v34, %v1355_v20 }
 0x2ce   :  { %8190 = vrcp.f32 %v1339_v12 }
 0x2cf   :  { %8192 = vtanh.f32 %v9189_v23 }
 0x2d7   :  { %v8189_v26 = vpop.eup %8188 }
 0x2d8   :  { %v8191_v22 = vpop.eup %8190  ;;  %v1362_v13 = vmul.f32 %v8189_v26, %v8187_v16 }
 0x2d9   :  { %v8193_v27 = vpop.eup %8192 }
 0x2da   :  { %v1363_v28 = vmul.f32 %v8193_v27, %v8191_v22 }
 0x2dc   :  { %v9192_v25 = vpack.c.bf16 %v1363_v28, %v1362_v13 }
 0x2de   :  { %1607 = vmatmul.mubr.bf16.vlgmr.msra.gmra.mrb[8].mxu0 %v9192_v25  ;;  %1650 = vmatmul.mubr.bf16.vlgmr.msra.gmra.mrb[8].mxu1 %v9192_v25 }
 0x2df   :  { %1962 = vmatpush1.bf16.msra.mxu1 %v8962_v38  ;;  %1950 = vmatprep.mubr.bf16.mxu0 %v8818_v0  ;;  %v9213_v38 = vld [vmem:[#allocation13 + $0x4] ss:$16 sps:$4 sm:$0xff]  }
 0x2e0   :  { %1963 = vmatprep.subr.bf16.mxu1 %v8964_v39  ;;  %1993 = vmatprep.mubr.bf16.mxu1 %v8818_v0  ;;  %v9215_v39 = vld [vmem:[#allocation13] ss:$16 sps:$4 sm:$0xff]  }
 0x2e1   :  { %1918 = vmatprep.subr.bf16.mxu0 %v9213_v38 }
 0x2e2   :  { %1919 = vmatpush1.bf16.msra.mxu0 %v9215_v39 }
 0x2e3   :  { %1964 = vmatpush1.bf16.msra.mxu1 %v8975_v42  ;;  %v9219_v42 = vld [vmem:[#allocation13 + $0x24] ss:$16 sps:$4 sm:$0xff]  }
 0x2e4   :  { %1965 = vmatprep.subr.bf16.mxu1 %v8984_v46  ;;  %v9221_v46 = vld [vmem:[#allocation13 + $0x20] ss:$16 sps:$4 sm:$0xff]   ;;  %1920 = vmatprep.subr.bf16.mxu0 %v9219_v42 }
 0x2e6   :  { %1921 = vmatpush1.bf16.msra.mxu0 %v9221_v46 }
 0x2e7   :  { %1966 = vmatpush1.bf16.msra.mxu1 %v8987_v47  ;;  %v9225_v47 = vld [vmem:[#allocation13 + $0x44] ss:$16 sps:$4 sm:$0xff]  }
 0x2e8   :  { %1967 = vmatprep.subr.bf16.mxu1 %v8989_v48  ;;  %v9227_v48 = vld [vmem:[#allocation13 + $0x40] ss:$16 sps:$4 sm:$0xff]   ;;  %1922 = vmatprep.subr.bf16.mxu0 %v9225_v47 }
 0x2ea   :  { %1923 = vmatpush1.bf16.msra.mxu0 %v9227_v48 }
 0x2eb   :  { %1968 = vmatpush1.bf16.msra.mxu1 %v9001_v51  ;;  %1924 = vmatprep.subr.bf16.mxu0 %v8982_v45 }
 0x2ec   :  { %1969 = vmatprep.subr.bf16.mxu1 %v9007_v54 }
 0x2ee   :  { %1925 = vmatpush1.bf16.msra.mxu0 %v8994_v49 }
 0x2ef   :  { %1970 = vmatpush1.bf16.msra.mxu1 %v9013_v56  ;;  %1926 = vmatprep.subr.bf16.mxu0 %v8997_v50 }
 0x2f0   :  { %1971 = vmatprep.subr.bf16.mxu1 %v9017_v58 }
 0x2f2   :  { %1927 = vmatpush1.bf16.msra.mxu0 %v9004_v53 }
 0x2f3   :  { %1972 = vmatpush1.bf16.msra.mxu1 %v9023_v60  ;;  %1928 = vmatprep.subr.bf16.mxu0 %v9010_v55 }
 0x2f4   :  { %1973 = vmatprep.subr.bf16.mxu1 %v9032_v63 }
 0x2f6   :  { %1929 = vmatpush1.bf16.msra.mxu0 %v9015_v57 }
 0x2f7   :  { %1974 = vmatpush1.bf16.msra.mxu1 %v9036_v2  ;;  %1930 = vmatprep.subr.bf16.mxu0 %v9021_v59 }
 0x2f8   :  { %1975 = vmatprep.subr.bf16.mxu1 %v9039_v3 }
 0x2fa   :  { %1931 = vmatpush1.bf16.msra.mxu0 %v9029_v62 }
 0x2fb   :  { %1976 = vmatpush1.bf16.msra.mxu1 %v9047_v5  ;;  %1932 = vmatprep.subr.bf16.mxu0 %v9034_v1 }
 0x2fe   :  { %1933 = vmatpush1.bf16.msra.mxu0 %v9043_v4 }
 0x2ff   :  { %2262 = vmatprep.subr.bf16.mxu0 %v9213_v38 }
 0x3b1   :  { %v1608_v45 = vpop.f32.mrb[8].mxu0  ;;  %v1651_v49 = vpop.f32.mrb[8].mxu1 }
 0x3b2   :  { %v7560_v50 = vadd.f32 %v1608_v45, %v9109_v18  ;;  %v1610_v51 = vpop.f32.mrb[9].mxu0  ;;  %v1653_v53 = vpop.f32.mrb[9].mxu1  ;;  %v7592_v3 = vadd.f32 %v1651_v49, %v9122_v35 }
 0x3b3   :  { %v7561_v54 = vadd.f32 %v1610_v51, %v9113_v19  ;;  %v1612_v55 = vpop.f32.mrb[10].mxu0  ;;  %v1655_v56 = vpop.f32.mrb[10].mxu1  ;;  %v7593_v5 = vadd.f32 %v1653_v53, %v9127_v7 }
 0x3b4   :  { %v6947_v57 = vmul.f32 -1.442695, %v7560_v50  ;;  %v7562_v58 = vadd.f32 %v1612_v55, %v9109_v18  ;;  %v1614_v59 = vpop.f32.mrb[11].mxu0  ;;  %v1657_v60 = vpop.f32.mrb[11].mxu1  ;;  %v7594_v4 = vadd.f32 %v1655_v56, %v9122_v35  ;;  %v6949_v24 = vmul.f32 -1.442695, %v7592_v3 }
 0x3b5   :  { %v6948_v62 = vmul.f32 -1.442695, %v7561_v54  ;;  %v7563_v63 = vadd.f32 %v1614_v59, %v9113_v19  ;;  %v7595_v40 = vadd.f32 %v1657_v60, %v9127_v7  ;;  %v9277_v59 = vld [vmem:[#allocation13 + $0x28] ss:$16 sps:$4 sm:$0xff]   ;;  %v9281_v60 = vld [vmem:[#allocation13 + $0x4c] ss:$16 sps:$4 sm:$0xff]  }
 0x3b6   :  { %8194 = vpow2.f32 %v6947_v57  ;;  %v6950_v1 = vmul.f32 -1.442695, %v7562_v58  ;;  %v6952_v36 = vmul.f32 -1.442695, %v7594_v4  ;;  %v9271_v57 = vld [vmem:[#allocation13 + $0x8] ss:$16 sps:$4 sm:$0xff]  }
 0x3b7   :  { %v6951_v2 = vmul.f32 -1.442695, %v7563_v63  ;;  %8196 = vpow2.f32 %v6948_v62  ;;  %v9275_v58 = vld [vmem:[#allocation13 + $0x2c] ss:$16 sps:$4 sm:$0xff]   ;;  %v9283_v62 = vld [vmem:[#allocation13 + $0x48] ss:$16 sps:$4 sm:$0xff]  }
 0x3b8   :  { %8198 = vpow2.f32 %v6950_v1  ;;  %v9287_v63 = vld [vmem:[#allocation13 + $0x64] ss:$16 sps:$4 sm:$0xff]   ;;  %v9289_v1 = vld [vmem:[#allocation13 + $0x6c] ss:$16 sps:$4 sm:$0xff]   ;;  %v9293_v3 = vld [vmem:[#allocation13 + $0x68] ss:$16 sps:$4 sm:$0xff]  }
 0x3b9   :  { %8200 = vpow2.f32 %v6951_v2  ;;  %v9291_v2 = vld [vmem:[#allocation13 + $0x60] ss:$16 sps:$4 sm:$0xff]  }
 0x3ba   :  { %8202 = vtanh.f32 %v7593_v5  ;;  %v9299_v4 = vld [vmem:[#allocation13 + $0x80] ss:$16 sps:$4 sm:$0xff]   ;;  %v9301_v5 = vld [vmem:[#allocation13 + $0x84] ss:$16 sps:$4 sm:$0xff]  }
 0x3bb   :  { %8204 = vpow2.f32 %v6949_v24  ;;  %v9303_v24 = vld [vmem:[#allocation13 + $0x88] ss:$16 sps:$4 sm:$0xff]  }
 0x3bc   :  { %8206 = vpow2.f32 %v6952_v36  ;;  %v9305_v36 = vld [vmem:[#allocation13 + $0x8c] ss:$16 sps:$4 sm:$0xff]  }
 0x3c0   :  { %v8195_v37 = vpop.eup %8194 }
 0x3c1   :  { %v1678_v41 = vadd.f32 1.0, %v8195_v37  ;;  %v8197_v44 = vpop.eup %8196  ;;  %v9307_v37 = vld [vmem:[#allocation13 + $0xa4] ss:$16 sps:$4 sm:$0xff]  }
 0x3c2   :  { %v8199_v31 = vpop.eup %8198  ;;  %v1679_v32 = vadd.f32 1.0, %v8197_v44  ;;  %v9318_v44 = vld [vmem:[#allocation13 + $0xa8] ss:$16 sps:$4 sm:$0xff]  }
 0x3c3   :  { %8208 = vrcp.f32 %v1678_v41  ;;  %v1681_v43 = vadd.f32 1.0, %v8199_v31  ;;  %v8201_v33 = vpop.eup %8200  ;;  %v9314_v41 = vld [vmem:[#allocation13 + $0xa0] ss:$16 sps:$4 sm:$0xff]   ;;  %v9320_v31 = vld [vmem:[#allocation13 + $0xc4] ss:$16 sps:$4 sm:$0xff]  }
 0x3c4   :  { %8210 = vtanh.f32 %v7595_v40  ;;  %v1682_v52 = vadd.f32 1.0, %v8201_v33  ;;  %v8203_v61 = vpop.eup %8202  ;;  %v9310_v40 = vld [vmem:[#allocation13 + $0xac] ss:$16 sps:$4 sm:$0xff]   ;;  %v9330_v33 = vld [vmem:[#allocation13 + $0xc8] ss:$16 sps:$4 sm:$0xff]  }
 0x3c5   :  { %8212 = vrcp.f32 %v1679_v32  ;;  %v8205_v6 = vpop.eup %8204  ;;  %v9323_v32 = vld [vmem:[#allocation13 + $0xcc] ss:$16 sps:$4 sm:$0xff]  }
 0x3c6   :  { %8214 = vrcp.f32 %v1681_v43  ;;  %v8207_v8 = vpop.eup %8206  ;;  %v1680_v16 = vadd.f32 1.0, %v8205_v6  ;;  %v9326_v43 = vld [vmem:[#allocation13 + $0xc0] ss:$16 sps:$4 sm:$0xff]  }
 0x3c7   :  { %8216 = vrcp.f32 %v1682_v52  ;;  %v1683_v28 = vadd.f32 1.0, %v8207_v8  ;;  %v9332_v52 = vld [vmem:[#allocation13 + $0xe4] ss:$16 sps:$4 sm:$0xff]   ;;  %v9338_v6 = vld [vmem:[#allocation13 + $0xe0] ss:$16 sps:$4 sm:$0xff]  }
 0x3c8   :  { %8218 = vrcp.f32 %v1680_v16  ;;  %v9342_v8 = vld [vmem:[#allocation13 + $0xe8] ss:$16 sps:$4 sm:$0xff]  }
 0x3cd   :  { %v8209_v9 = vpop.eup %8208 }
 0x3ce   :  { %v8211_v34 = vpop.eup %8210  ;;  %v1700_v10 = vmul.f32 %v8209_v9, %v8203_v61  ;;  %v9335_v61 = vld [vmem:[#allocation13 + $0xec] ss:$16 sps:$4 sm:$0xff]  }
 0x3cf   :  { %v8213_v12 = vpop.eup %8212 }
 0x3d0   :  { %v8215_v20 = vpop.eup %8214  ;;  %v1698_v26 = vmul.f32 %v8213_v12, %v9185_v11 }
 0x3d1   :  { %v1701_v22 = vmul.f32 %v8215_v20, %v8211_v34  ;;  %v8217_v27 = vpop.eup %8216 }
 0x3d2   :  { %v9251_v13 = vadd.f32 %v1700_v10, %v1698_v26  ;;  %v1699_v45 = vmul.f32 %v8217_v27, %v9189_v23  ;;  %v8219_v50 = vpop.eup %8218  ;;  %v9269_v23 = vld [vmem:[#allocation13 + $0xc] ss:$16 sps:$4 sm:$0xff]  }
 0x3d3   :  { %2305 = vmatprep.subr.bf16.mxu1 %v9269_v23 }
 0x3d4   :  { %8220 = vtanh.f32 %v9251_v13  ;;  %v9255_v49 = vadd.f32 %v1701_v22, %v1699_v45 }
 0x3d5   :  { %8222 = vrcp.f32 %v1683_v28 }
 0x3d6   :  { %8224 = vtanh.f32 %v9255_v49 }
 0x3de   :  { %v8221_v51 = vpop.eup %8220 }
 0x3df   :  { %v8223_v53 = vpop.eup %8222  ;;  %v1706_v11 = vmul.f32 %v8221_v51, %v8219_v50 }
 0x3e0   :  { %v8225_v54 = vpop.eup %8224 }
 0x3e1   :  { %v1707_v55 = vmul.f32 %v8225_v54, %v8223_v53 }
 0x3e3   :  { %v9258_v56 = vpack.c.bf16 %v1707_v55, %v1706_v11 }
 0x3e5   :  { %1951 = vmatmul.mubr.bf16.vlgmr.msra.gmra.mrb[12].mxu0 %v9258_v56  ;;  %1994 = vmatmul.mubr.bf16.vlgmr.msra.gmra.mrb[12].mxu1 %v9258_v56 }
 0x3e6   :  { %2263 = vmatpush1.bf16.msra.mxu0 %v9215_v39  ;;  %2294 = vmatprep.mubr.bf16.mxu0 %v8818_v0 }
 0x3e7   :  { %2264 = vmatprep.subr.bf16.mxu0 %v9219_v42  ;;  %2337 = vmatprep.mubr.bf16.mxu1 %v8818_v0 }
 0x3e8   :  { %2306 = vmatpush1.bf16.msra.mxu1 %v9271_v57 }
 0x3e9   :  { %2307 = vmatprep.subr.bf16.mxu1 %v9275_v58 }
 0x3ea   :  { %2265 = vmatpush1.bf16.msra.mxu0 %v9221_v46 }
 0x3eb   :  { %2266 = vmatprep.subr.bf16.mxu0 %v9225_v47 }
 0x3ec   :  { %2308 = vmatpush1.bf16.msra.mxu1 %v9277_v59 }
 0x3ed   :  { %2309 = vmatprep.subr.bf16.mxu1 %v9281_v60 }
 0x3ee   :  { %2267 = vmatpush1.bf16.msra.mxu0 %v9227_v48 }
 0x3ef   :  { %2268 = vmatprep.subr.bf16.mxu0 %v9287_v63 }
 0x3f0   :  { %2310 = vmatpush1.bf16.msra.mxu1 %v9283_v62 }
 0x3f1   :  { %2311 = vmatprep.subr.bf16.mxu1 %v9289_v1 }
 0x3f2   :  { %2269 = vmatpush1.bf16.msra.mxu0 %v9291_v2 }
 0x3f3   :  { %2270 = vmatprep.subr.bf16.mxu0 %v9301_v5 }
 0x3f4   :  { %2312 = vmatpush1.bf16.msra.mxu1 %v9293_v3 }
 0x3f5   :  { %2313 = vmatprep.subr.bf16.mxu1 %v9305_v36 }
 0x3f6   :  { %2271 = vmatpush1.bf16.msra.mxu0 %v9299_v4 }
 0x3f7   :  { %2272 = vmatprep.subr.bf16.mxu0 %v9307_v37 }
 0x3f8   :  { %2314 = vmatpush1.bf16.msra.mxu1 %v9303_v24 }
 0x3f9   :  { %2315 = vmatprep.subr.bf16.mxu1 %v9310_v40 }
 0x3fa   :  { %2273 = vmatpush1.bf16.msra.mxu0 %v9314_v41 }
 0x3fb   :  { %2274 = vmatprep.subr.bf16.mxu0 %v9320_v31 }
 0x3fc   :  { %2316 = vmatpush1.bf16.msra.mxu1 %v9318_v44 }
 0x3fd   :  { %2317 = vmatprep.subr.bf16.mxu1 %v9323_v32 }
 0x3fe   :  { %2275 = vmatpush1.bf16.msra.mxu0 %v9326_v43 }
 0x3ff   :  { %2276 = vmatprep.subr.bf16.mxu0 %v9332_v52 }
 0x400   :  { %2318 = vmatpush1.bf16.msra.mxu1 %v9330_v33 }
 0x401   :  { %2319 = vmatprep.subr.bf16.mxu1 %v9335_v61 }
 0x402   :  { %2277 = vmatpush1.bf16.msra.mxu0 %v9338_v6 }
 0x403   :  { %2606 = vmatprep.subr.bf16.mxu0 %v9213_v38 }
 0x404   :  { %2320 = vmatpush1.bf16.msra.mxu1 %v9342_v8 }
 0x405   :  { %2649 = vmatprep.subr.bf16.mxu1 %v9269_v23 }
 0x4b8   :  { %v1952_v9 = vpop.f32.mrb[12].mxu0  ;;  %v1995_v34 = vpop.f32.mrb[12].mxu1 }
 0x4b9   :  { %v7564_v10 = vadd.f32 %v1952_v9, %v9109_v18  ;;  %v1954_v12 = vpop.f32.mrb[13].mxu0  ;;  %v1997_v20 = vpop.f32.mrb[13].mxu1  ;;  %v7596_v55 = vadd.f32 %v1995_v34, %v9122_v35 }
 0x4ba   :  { %v7565_v16 = vadd.f32 %v1954_v12, %v9113_v19  ;;  %v1956_v26 = vpop.f32.mrb[14].mxu0  ;;  %v1999_v22 = vpop.f32.mrb[14].mxu1  ;;  %v7597_v12 = vadd.f32 %v1997_v20, %v9127_v7 }
 0x4bb   :  { %v6985_v27 = vmul.f32 -1.442695, %v7564_v10  ;;  %v7566_v28 = vadd.f32 %v1956_v26, %v9109_v18  ;;  %v1958_v45 = vpop.f32.mrb[15].mxu0  ;;  %v2001_v50 = vpop.f32.mrb[15].mxu1  ;;  %v7598_v9 = vadd.f32 %v1999_v22, %v9122_v35  ;;  %v6987_v10 = vmul.f32 -1.442695, %v7596_v55 }
 0x4bc   :  { %v6986_v51 = vmul.f32 -1.442695, %v7565_v16  ;;  %v7567_v53 = vadd.f32 %v1958_v45, %v9113_v19  ;;  %v7599_v16 = vadd.f32 %v2001_v50, %v9127_v7 }
 0x4bd   :  { %8226 = vpow2.f32 %v6985_v27  ;;  %v6988_v54 = vmul.f32 -1.442695, %v7566_v28  ;;  %v6990_v30 = vmul.f32 -1.442695, %v7598_v9 }
 0x4be   :  { %v6989_v11 = vmul.f32 -1.442695, %v7567_v53  ;;  %8228 = vpow2.f32 %v6986_v51 }
 0x4bf   :  { %8230 = vpow2.f32 %v6988_v54 }
 0x4c0   :  { %8232 = vpow2.f32 %v6989_v11 }
 0x4c1   :  { %8234 = vtanh.f32 %v7597_v12 }
 0x4c2   :  { %8236 = vpow2.f32 %v6987_v10 }
 0x4c3   :  { %8238 = vpow2.f32 %v6990_v30 }
 0x4c7   :  { %v8227_v26 = vpop.eup %8226 }
 0x4c8   :  { %v2022_v21 = vadd.f32 1.0, %v8227_v26  ;;  %v8229_v27 = vpop.eup %8228 }
 0x4c9   :  { %v8231_v28 = vpop.eup %8230  ;;  %v2023_v45 = vadd.f32 1.0, %v8229_v27 }
 0x4ca   :  { %8240 = vrcp.f32 %v2022_v21  ;;  %v2025_v34 = vadd.f32 1.0, %v8231_v28  ;;  %v8233_v51 = vpop.eup %8232 }
 0x4cb   :  { %8242 = vtanh.f32 %v7599_v16  ;;  %v2026_v22 = vadd.f32 1.0, %v8233_v51  ;;  %v8235_v20 = vpop.eup %8234 }
 0x4cc   :  { %8244 = vrcp.f32 %v2023_v45  ;;  %v8237_v53 = vpop.eup %8236 }
 0x4cd   :  { %8246 = vrcp.f32 %v2025_v34  ;;  %v8239_v54 = vpop.eup %8238  ;;  %v2024_v10 = vadd.f32 1.0, %v8237_v53 }
 0x4ce   :  { %8248 = vrcp.f32 %v2026_v22  ;;  %v2027_v16 = vadd.f32 1.0, %v8239_v54 }
 0x4cf   :  { %8250 = vrcp.f32 %v2024_v10 }
 0x4d4   :  { %v8241_v11 = vpop.eup %8240 }
 0x4d5   :  { %v8243_v55 = vpop.eup %8242  ;;  %v2044_v50 = vmul.f32 %v8241_v11, %v8235_v20 }
 0x4d6   :  { %v8245_v9 = vpop.eup %8244 }
 0x4d7   :  { %v8247_v12 = vpop.eup %8246  ;;  %v2042_v30 = vmul.f32 %v8245_v9, %v9251_v13 }
 0x4d8   :  { %v2045_v21 = vmul.f32 %v8247_v12, %v8243_v55  ;;  %v8249_v26 = vpop.eup %8248 }
 0x4d9   :  { %v9358_v27 = vadd.f32 %v2044_v50, %v2042_v30  ;;  %v2043_v28 = vmul.f32 %v8249_v26, %v9255_v49  ;;  %v8251_v34 = vpop.eup %8250 }
 0x4db   :  { %8252 = vtanh.f32 %v9358_v27  ;;  %v9362_v45 = vadd.f32 %v2045_v21, %v2043_v28 }
 0x4dc   :  { %8254 = vrcp.f32 %v2027_v16 }
 0x4dd   :  { %8256 = vtanh.f32 %v9362_v45 }
 0x4e5   :  { %v8253_v51 = vpop.eup %8252 }
 0x4e6   :  { %v8255_v22 = vpop.eup %8254  ;;  %v2050_v13 = vmul.f32 %v8253_v51, %v8251_v34 }
 0x4e7   :  { %v8257_v20 = vpop.eup %8256 }
 0x4e8   :  { %v2051_v53 = vmul.f32 %v8257_v20, %v8255_v22 }
 0x4ea   :  { %v9365_v11 = vpack.c.bf16 %v2051_v53, %v2050_v13 }
 0x4ec   :  { %2295 = vmatmul.mubr.bf16.vlgmr.msra.gmra.mrb[16].mxu0 %v9365_v11  ;;  %2338 = vmatmul.mubr.bf16.vlgmr.msra.gmra.mrb[16].mxu1 %v9365_v11 }
 0x4ed   :  { %2607 = vmatpush1.bf16.msra.mxu0 %v9215_v39  ;;  %2650 = vmatpush1.bf16.msra.mxu1 %v9271_v57 }
 0x4ee   :  { %2608 = vmatprep.subr.bf16.mxu0 %v9219_v42  ;;  %2651 = vmatprep.subr.bf16.mxu1 %v9275_v58 }
 0x4ef   :  { %2638 = vmatprep.mubr.bf16.mxu0 %v8818_v0  ;;  %2681 = vmatprep.mubr.bf16.mxu1 %v8818_v0 }
 0x4f1   :  { %2609 = vmatpush1.bf16.msra.mxu0 %v9221_v46  ;;  %2652 = vmatpush1.bf16.msra.mxu1 %v9277_v59 }
 0x4f2   :  { %2610 = vmatprep.subr.bf16.mxu0 %v9225_v47  ;;  %2653 = vmatprep.subr.bf16.mxu1 %v9281_v60 }
 0x4f5   :  { %2611 = vmatpush1.bf16.msra.mxu0 %v9227_v48  ;;  %2654 = vmatpush1.bf16.msra.mxu1 %v9283_v62 }
 0x4f6   :  { %2612 = vmatprep.subr.bf16.mxu0 %v9287_v63  ;;  %2655 = vmatprep.subr.bf16.mxu1 %v9289_v1 }
 0x4f9   :  { %2613 = vmatpush1.bf16.msra.mxu0 %v9291_v2  ;;  %2656 = vmatpush1.bf16.msra.mxu1 %v9293_v3 }
 0x4fa   :  { %2614 = vmatprep.subr.bf16.mxu0 %v9301_v5  ;;  %2657 = vmatprep.subr.bf16.mxu1 %v9305_v36 }
 0x4fd   :  { %2615 = vmatpush1.bf16.msra.mxu0 %v9299_v4  ;;  %2658 = vmatpush1.bf16.msra.mxu1 %v9303_v24 }
 0x4fe   :  { %2616 = vmatprep.subr.bf16.mxu0 %v9307_v37  ;;  %2659 = vmatprep.subr.bf16.mxu1 %v9310_v40 }
 0x501   :  { %2617 = vmatpush1.bf16.msra.mxu0 %v9314_v41  ;;  %2660 = vmatpush1.bf16.msra.mxu1 %v9318_v44 }
 0x502   :  { %2618 = vmatprep.subr.bf16.mxu0 %v9320_v31  ;;  %2661 = vmatprep.subr.bf16.mxu1 %v9323_v32 }
 0x505   :  { %2619 = vmatpush1.bf16.msra.mxu0 %v9326_v43  ;;  %2662 = vmatpush1.bf16.msra.mxu1 %v9330_v33 }
 0x506   :  { %2620 = vmatprep.subr.bf16.mxu0 %v9332_v52  ;;  %2663 = vmatprep.subr.bf16.mxu1 %v9335_v61 }
 0x509   :  { %2621 = vmatpush1.bf16.msra.mxu0 %v9338_v6  ;;  %2664 = vmatpush1.bf16.msra.mxu1 %v9342_v8 }
 0x50a   :  { %2950 = vmatprep.subr.bf16.mxu0 %v9213_v38  ;;  %2993 = vmatprep.subr.bf16.mxu1 %v9269_v23 }
 0x5bf   :  { %v2296_v49 = vpop.f32.mrb[16].mxu0  ;;  %v2339_v54 = vpop.f32.mrb[16].mxu1 }
 0x5c0   :  { %v7568_v55 = vadd.f32 %v2296_v49, %v9109_v18  ;;  %v2298_v50 = vpop.f32.mrb[17].mxu0  ;;  %v2341_v9 = vpop.f32.mrb[17].mxu1  ;;  %v7600_v20 = vadd.f32 %v2339_v54, %v9122_v35 }
 0x5c1   :  { %v7569_v12 = vadd.f32 %v2298_v50, %v9113_v19  ;;  %v2300_v10 = vpop.f32.mrb[18].mxu0  ;;  %v2343_v30 = vpop.f32.mrb[18].mxu1  ;;  %v7601_v53 = vadd.f32 %v2341_v9, %v9127_v7 }
 0x5c2   :  { %v7023_v21 = vmul.f32 -1.442695, %v7568_v55  ;;  %v7570_v26 = vadd.f32 %v2300_v10, %v9109_v18  ;;  %v2302_v16 = vpop.f32.mrb[19].mxu0  ;;  %v2345_v28 = vpop.f32.mrb[19].mxu1  ;;  %v7602_v13 = vadd.f32 %v2343_v30, %v9122_v35  ;;  %v7025_v49 = vmul.f32 -1.442695, %v7600_v20 }
 0x5c3   :  { %v7024_v34 = vmul.f32 -1.442695, %v7569_v12  ;;  %v7571_v38 = vadd.f32 %v2302_v16, %v9113_v19  ;;  %v7603_v12 = vadd.f32 %v2345_v28, %v9127_v7 }
 0x5c4   :  { %8258 = vpow2.f32 %v7023_v21  ;;  %v7026_v51 = vmul.f32 -1.442695, %v7570_v26  ;;  %v7028_v55 = vmul.f32 -1.442695, %v7602_v13 }
 0x5c5   :  { %v7027_v22 = vmul.f32 -1.442695, %v7571_v38  ;;  %8260 = vpow2.f32 %v7024_v34 }
 0x5c6   :  { %8262 = vpow2.f32 %v7026_v51 }
 0x5c7   :  { %8264 = vpow2.f32 %v7027_v22 }
 0x5c8   :  { %8266 = vtanh.f32 %v7601_v53 }
 0x5c9   :  { %8268 = vpow2.f32 %v7025_v49 }
 0x5ca   :  { %8270 = vpow2.f32 %v7028_v55 }
 0x5ce   :  { %v8259_v50 = vpop.eup %8258 }
 0x5cf   :  { %v2366_v10 = vadd.f32 1.0, %v8259_v50  ;;  %v8261_v21 = vpop.eup %8260 }
 0x5d0   :  { %v8263_v26 = vpop.eup %8262  ;;  %v2367_v16 = vadd.f32 1.0, %v8261_v21 }
 0x5d1   :  { %8272 = vrcp.f32 %v2366_v10  ;;  %v2369_v54 = vadd.f32 1.0, %v8263_v26  ;;  %v8265_v34 = vpop.eup %8264 }
 0x5d2   :  { %8274 = vtanh.f32 %v7603_v12  ;;  %v2370_v30 = vadd.f32 1.0, %v8265_v34  ;;  %v8267_v9 = vpop.eup %8266 }
 0x5d3   :  { %8276 = vrcp.f32 %v2367_v16  ;;  %v8269_v38 = vpop.eup %8268 }
 0x5d4   :  { %8278 = vrcp.f32 %v2369_v54  ;;  %v8271_v51 = vpop.eup %8270  ;;  %v2368_v49 = vadd.f32 1.0, %v8269_v38 }
 0x5d5   :  { %8280 = vrcp.f32 %v2370_v30  ;;  %v2371_v12 = vadd.f32 1.0, %v8271_v51 }
 0x5d6   :  { %8282 = vrcp.f32 %v2368_v49 }
 0x5db   :  { %v8273_v22 = vpop.eup %8272 }
 0x5dc   :  { %v8275_v20 = vpop.eup %8274  ;;  %v2388_v28 = vmul.f32 %v8273_v22, %v8267_v9 }
 0x5dd   :  { %v8277_v13 = vpop.eup %8276 }
 0x5de   :  { %v8279_v53 = vpop.eup %8278  ;;  %v2386_v55 = vmul.f32 %v8277_v13, %v9358_v27 }
 0x5df   :  { %v2389_v50 = vmul.f32 %v8279_v53, %v8275_v20  ;;  %v8281_v10 = vpop.eup %8280 }
 0x5e0   :  { %v9412_v21 = vadd.f32 %v2388_v28, %v2386_v55  ;;  %v2387_v26 = vmul.f32 %v8281_v10, %v9362_v45  ;;  %v8283_v54 = vpop.eup %8282 }
 0x5e2   :  { %8284 = vtanh.f32 %v9412_v21  ;;  %v9416_v16 = vadd.f32 %v2389_v50, %v2387_v26 }
 0x5e3   :  { %8286 = vrcp.f32 %v2371_v12 }
 0x5e4   :  { %8288 = vtanh.f32 %v9416_v16 }
 0x5ec   :  { %v8285_v34 = vpop.eup %8284 }
 0x5ed   :  { %v8287_v30 = vpop.eup %8286  ;;  %v2394_v27 = vmul.f32 %v8285_v34, %v8283_v54 }
 0x5ee   :  { %v8289_v9 = vpop.eup %8288 }
 0x5ef   :  { %v2395_v38 = vmul.f32 %v8289_v9, %v8287_v30 }
 0x5f1   :  { %v9419_v22 = vpack.c.bf16 %v2395_v38, %v2394_v27 }
 0x5f3   :  { %2639 = vmatmul.mubr.bf16.vlgmr.msra.gmra.mrb[20].mxu0 %v9419_v22  ;;  %2682 = vmatmul.mubr.bf16.vlgmr.msra.gmra.mrb[20].mxu1 %v9419_v22 }
 0x5f4   :  { %2951 = vmatpush1.bf16.msra.mxu0 %v9215_v39  ;;  %2994 = vmatpush1.bf16.msra.mxu1 %v9271_v57 }
 0x5f5   :  { %2952 = vmatprep.subr.bf16.mxu0 %v9219_v42  ;;  %2995 = vmatprep.subr.bf16.mxu1 %v9275_v58 }
 0x5f6   :  { %2982 = vmatprep.mubr.bf16.mxu0 %v8818_v0  ;;  %3025 = vmatprep.mubr.bf16.mxu1 %v8818_v0 }
 0x5f8   :  { %2953 = vmatpush1.bf16.msra.mxu0 %v9221_v46  ;;  %2996 = vmatpush1.bf16.msra.mxu1 %v9277_v59 }
 0x5f9   :  { %2954 = vmatprep.subr.bf16.mxu0 %v9225_v47  ;;  %2997 = vmatprep.subr.bf16.mxu1 %v9281_v60 }
 0x5fc   :  { %2955 = vmatpush1.bf16.msra.mxu0 %v9227_v48  ;;  %2998 = vmatpush1.bf16.msra.mxu1 %v9283_v62 }
 0x5fd   :  { %2956 = vmatprep.subr.bf16.mxu0 %v9287_v63  ;;  %2999 = vmatprep.subr.bf16.mxu1 %v9289_v1 }
 0x600   :  { %2957 = vmatpush1.bf16.msra.mxu0 %v9291_v2  ;;  %3000 = vmatpush1.bf16.msra.mxu1 %v9293_v3 }
 0x601   :  { %2958 = vmatprep.subr.bf16.mxu0 %v9301_v5  ;;  %3001 = vmatprep.subr.bf16.mxu1 %v9305_v36 }
 0x604   :  { %2959 = vmatpush1.bf16.msra.mxu0 %v9299_v4  ;;  %3002 = vmatpush1.bf16.msra.mxu1 %v9303_v24 }
 0x605   :  { %2960 = vmatprep.subr.bf16.mxu0 %v9307_v37  ;;  %3003 = vmatprep.subr.bf16.mxu1 %v9310_v40 }
 0x608   :  { %2961 = vmatpush1.bf16.msra.mxu0 %v9314_v41  ;;  %3004 = vmatpush1.bf16.msra.mxu1 %v9318_v44 }
 0x609   :  { %2962 = vmatprep.subr.bf16.mxu0 %v9320_v31  ;;  %3005 = vmatprep.subr.bf16.mxu1 %v9323_v32 }
 0x60c   :  { %2963 = vmatpush1.bf16.msra.mxu0 %v9326_v43  ;;  %3006 = vmatpush1.bf16.msra.mxu1 %v9330_v33 }
 0x60d   :  { %2964 = vmatprep.subr.bf16.mxu0 %v9332_v52  ;;  %3007 = vmatprep.subr.bf16.mxu1 %v9335_v61 }
 0x610   :  { %2965 = vmatpush1.bf16.msra.mxu0 %v9338_v6  ;;  %3008 = vmatpush1.bf16.msra.mxu1 %v9342_v8 }
 0x611   :  { %3337 = vmatprep.subr.bf16.mxu1 %v9269_v23 }
 0x6c6   :  { %v2640_v39 = vpop.f32.mrb[20].mxu0  ;;  %v2683_v42 = vpop.f32.mrb[20].mxu1 }
 0x6c7   :  { %v7572_v46 = vadd.f32 %v2640_v39, %v9109_v18  ;;  %v2642_v47 = vpop.f32.mrb[21].mxu0  ;;  %v2685_v48 = vpop.f32.mrb[21].mxu1  ;;  %v7604_v12 = vadd.f32 %v2683_v42, %v9122_v35 }
 0x6c8   :  { %v7573_v45 = vadd.f32 %v2642_v47, %v9113_v19  ;;  %v2644_v51 = vpop.f32.mrb[22].mxu0  ;;  %v2687_v20 = vpop.f32.mrb[22].mxu1  ;;  %v7605_v54 = vadd.f32 %v2685_v48, %v9127_v7 }
 0x6c9   :  { %v7061_v28 = vmul.f32 -1.442695, %v7572_v46  ;;  %v7574_v13 = vadd.f32 %v2644_v51, %v9109_v18  ;;  %v2646_v53 = vpop.f32.mrb[23].mxu0  ;;  %v2689_v49 = vpop.f32.mrb[23].mxu1  ;;  %v7606_v26 = vadd.f32 %v2687_v20, %v9122_v35  ;;  %v7063_v34 = vmul.f32 -1.442695, %v7604_v12 }
 0x6ca   :  { %v7062_v55 = vmul.f32 -1.442695, %v7573_v45  ;;  %v7575_v50 = vadd.f32 %v2646_v53, %v9113_v19  ;;  %v7607_v27 = vadd.f32 %v2689_v49, %v9127_v7 }
 0x6cb   :  { %8290 = vpow2.f32 %v7061_v28  ;;  %v7064_v23 = vmul.f32 -1.442695, %v7574_v13  ;;  %v7066_v30 = vmul.f32 -1.442695, %v7606_v26 }
 0x6cc   :  { %v7065_v10 = vmul.f32 -1.442695, %v7575_v50  ;;  %8292 = vpow2.f32 %v7062_v55 }
 0x6cd   :  { %8294 = vpow2.f32 %v7064_v23 }
 0x6ce   :  { %8296 = vpow2.f32 %v7065_v10 }
 0x6cf   :  { %8298 = vtanh.f32 %v7605_v54 }
 0x6d0   :  { %8300 = vpow2.f32 %v7063_v34 }
 0x6d1   :  { %8302 = vpow2.f32 %v7066_v30 }
 0x6d5   :  { %v8291_v9 = vpop.eup %8290 }
 0x6d6   :  { %v2710_v38 = vadd.f32 1.0, %v8291_v9  ;;  %v8293_v39 = vpop.eup %8292 }
 0x6d7   :  { %v8295_v46 = vpop.eup %8294  ;;  %v2711_v47 = vadd.f32 1.0, %v8293_v39 }
 0x6d8   :  { %8304 = vrcp.f32 %v2710_v38  ;;  %v2713_v42 = vadd.f32 1.0, %v8295_v46  ;;  %v8297_v45 = vpop.eup %8296 }
 0x6d9   :  { %8306 = vtanh.f32 %v7607_v27  ;;  %v2714_v51 = vadd.f32 1.0, %v8297_v45  ;;  %v8299_v48 = vpop.eup %8298 }
 0x6da   :  { %8308 = vrcp.f32 %v2711_v47  ;;  %v8301_v20 = vpop.eup %8300 }
 0x6db   :  { %8310 = vrcp.f32 %v2713_v42  ;;  %v8303_v28 = vpop.eup %8302  ;;  %v2712_v23 = vadd.f32 1.0, %v8301_v20 }
 0x6dc   :  { %8312 = vrcp.f32 %v2714_v51  ;;  %v2715_v34 = vadd.f32 1.0, %v8303_v28 }
 0x6dd   :  { %8314 = vrcp.f32 %v2712_v23 }
 0x6e2   :  { %v8305_v13 = vpop.eup %8304 }
 0x6e3   :  { %v8307_v53 = vpop.eup %8306  ;;  %v2732_v49 = vmul.f32 %v8305_v13, %v8299_v48 }
 0x6e4   :  { %v8309_v55 = vpop.eup %8308 }
 0x6e5   :  { %v8311_v50 = vpop.eup %8310  ;;  %v2730_v10 = vmul.f32 %v8309_v55, %v9412_v21 }
 0x6e6   :  { %v2733_v12 = vmul.f32 %v8311_v50, %v8307_v53  ;;  %v8313_v26 = vpop.eup %8312 }
 0x6e7   :  { %v9465_v54 = vadd.f32 %v2732_v49, %v2730_v10  ;;  %v2731_v30 = vmul.f32 %v8313_v26, %v9416_v16  ;;  %v8315_v27 = vpop.eup %8314 }
 0x6e9   :  { %8316 = vtanh.f32 %v9465_v54  ;;  %v9469_v9 = vadd.f32 %v2733_v12, %v2731_v30 }
 0x6ea   :  { %8318 = vrcp.f32 %v2715_v34 }
 0x6eb   :  { %8320 = vtanh.f32 %v9469_v9 }
 0x6f3   :  { %v8317_v38 = vpop.eup %8316 }
 0x6f4   :  { %v8319_v39 = vpop.eup %8318  ;;  %v2738_v21 = vmul.f32 %v8317_v38, %v8315_v27 }
 0x6f5   :  { %v8321_v46 = vpop.eup %8320 }
 0x6f6   :  { %v2739_v47 = vmul.f32 %v8321_v46, %v8319_v39 }
 0x6f8   :  { %v9472_v42 = vpack.c.bf16 %v2739_v47, %v2738_v21 }
 0x6fa   :  { %2983 = vmatmul.mubr.bf16.vlgmr.msra.gmra.mrb[24].mxu0 %v9472_v42  ;;  %3026 = vmatmul.mubr.bf16.vlgmr.msra.gmra.mrb[24].mxu1 %v9472_v42 }
 0x6fb   :  { %3338 = vmatpush1.bf16.msra.mxu1 %v9271_v57  ;;  %3326 = vmatprep.mubr.bf16.mxu0 %v8818_v0  ;;  %v7976_v57 = vld [vmem:[#allocation13 + $0x4] ss:$16 sps:$4 sm:$0xff]  }
 0x6fc   :  { %3339 = vmatprep.subr.bf16.mxu1 %v9275_v58  ;;  %3369 = vmatprep.mubr.bf16.mxu1 %v8818_v0  ;;  %v7974_v58 = vld [vmem:[#allocation13] ss:$16 sps:$4 sm:$0xff]  }
 0x6fd   :  { %3294 = vmatprep.subr.bf16.mxu0 %v7976_v57 }
 0x6fe   :  { %3295 = vmatpush1.bf16.msra.mxu0 %v7974_v58 }
 0x6ff   :  { %3340 = vmatpush1.bf16.msra.mxu1 %v9277_v59  ;;  %v7979_v59 = vld [vmem:[#allocation13 + $0x24] ss:$16 sps:$4 sm:$0xff]  }
 0x700   :  { %3341 = vmatprep.subr.bf16.mxu1 %v9281_v60  ;;  %v7977_v60 = vld [vmem:[#allocation13 + $0x20] ss:$16 sps:$4 sm:$0xff]   ;;  %3296 = vmatprep.subr.bf16.mxu0 %v7979_v59 }
 0x702   :  { %3297 = vmatpush1.bf16.msra.mxu0 %v7977_v60 }
 0x703   :  { %3342 = vmatpush1.bf16.msra.mxu1 %v9283_v62  ;;  %v7982_v62 = vld [vmem:[#allocation13 + $0x44] ss:$16 sps:$4 sm:$0xff]  }
 0x704   :  { %3343 = vmatprep.subr.bf16.mxu1 %v9289_v1  ;;  %v7980_v1 = vld [vmem:[#allocation13 + $0x40] ss:$16 sps:$4 sm:$0xff]   ;;  %3298 = vmatprep.subr.bf16.mxu0 %v7982_v62 }
 0x706   :  { %3299 = vmatpush1.bf16.msra.mxu0 %v7980_v1 }
 0x707   :  { %3344 = vmatpush1.bf16.msra.mxu1 %v9293_v3  ;;  %3300 = vmatprep.subr.bf16.mxu0 %v9287_v63  ;;  %v7988_v3 = vld [vmem:[#allocation12 + $0xc] ss:$16 sps:$4 sm:$0xff]  }
 0x708   :  { %3345 = vmatprep.subr.bf16.mxu1 %v9305_v36 }
 0x70a   :  { %3301 = vmatpush1.bf16.msra.mxu0 %v9291_v2 }
 0x70b   :  { %3346 = vmatpush1.bf16.msra.mxu1 %v9303_v24  ;;  %3302 = vmatprep.subr.bf16.mxu0 %v9301_v5  ;;  %v7985_v24 = vld [vmem:[#allocation12 + $0x4] ss:$16 sps:$4 sm:$0xff]  }
 0x70c   :  { %3347 = vmatprep.subr.bf16.mxu1 %v9310_v40 }
 0x70e   :  { %3303 = vmatpush1.bf16.msra.mxu0 %v9299_v4 }
 0x70f   :  { %3348 = vmatpush1.bf16.msra.mxu1 %v9318_v44  ;;  %3304 = vmatprep.subr.bf16.mxu0 %v9307_v37 }
 0x710   :  { %3349 = vmatprep.subr.bf16.mxu1 %v9323_v32 }
 0x712   :  { %3305 = vmatpush1.bf16.msra.mxu0 %v9314_v41 }
 0x713   :  { %3350 = vmatpush1.bf16.msra.mxu1 %v9330_v33  ;;  %3306 = vmatprep.subr.bf16.mxu0 %v9320_v31 }
 0x714   :  { %3351 = vmatprep.subr.bf16.mxu1 %v9335_v61 }
 0x716   :  { %3307 = vmatpush1.bf16.msra.mxu0 %v9326_v43 }
 0x717   :  { %3352 = vmatpush1.bf16.msra.mxu1 %v9342_v8  ;;  %3308 = vmatprep.subr.bf16.mxu0 %v9332_v52 }
 0x718   :  { %3777 = vmatprep.subr.bf16.mxu1 %v7988_v3 }
 0x71a   :  { %3309 = vmatpush1.bf16.msra.mxu0 %v9338_v6 }
 0x71b   :  { %3664 = vmatprep.subr.bf16.mxu0 %v7985_v24 }
 0x7cd   :  { %v2984_v63 = vpop.f32.mrb[24].mxu0  ;;  %v3027_v2 = vpop.f32.mrb[24].mxu1 }
 0x7ce   :  { %v7576_v5 = vadd.f32 %v2984_v63, %v9109_v18  ;;  %v2986_v4 = vpop.f32.mrb[25].mxu0  ;;  %v3029_v36 = vpop.f32.mrb[25].mxu1  ;;  %v7608_v8 = vadd.f32 %v3027_v2, %v9122_v35 }
 0x7cf   :  { %v7577_v37 = vadd.f32 %v2986_v4, %v9113_v19  ;;  %v2988_v40 = vpop.f32.mrb[26].mxu0  ;;  %v3031_v41 = vpop.f32.mrb[26].mxu1  ;;  %v7609_v45 = vadd.f32 %v3029_v36, %v9127_v7  ;;  %v7983_v4 = vld [vmem:[#allocation12] ss:$16 sps:$4 sm:$0xff]   ;;  %v7986_v36 = vld [vmem:[#allocation12 + $0x8] ss:$16 sps:$4 sm:$0xff]  }
 0x7d0   :  { %v7099_v44 = vmul.f32 -1.442695, %v7576_v5  ;;  %v7578_v31 = vadd.f32 %v2988_v40, %v9109_v18  ;;  %v2990_v32 = vpop.f32.mrb[27].mxu0  ;;  %v3033_v43 = vpop.f32.mrb[27].mxu1  ;;  %v7610_v16 = vadd.f32 %v3031_v41, %v9122_v35  ;;  %v7101_v51 = vmul.f32 -1.442695, %v7608_v8 }
 0x7d1   :  { %v7100_v33 = vmul.f32 -1.442695, %v7577_v37  ;;  %v7579_v52 = vadd.f32 %v2990_v32, %v9113_v19  ;;  %v7611_v28 = vadd.f32 %v3033_v43, %v9127_v7  ;;  %v7991_v40 = vld [vmem:[#allocation12 + $0x24] ss:$16 sps:$4 sm:$0xff]   ;;  %v7989_v41 = vld [vmem:[#allocation12 + $0x20] ss:$16 sps:$4 sm:$0xff]  }
 0x7d2   :  { %8322 = vpow2.f32 %v7099_v44  ;;  %v7102_v61 = vmul.f32 -1.442695, %v7578_v31  ;;  %v7104_v48 = vmul.f32 -1.442695, %v7610_v16  ;;  %v7992_v44 = vld [vmem:[#allocation12 + $0x28] ss:$16 sps:$4 sm:$0xff]  }
 0x7d3   :  { %v7103_v6 = vmul.f32 -1.442695, %v7579_v52  ;;  %8324 = vpow2.f32 %v7100_v33  ;;  %v7997_v31 = vld [vmem:[#allocation12 + $0x44] ss:$16 sps:$4 sm:$0xff]   ;;  %v8000_v32 = vld [vmem:[#allocation12 + $0x4c] ss:$16 sps:$4 sm:$0xff]  }
 0x7d4   :  { %8326 = vpow2.f32 %v7102_v61  ;;  %v7995_v43 = vld [vmem:[#allocation12 + $0x40] ss:$16 sps:$4 sm:$0xff]   ;;  %v7998_v33 = vld [vmem:[#allocation12 + $0x48] ss:$16 sps:$4 sm:$0xff]   ;;  %v8003_v52 = vld [vmem:[#allocation12 + $0x64] ss:$16 sps:$4 sm:$0xff]  }
 0x7d5   :  { %8328 = vpow2.f32 %v7103_v6  ;;  %v8006_v61 = vld [vmem:[#allocation12 + $0x6c] ss:$16 sps:$4 sm:$0xff]   ;;  %v8001_v6 = vld [vmem:[#allocation12 + $0x60] ss:$16 sps:$4 sm:$0xff]   ;;  %v8004_v8 = vld [vmem:[#allocation12 + $0x68] ss:$16 sps:$4 sm:$0xff]  }
 0x7d6   :  { %8330 = vtanh.f32 %v7609_v45  ;;  %v8009_v16 = vld [vmem:[#allocation12 + $0x84] ss:$16 sps:$4 sm:$0xff]   ;;  %v8012_v45 = vld [vmem:[#allocation12 + $0x8c] ss:$16 sps:$4 sm:$0xff]  }
 0x7d7   :  { %8332 = vpow2.f32 %v7101_v51  ;;  %v8007_v51 = vld [vmem:[#allocation12 + $0x80] ss:$16 sps:$4 sm:$0xff]  }
 0x7d8   :  { %8334 = vpow2.f32 %v7104_v48  ;;  %v8010_v48 = vld [vmem:[#allocation12 + $0x88] ss:$16 sps:$4 sm:$0xff]  }
 0x7dc   :  { %v8323_v20 = vpop.eup %8322 }
 0x7dd   :  { %v3054_v13 = vadd.f32 1.0, %v8323_v20  ;;  %v8325_v53 = vpop.eup %8324  ;;  %v8015_v20 = vld [vmem:[#allocation12 + $0xa4] ss:$16 sps:$4 sm:$0xff]  }
 0x7de   :  { %v8327_v49 = vpop.eup %8326  ;;  %v3055_v55 = vadd.f32 1.0, %v8325_v53  ;;  %v8016_v53 = vld [vmem:[#allocation12 + $0xa8] ss:$16 sps:$4 sm:$0xff]  }
 0x7df   :  { %8336 = vrcp.f32 %v3054_v13  ;;  %v3057_v50 = vadd.f32 1.0, %v8327_v49  ;;  %v8329_v23 = vpop.eup %8328  ;;  %v8013_v13 = vld [vmem:[#allocation12 + $0xa0] ss:$16 sps:$4 sm:$0xff]   ;;  %v8021_v49 = vld [vmem:[#allocation12 + $0xc4] ss:$16 sps:$4 sm:$0xff]  }
 0x7e0   :  { %8338 = vtanh.f32 %v7611_v28  ;;  %v3058_v10 = vadd.f32 1.0, %v8329_v23  ;;  %v8331_v12 = vpop.eup %8330  ;;  %v8018_v28 = vld [vmem:[#allocation12 + $0xac] ss:$16 sps:$4 sm:$0xff]   ;;  %v8022_v23 = vld [vmem:[#allocation12 + $0xc8] ss:$16 sps:$4 sm:$0xff]  }
 0x7e1   :  { %8340 = vrcp.f32 %v3055_v55  ;;  %v8333_v26 = vpop.eup %8332  ;;  %v8024_v55 = vld [vmem:[#allocation12 + $0xcc] ss:$16 sps:$4 sm:$0xff]  }
 0x7e2   :  { %8342 = vrcp.f32 %v3057_v50  ;;  %v8335_v34 = vpop.eup %8334  ;;  %v3056_v21 = vadd.f32 1.0, %v8333_v26  ;;  %v8019_v50 = vld [vmem:[#allocation12 + $0xc0] ss:$16 sps:$4 sm:$0xff]  }
 0x7e3   :  { %8344 = vrcp.f32 %v3058_v10  ;;  %v3059_v60 = vadd.f32 1.0, %v8335_v34  ;;  %v8027_v10 = vld [vmem:[#allocation12 + $0xe4] ss:$16 sps:$4 sm:$0xff]   ;;  %v8025_v26 = vld [vmem:[#allocation12 + $0xe0] ss:$16 sps:$4 sm:$0xff]  }
 0x7e4   :  { %8346 = vrcp.f32 %v3056_v21  ;;  %v8028_v34 = vld [vmem:[#allocation12 + $0xe8] ss:$16 sps:$4 sm:$0xff]  }
 0x7e5   :  { %v9583_v21 = vld [vmem:[#allocation13 + $0x148] ss:$16 sps:$4 sm:$0xff]  }
 0x7e9   :  { %v8337_v30 = vpop.eup %8336 }
 0x7ea   :  { %v8339_v27 = vpop.eup %8338  ;;  %v3076_v38 = vmul.f32 %v8337_v30, %v8331_v12  ;;  %v8030_v12 = vld [vmem:[#allocation12 + $0xec] ss:$16 sps:$4 sm:$0xff]   ;;  %v9525_v30 = vld [vmem:[#allocation13 + $0x104] ss:$16 sps:$4 sm:$0xff]  }
 0x7eb   :  { %v8341_v39 = vpop.eup %8340 }
 0x7ec   :  { %v8343_v46 = vpop.eup %8342  ;;  %v3074_v47 = vmul.f32 %v8341_v39, %v9465_v54  ;;  %v9579_v39 = vld [vmem:[#allocation13 + $0x144] ss:$16 sps:$4 sm:$0xff]  }
 0x7ed   :  { %v3077_v57 = vmul.f32 %v8343_v46, %v8339_v27  ;;  %v8345_v58 = vpop.eup %8344  ;;  %v9527_v27 = vld [vmem:[#allocation13 + $0x100] ss:$16 sps:$4 sm:$0xff]   ;;  %v9581_v46 = vld [vmem:[#allocation13 + $0x164] ss:$16 sps:$4 sm:$0xff]  }
 0x7ee   :  { %v9512_v59 = vadd.f32 %v3076_v38, %v3074_v47  ;;  %v3075_v62 = vmul.f32 %v8345_v58, %v9469_v9  ;;  %v8347_v3 = vpop.eup %8346  ;;  %v7994_v9 = vld [vmem:[#allocation12 + $0x2c] ss:$16 sps:$4 sm:$0xff]   ;;  %v9577_v38 = vld [vmem:[#allocation13 + $0x140] ss:$16 sps:$4 sm:$0xff]  }
 0x7ef   :  { %v9585_v47 = vld [vmem:[#allocation13 + $0x14c] ss:$16 sps:$4 sm:$0xff]  }
 0x7f0   :  { %8348 = vtanh.f32 %v9512_v59  ;;  %v9516_v1 = vadd.f32 %v3077_v57, %v3075_v62  ;;  %v9589_v57 = vld [vmem:[#allocation13 + $0x160] ss:$16 sps:$4 sm:$0xff]   ;;  %v9592_v58 = vld [vmem:[#allocation13 + $0x16c] ss:$16 sps:$4 sm:$0xff]   ;;  %v9598_v62 = vld [vmem:[#allocation13 + $0x168] ss:$16 sps:$4 sm:$0xff]  }
 0x7f1   :  { %8350 = vrcp.f32 %v3059_v60  ;;  %v9595_v60 = vld [vmem:[#allocation13 + $0x184] ss:$16 sps:$4 sm:$0xff]  }
 0x7f2   :  { %8352 = vtanh.f32 %v9516_v1 }
 0x7fa   :  { %v8349_v24 = vpop.eup %8348 }
 0x7fb   :  { %v8351_v63 = vpop.eup %8350  ;;  %v3082_v54 = vmul.f32 %v8349_v24, %v8347_v3  ;;  %v9601_v3 = vld [vmem:[#allocation13 + $0x18c] ss:$16 sps:$4 sm:$0xff]   ;;  %v9604_v24 = vld [vmem:[#allocation13 + $0x180] ss:$16 sps:$4 sm:$0xff]  }
 0x7fc   :  { %v8353_v2 = vpop.eup %8352 }
 0x7fd   :  { %v3083_v5 = vmul.f32 %v8353_v2, %v8351_v63  ;;  %v9607_v63 = vld [vmem:[#allocation13 + $0x1a4] ss:$16 sps:$4 sm:$0xff]   ;;  %v9610_v2 = vld [vmem:[#allocation13 + $0x188] ss:$16 sps:$4 sm:$0xff]  }
 0x7ff   :  { %v9519_v37 = vpack.c.bf16 %v3083_v5, %v3082_v54  ;;  %v9613_v54 = vld [vmem:[#allocation13 + $0x1ac] ss:$16 sps:$4 sm:$0xff]   ;;  %v9616_v5 = vld [vmem:[#allocation13 + $0x1a0] ss:$16 sps:$4 sm:$0xff]  }
 0x801   :  { %3327 = vmatmul.mubr.bf16.vlgmr.msra.gmra.mrb[28].mxu0 %v9519_v37  ;;  %3370 = vmatmul.mubr.bf16.vlgmr.msra.gmra.mrb[28].mxu1 %v9519_v37 }
 0x802   :  { %3665 = vmatpush1.bf16.msra.mxu0 %v7983_v4  ;;  %3778 = vmatpush1.bf16.msra.mxu1 %v7986_v36  ;;  %v9619_v4 = vld [vmem:[#allocation13 + $0x1c4] ss:$16 sps:$4 sm:$0xff]   ;;  %v9622_v36 = vld [vmem:[#allocation13 + $0x1a8] ss:$16 sps:$4 sm:$0xff]  }
 0x803   :  { %3666 = vmatprep.subr.bf16.mxu0 %v7991_v40  ;;  %3779 = vmatprep.subr.bf16.mxu1 %v7994_v9  ;;  %v9630_v40 = vld [vmem:[#allocation13 + $0x1e4] ss:$16 sps:$4 sm:$0xff]   ;;  %v9632_v9 = vld [vmem:[#allocation13 + $0x1c8] ss:$16 sps:$4 sm:$0xff]  }
 0x804   :  { %3696 = vmatprep.mubr.bf16.mxu0 %v8818_v0  ;;  %3809 = vmatprep.mubr.bf16.mxu1 %v8818_v0 }
 0x806   :  { %3667 = vmatpush1.bf16.msra.mxu0 %v7989_v41  ;;  %3780 = vmatpush1.bf16.msra.mxu1 %v7992_v44  ;;  %v9634_v41 = vld [vmem:[#allocation13 + $0x1cc] ss:$16 sps:$4 sm:$0xff]  }
 0x807   :  { %3668 = vmatprep.subr.bf16.mxu0 %v7997_v31  ;;  %3781 = vmatprep.subr.bf16.mxu1 %v8000_v32  ;;  %v9636_v44 = vld [vmem:[#allocation13 + $0x1ec] ss:$16 sps:$4 sm:$0xff]   ;;  %v9640_v31 = vld [vmem:[#allocation13 + $0x1e0] ss:$16 sps:$4 sm:$0xff]   ;;  %v9644_v32 = vld [vmem:[#allocation13 + $0x1e8] ss:$16 sps:$4 sm:$0xff]  }
 0x80a   :  { %3669 = vmatpush1.bf16.msra.mxu0 %v7995_v43  ;;  %3782 = vmatpush1.bf16.msra.mxu1 %v7998_v33 }
 0x80b   :  { %3670 = vmatprep.subr.bf16.mxu0 %v8003_v52  ;;  %3783 = vmatprep.subr.bf16.mxu1 %v8006_v61 }
 0x80e   :  { %3671 = vmatpush1.bf16.msra.mxu0 %v8001_v6  ;;  %3784 = vmatpush1.bf16.msra.mxu1 %v8004_v8 }
 0x80f   :  { %3672 = vmatprep.subr.bf16.mxu0 %v8009_v16  ;;  %3785 = vmatprep.subr.bf16.mxu1 %v8012_v45 }
 0x812   :  { %3673 = vmatpush1.bf16.msra.mxu0 %v8007_v51  ;;  %3786 = vmatpush1.bf16.msra.mxu1 %v8010_v48 }
 0x813   :  { %3674 = vmatprep.subr.bf16.mxu0 %v8015_v20  ;;  %3787 = vmatprep.subr.bf16.mxu1 %v8018_v28 }
 0x816   :  { %3675 = vmatpush1.bf16.msra.mxu0 %v8013_v13  ;;  %3788 = vmatpush1.bf16.msra.mxu1 %v8016_v53 }
 0x817   :  { %3676 = vmatprep.subr.bf16.mxu0 %v8021_v49  ;;  %3789 = vmatprep.subr.bf16.mxu1 %v8024_v55 }
 0x81a   :  { %3677 = vmatpush1.bf16.msra.mxu0 %v8019_v50  ;;  %3790 = vmatpush1.bf16.msra.mxu1 %v8022_v23 }
 0x81b   :  { %3678 = vmatprep.subr.bf16.mxu0 %v8027_v10  ;;  %3791 = vmatprep.subr.bf16.mxu1 %v8030_v12 }
 0x81e   :  { %3679 = vmatpush1.bf16.msra.mxu0 %v8025_v26  ;;  %3792 = vmatpush1.bf16.msra.mxu1 %v8028_v34 }
 0x81f   :  { %4156 = vmatprep.subr.bf16.mxu0 %v9525_v30 }
 0x821   :  { %3697 = vmatmul.mubr.bf16.vlgmr.msra.gmra.mrb[32].mxu0 %v9139_v29  ;;  %3810 = vmatmul.mubr.bf16.vlgmr.msra.gmra.mrb[32].mxu1 %v9139_v29  ;;  %v9559_v29 = vld [vmem:[#allocation13 + $0x10c] ss:$16 sps:$4 sm:$0xff]  }
 0x822   :  { %3706 = vmatprep.mubr.bf16.mxu0 %v8818_v0  ;;  %3819 = vmatprep.mubr.bf16.mxu1 %v8818_v0 }
 0x823   :  { %4157 = vmatpush1.bf16.msra.mxu0 %v9527_v27  ;;  %4199 = vmatprep.subr.bf16.mxu1 %v9559_v29 }
 0x829   :  { %3707 = vmatmul.mubr.bf16.gmra.mrb[36].mxu0 %v9192_v25  ;;  %3820 = vmatmul.mubr.bf16.gmra.mrb[36].mxu1 %v9192_v25  ;;  %v9561_v25 = vld [vmem:[#allocation13 + $0x108] ss:$16 sps:$4 sm:$0xff]  }
 0x82a   :  { %3716 = vmatprep.mubr.bf16.mxu0 %v8818_v0  ;;  %3829 = vmatprep.mubr.bf16.mxu1 %v8818_v0 }
 0x82b   :  { %4200 = vmatpush1.bf16.msra.mxu1 %v9561_v25 }
 0x831   :  { %3717 = vmatmul.mubr.bf16.gmra.mrb[40].mxu0 %v9258_v56  ;;  %3830 = vmatmul.mubr.bf16.gmra.mrb[40].mxu1 %v9258_v56  ;;  %v9565_v56 = vld [vmem:[#allocation13 + $0x124] ss:$16 sps:$4 sm:$0xff]  }
 0x832   :  { %3726 = vmatprep.mubr.bf16.mxu0 %v8818_v0  ;;  %3839 = vmatprep.mubr.bf16.mxu1 %v8818_v0 }
 0x833   :  { %4158 = vmatprep.subr.bf16.mxu0 %v9565_v56 }
 0x839   :  { %3727 = vmatmul.mubr.bf16.gmra.mrb[44].mxu0 %v9365_v11  ;;  %3840 = vmatmul.mubr.bf16.gmra.mrb[44].mxu1 %v9365_v11  ;;  %v9567_v11 = vld [vmem:[#allocation13 + $0x12c] ss:$16 sps:$4 sm:$0xff]  }
 0x83a   :  { %3736 = vmatprep.mubr.bf16.mxu0 %v8818_v0  ;;  %3849 = vmatprep.mubr.bf16.mxu1 %v8818_v0 }
 0x83b   :  { %4201 = vmatprep.subr.bf16.mxu1 %v9567_v11 }
 0x841   :  { %3737 = vmatmul.mubr.bf16.gmra.mrb[48].mxu0 %v9419_v22  ;;  %3850 = vmatmul.mubr.bf16.gmra.mrb[48].mxu1 %v9419_v22  ;;  %v9569_v22 = vld [vmem:[#allocation13 + $0x120] ss:$16 sps:$4 sm:$0xff]  }
 0x842   :  { %3746 = vmatprep.mubr.bf16.mxu0 %v8818_v0  ;;  %3859 = vmatprep.mubr.bf16.mxu1 %v8818_v0 }
 0x843   :  { %4159 = vmatpush1.bf16.msra.mxu0 %v9569_v22 }
 0x844   :  { %4160 = vmatprep.subr.bf16.mxu0 %v9579_v39 }
 0x847   :  { %4161 = vmatpush1.bf16.msra.mxu0 %v9577_v38 }
 0x848   :  { %4162 = vmatprep.subr.bf16.mxu0 %v9581_v46 }
 0x849   :  { %3747 = vmatmul.mubr.bf16.gmra.mrb[52].mxu0 %v9472_v42  ;;  %3860 = vmatmul.mubr.bf16.gmra.mrb[52].mxu1 %v9472_v42  ;;  %v9571_v42 = vld [vmem:[#allocation13 + $0x128] ss:$16 sps:$4 sm:$0xff]  }
 0x84a   :  { %3756 = vmatprep.mubr.bf16.mxu0 %v8818_v0  ;;  %3869 = vmatprep.mubr.bf16.mxu1 %v8818_v0 }
 0x84b   :  { %4202 = vmatpush1.bf16.msra.mxu1 %v9571_v42  ;;  %4163 = vmatpush1.bf16.msra.mxu0 %v9589_v57 }
 0x84c   :  { %4203 = vmatprep.subr.bf16.mxu1 %v9585_v47  ;;  %4164 = vmatprep.subr.bf16.mxu0 %v9595_v60 }
 0x84f   :  { %4204 = vmatpush1.bf16.msra.mxu1 %v9583_v21  ;;  %4165 = vmatpush1.bf16.msra.mxu0 %v9604_v24 }
 0x850   :  { %4205 = vmatprep.subr.bf16.mxu1 %v9592_v58  ;;  %4166 = vmatprep.subr.bf16.mxu0 %v9607_v63 }
 0x851   :  { %3757 = vmatmul.mubr.bf16.gmra.mrb[56].mxu0 %v9519_v37  ;;  %3870 = vmatmul.mubr.bf16.gmra.mrb[56].mxu1 %v9519_v37  ;;  %v9626_v37 = vld [vmem:[#allocation13 + $0x1c0] ss:$16 sps:$4 sm:$0xff]  }
 0x852   :  { %3766 = vmatprep.mubr.bf16.mxu0 %v8818_v0  ;;  %3879 = vmatprep.mubr.bf16.mxu1 %v8818_v0 }
 0x853   :  { %4206 = vmatpush1.bf16.msra.mxu1 %v9598_v62  ;;  %4167 = vmatpush1.bf16.msra.mxu0 %v9616_v5 }
 0x854   :  { %4207 = vmatprep.subr.bf16.mxu1 %v9601_v3  ;;  %4168 = vmatprep.subr.bf16.mxu0 %v9619_v4 }
 0x857   :  { %4208 = vmatpush1.bf16.msra.mxu1 %v9610_v2  ;;  %4169 = vmatpush1.bf16.msra.mxu0 %v9626_v37 }
 0x858   :  { %4209 = vmatprep.subr.bf16.mxu1 %v9613_v54  ;;  %4170 = vmatprep.subr.bf16.mxu0 %v9630_v40 }
 0x85b   :  { %4210 = vmatpush1.bf16.msra.mxu1 %v9622_v36  ;;  %4171 = vmatpush1.bf16.msra.mxu0 %v9640_v31 }
 0x85c   :  { %4211 = vmatprep.subr.bf16.mxu1 %v9634_v41  ;;  %4504 = vmatprep.subr.bf16.mxu0 %v9525_v30 }
 0x85f   :  { %4212 = vmatpush1.bf16.msra.mxu1 %v9632_v9 }
 0x860   :  { %4213 = vmatprep.subr.bf16.mxu1 %v9636_v44 }
 0x863   :  { %4214 = vmatpush1.bf16.msra.mxu1 %v9644_v32 }
 0x864   :  { %4547 = vmatprep.subr.bf16.mxu1 %v9559_v29 }
 0x8d4   :  { %v3328_v43 = vpop.f32.mrb[28].mxu0  ;;  %v3371_v33 = vpop.f32.mrb[28].mxu1 }
 0x8d5   :  { %v7580_v52 = vadd.f32 %v3328_v43, %v9109_v18  ;;  %v3330_v61 = vpop.f32.mrb[29].mxu0  ;;  %v3373_v6 = vpop.f32.mrb[29].mxu1  ;;  %v7612_v50 = vadd.f32 %v3371_v33, %v9122_v35 }
 0x8d6   :  { %v7581_v8 = vadd.f32 %v3330_v61, %v9113_v19  ;;  %v3332_v16 = vpop.f32.mrb[30].mxu0  ;;  %v3375_v45 = vpop.f32.mrb[30].mxu1  ;;  %v7613_v10 = vadd.f32 %v3373_v6, %v9127_v7 }
 0x8d7   :  { %v7137_v51 = vmul.f32 -1.442695, %v7580_v52  ;;  %v7582_v48 = vadd.f32 %v3332_v16, %v9109_v18  ;;  %v3334_v20 = vpop.f32.mrb[31].mxu0  ;;  %v3377_v28 = vpop.f32.mrb[31].mxu1  ;;  %v7614_v23 = vadd.f32 %v3375_v45, %v9122_v35  ;;  %v7139_v12 = vmul.f32 -1.442695, %v7612_v50 }
 0x8d8   :  { %v7138_v13 = vmul.f32 -1.442695, %v7581_v8  ;;  %v7583_v53 = vadd.f32 %v3334_v20, %v9113_v19  ;;  %v7615_v34 = vadd.f32 %v3377_v28, %v9127_v7 }
 0x8d9   :  { %8354 = vpow2.f32 %v7137_v51  ;;  %v7140_v49 = vmul.f32 -1.442695, %v7582_v48  ;;  %v7142_v26 = vmul.f32 -1.442695, %v7614_v23 }
 0x8da   :  { %v7141_v55 = vmul.f32 -1.442695, %v7583_v53  ;;  %8356 = vpow2.f32 %v7138_v13 }
 0x8db   :  { %8358 = vpow2.f32 %v7140_v49 }
 0x8dc   :  { %8360 = vpow2.f32 %v7141_v55 }
 0x8dd   :  { %8362 = vtanh.f32 %v7613_v10 }
 0x8de   :  { %8364 = vpow2.f32 %v7139_v12 }
 0x8df   :  { %8366 = vpow2.f32 %v7142_v26 }
 0x8e3   :  { %v8355_v18 = vpop.eup %8354 }
 0x8e4   :  { %v3398_v43 = vadd.f32 1.0, %v8355_v18  ;;  %v8357_v19 = vpop.eup %8356 }
 0x8e5   :  { %v8359_v52 = vpop.eup %8358  ;;  %v3399_v61 = vadd.f32 1.0, %v8357_v19 }
 0x8e6   :  { %8368 = vrcp.f32 %v3398_v43  ;;  %v3401_v33 = vadd.f32 1.0, %v8359_v52  ;;  %v8361_v8 = vpop.eup %8360 }
 0x8e7   :  { %8370 = vtanh.f32 %v7615_v34  ;;  %v3402_v35 = vadd.f32 1.0, %v8361_v8  ;;  %v8363_v6 = vpop.eup %8362  ;;  %v7143_v8 = vld [vmem:[%s10121_s6 + $0x4] sm:$0xf]  ;;  %s8819_s6 = smov [#allocation15]  }
 0x8e8   :  { %8372 = vrcp.f32 %v3399_v61  ;;  %v8365_v16 = vpop.eup %8364  ;;  %s6745_s10 = sshll.u32 %s8819_s6, 4  ;;  %s6746_s10 = int_to_ptr.vmem [resolvable:$true] %s6745_s10 }
 0x8e9   :  { %8374 = vrcp.f32 %v3401_v33  ;;  %v8367_v45 = vpop.eup %8366  ;;  %v3400_v28 = vadd.f32 1.0, %v8365_v16  ;;  %v3437_v33 = vld [vmem:[#allocation7 + $0x18] sm:$0xff]  ;;  %s8774_s13 = scalar_lea.vmem %s6746_s10, 1024  ;;  %p8779_p7 = scmp.lt.s32.totalorder %s6746_s10, %s6746_s10 }
 0x8ea   :  { %8376 = vrcp.f32 %v3402_v35  ;;  %v3403_v23 = vadd.f32 1.0, %v8367_v45  ;;  %v9702_v35 = vrot.slane %v7143_v8, %v166_v15  ;;  %p8775_p6 = scmp.ne.s32.totalorder %s6746_s10, %s8774_s13  ;;  %p8780_p8 = scmp.lt.s32.totalorder %s8774_s13, %s8774_s13 }
 0x8eb   :  { %8378 = vrcp.f32 %v3400_v28 }
 0x8ec   :  { %p8781_p9 = por %p8780_p8, %p8779_p7 }
 0x8ee   :  { %p8782_p10 = pnand %p8781_p9, %p8775_p6 }
 0x8f0   :  { %v8369_v51 = vpop.eup %8368 }
 0x8f1   :  { %v8371_v48 = vpop.eup %8370  ;;  %v3420_v7 = vmul.f32 %v8369_v51, %v8363_v6  ;;  %v9706_v6 = vrot.slane %v7143_v8, %v170_v17 }
 0x8f2   :  { %v8373_v20 = vpop.eup %8372 }
 0x8f3   :  { %v8375_v13 = vpop.eup %8374  ;;  %v3418_v53 = vmul.f32 %v8373_v20, %v9512_v59  ;;  %v3436_v59 = vld [vmem:[#allocation7 + $0x10] sm:$0xff] }
 0x8f4   :  { %v3421_v49 = vmul.f32 %v8375_v13, %v8371_v48  ;;  %v8377_v55 = vpop.eup %8376 }
 0x8f5   :  { %v3422_v50 = vadd.f32 %v3420_v7, %v3418_v53  ;;  %v3419_v10 = vmul.f32 %v8377_v55, %v9516_v1  ;;  %v8379_v26 = vpop.eup %8378  ;;  %v3954_v1 = vpack.c.bf16 %v3437_v33, %v3436_v59  ;;  %v10125_v55 = vsub.s32 2, %v9100_v14 }
 0x8f7   :  { %8380 = vtanh.f32 %v3422_v50  ;;  %v3423_v12 = vadd.f32 %v3421_v49, %v3419_v10  ;;  %v9713_v50 = vrot.slane %v7143_v8, %v10125_v55 }
 0x8f8   :  { %8382 = vrcp.f32 %v3403_v23 }
 0x8f9   :  { %8384 = vtanh.f32 %v3423_v12 }
 0x901   :  { %v8381_v18 = vpop.eup %8380 }
 0x902   :  { %v3426_v34 = vmul.f32 %v8381_v18, %v8379_v26  ;;  %v8383_v43 = vpop.eup %8382  ;;  %v10126_v26 = vsub.s32 3, %v9100_v14 }
 0x903   :  { %v8385_v19 = vpop.eup %8384 }
 0x904   :  { %v3427_v52 = vmul.f32 %v8385_v19, %v8383_v43  ;;  %v9718_v18 = vrot.slane %v7143_v8, %v10126_v26 }
 0x906   :  { %v3428_v61 = vpack.c.bf16 %v3427_v52, %v3426_v34 }
 0x908   :  { %3767 = vmatmul.mubr.bf16.gmra.mrb[60].mxu0 %v3428_v61  ;;  %3880 = vmatmul.mubr.bf16.gmra.mrb[60].mxu1 %v3428_v61 }
 0x909   :  { %4188 = vmatprep.mubr.bf16.mxu0 %v8818_v0  ;;  %4231 = vmatprep.mubr.bf16.mxu1 %v8818_v0 }
 0x910   :  { %4189 = vmatmul.mubr.bf16.vlgmr.msra.gmra.mrb[32].mxu0 %v3954_v1  ;;  %4232 = vmatmul.mubr.bf16.vlgmr.msra.gmra.mrb[32].mxu1 %v3954_v1 }
 0x911   :  { %4505 = vmatpush1.bf16.msra.mxu0 %v9527_v27  ;;  %4548 = vmatpush1.bf16.msra.mxu1 %v9561_v25 }
 0x912   :  { %4506 = vmatprep.subr.bf16.mxu0 %v9565_v56  ;;  %4549 = vmatprep.subr.bf16.mxu1 %v9567_v11 }
 0x913   :  { %4536 = vmatprep.mubr.bf16.mxu0 %v8818_v0  ;;  %4579 = vmatprep.mubr.bf16.mxu1 %v8818_v0 }
 0x915   :  { %4507 = vmatpush1.bf16.msra.mxu0 %v9569_v22  ;;  %4550 = vmatpush1.bf16.msra.mxu1 %v9571_v42 }
 0x916   :  { %4508 = vmatprep.subr.bf16.mxu0 %v9579_v39  ;;  %4551 = vmatprep.subr.bf16.mxu1 %v9585_v47 }
 0x919   :  { %4509 = vmatpush1.bf16.msra.mxu0 %v9577_v38  ;;  %4552 = vmatpush1.bf16.msra.mxu1 %v9583_v21 }
 0x91a   :  { %4510 = vmatprep.subr.bf16.mxu0 %v9581_v46  ;;  %4553 = vmatprep.subr.bf16.mxu1 %v9592_v58 }
 0x91d   :  { %4511 = vmatpush1.bf16.msra.mxu0 %v9589_v57  ;;  %4554 = vmatpush1.bf16.msra.mxu1 %v9598_v62 }
 0x91e   :  { %4512 = vmatprep.subr.bf16.mxu0 %v9595_v60  ;;  %4555 = vmatprep.subr.bf16.mxu1 %v9601_v3 }
 0x921   :  { %4513 = vmatpush1.bf16.msra.mxu0 %v9604_v24  ;;  %4556 = vmatpush1.bf16.msra.mxu1 %v9610_v2 }
 0x922   :  { %4514 = vmatprep.subr.bf16.mxu0 %v9607_v63  ;;  %4557 = vmatprep.subr.bf16.mxu1 %v9613_v54 }
 0x925   :  { %4515 = vmatpush1.bf16.msra.mxu0 %v9616_v5  ;;  %4558 = vmatpush1.bf16.msra.mxu1 %v9622_v36 }
 0x926   :  { %4516 = vmatprep.subr.bf16.mxu0 %v9619_v4  ;;  %4559 = vmatprep.subr.bf16.mxu1 %v9634_v41 }
 0x929   :  { %4517 = vmatpush1.bf16.msra.mxu0 %v9626_v37  ;;  %4560 = vmatpush1.bf16.msra.mxu1 %v9632_v9 }
 0x92a   :  { %4518 = vmatprep.subr.bf16.mxu0 %v9630_v40  ;;  %4561 = vmatprep.subr.bf16.mxu1 %v9636_v44 }
 0x92d   :  { %4519 = vmatpush1.bf16.msra.mxu0 %v9640_v31  ;;  %4562 = vmatpush1.bf16.msra.mxu1 %v9644_v32 }
 0x92e   :  { %4852 = vmatprep.subr.bf16.mxu0 %v9525_v30  ;;  %4895 = vmatprep.subr.bf16.mxu1 %v9559_v29 }
 0x9e3   :  { %v4190_v16 = vpop.f32.mrb[32].mxu0  ;;  %v4233_v45 = vpop.f32.mrb[32].mxu1 }
 0x9e4   :  { %v7616_v51 = vadd.f32 %v4190_v16, %v9702_v35  ;;  %v4192_v48 = vpop.f32.mrb[33].mxu0  ;;  %v4235_v30 = vpop.f32.mrb[33].mxu1  ;;  %v7648_v34 = vadd.f32 %v4233_v45, %v9713_v50 }
 0x9e5   :  { %v7617_v7 = vadd.f32 %v4192_v48, %v9706_v6  ;;  %v4194_v20 = vpop.f32.mrb[34].mxu0  ;;  %v4237_v28 = vpop.f32.mrb[34].mxu1  ;;  %v7649_v19 = vadd.f32 %v4235_v30, %v9718_v18 }
 0x9e6   :  { %v7208_v13 = vmul.f32 -1.442695, %v7616_v51  ;;  %v7618_v53 = vadd.f32 %v4194_v20, %v9702_v35  ;;  %v4196_v49 = vpop.f32.mrb[35].mxu0  ;;  %v4239_v15 = vpop.f32.mrb[35].mxu1  ;;  %v7650_v43 = vadd.f32 %v4237_v28, %v9713_v50  ;;  %v7210_v52 = vmul.f32 -1.442695, %v7648_v34 }
 0x9e7   :  { %v7209_v17 = vmul.f32 -1.442695, %v7617_v7  ;;  %v7619_v23 = vadd.f32 %v4196_v49, %v9706_v6  ;;  %v7651_v33 = vadd.f32 %v4239_v15, %v9718_v18 }
 0x9e8   :  { %8386 = vpow2.f32 %v7208_v13  ;;  %v7211_v10 = vmul.f32 -1.442695, %v7618_v53  ;;  %v7213_v61 = vmul.f32 -1.442695, %v7650_v43  ;;  %v3439_v13 = vld [vmem:[#allocation9 + $0x10] sm:$0xff] }
 0x9e9   :  { %v7212_v12 = vmul.f32 -1.442695, %v7619_v23  ;;  %8388 = vpow2.f32 %v7209_v17 }
 0x9ea   :  { %8390 = vpow2.f32 %v7211_v10  ;;  %v3440_v10 = vld [vmem:[#allocation9 + $0x18] sm:$0xff] }
 0x9eb   :  { %8392 = vpow2.f32 %v7212_v12 }
 0x9ec   :  { %8394 = vtanh.f32 %v7649_v19 }
 0x9ed   :  { %8396 = vpow2.f32 %v7210_v52 }
 0x9ee   :  { %8398 = vpow2.f32 %v7213_v61 }
 0x9f2   :  { %v8387_v59 = vpop.eup %8386 }
 0x9f3   :  { %v4260_v1 = vadd.f32 1.0, %v8387_v59  ;;  %v8389_v16 = vpop.eup %8388 }
 0x9f4   :  { %v8391_v14 = vpop.eup %8390  ;;  %v4261_v8 = vadd.f32 1.0, %v8389_v16 }
 0x9f5   :  { %8400 = vrcp.f32 %v4260_v1  ;;  %v4263_v45 = vadd.f32 1.0, %v8391_v14  ;;  %v8393_v51 = vpop.eup %8392 }
 0x9f6   :  { %8402 = vtanh.f32 %v7651_v33  ;;  %v4264_v48 = vadd.f32 1.0, %v8393_v51  ;;  %v8395_v30 = vpop.eup %8394 }
 0x9f7   :  { %8404 = vrcp.f32 %v4261_v8  ;;  %v8397_v7 = vpop.eup %8396 }
 0x9f8   :  { %8406 = vrcp.f32 %v4263_v45  ;;  %v8399_v20 = vpop.eup %8398  ;;  %v4262_v17 = vadd.f32 1.0, %v8397_v7 }
 0x9f9   :  { %8408 = vrcp.f32 %v4264_v48  ;;  %v4265_v43 = vadd.f32 1.0, %v8399_v20 }
 0x9fa   :  { %8410 = vrcp.f32 %v4262_v17 }
 0x9ff   :  { %v8401_v28 = vpop.eup %8400 }
 0xa00   :  { %v8403_v53 = vpop.eup %8402  ;;  %v4282_v49 = vmul.f32 %v8401_v28, %v8395_v30 }
 0xa01   :  { %v8405_v15 = vpop.eup %8404 }
 0xa02   :  { %v8407_v55 = vpop.eup %8406  ;;  %v4280_v23 = vmul.f32 %v8405_v15, %v3439_v13 }
 0xa03   :  { %v4283_v12 = vmul.f32 %v8407_v55, %v8403_v53  ;;  %v8409_v26 = vpop.eup %8408 }
 0xa04   :  { %v9724_v34 = vadd.f32 %v4282_v49, %v4280_v23  ;;  %v4281_v19 = vmul.f32 %v8409_v26, %v3440_v10  ;;  %v8411_v61 = vpop.eup %8410 }
 0xa06   :  { %8412 = vtanh.f32 %v9724_v34  ;;  %v9727_v52 = vadd.f32 %v4283_v12, %v4281_v19 }
 0xa07   :  { %8414 = vrcp.f32 %v4265_v43 }
 0xa08   :  { %8416 = vtanh.f32 %v9727_v52 }
 0xa10   :  { %v8413_v59 = vpop.eup %8412 }
 0xa11   :  { %v8415_v33 = vpop.eup %8414  ;;  %v4288_v16 = vmul.f32 %v8413_v59, %v8411_v61 }
 0xa12   :  { %v8417_v1 = vpop.eup %8416 }
 0xa13   :  { %v4289_v14 = vmul.f32 %v8417_v1, %v8415_v33 }
 0xa15   :  { %v4290_v8 = vpack.c.bf16 %v4289_v14, %v4288_v16 }
 0xa17   :  { %7516 = vst [vmem:[#allocation15] sm:$0xff] %v4290_v8   ;;  %4537 = vmatmul.mubr.bf16.vlgmr.msra.gmra.mrb[36].mxu0 %v4290_v8  ;;  %4580 = vmatmul.mubr.bf16.vlgmr.msra.gmra.mrb[36].mxu1 %v4290_v8 }
 0xa18   :  { %4853 = vmatpush1.bf16.msra.mxu0 %v9527_v27  ;;  %4896 = vmatpush1.bf16.msra.mxu1 %v9561_v25 }
 0xa19   :  { %4854 = vmatprep.subr.bf16.mxu0 %v9565_v56  ;;  %4897 = vmatprep.subr.bf16.mxu1 %v9567_v11 }
 0xa1a   :  { %4884 = vmatprep.mubr.bf16.mxu0 %v8818_v0  ;;  %4927 = vmatprep.mubr.bf16.mxu1 %v8818_v0 }
 0xa1c   :  { %4855 = vmatpush1.bf16.msra.mxu0 %v9569_v22  ;;  %4898 = vmatpush1.bf16.msra.mxu1 %v9571_v42 }
 0xa1d   :  { %4856 = vmatprep.subr.bf16.mxu0 %v9579_v39  ;;  %4899 = vmatprep.subr.bf16.mxu1 %v9585_v47 }
 0xa20   :  { %4857 = vmatpush1.bf16.msra.mxu0 %v9577_v38  ;;  %4900 = vmatpush1.bf16.msra.mxu1 %v9583_v21 }
 0xa21   :  { %4858 = vmatprep.subr.bf16.mxu0 %v9581_v46  ;;  %4901 = vmatprep.subr.bf16.mxu1 %v9592_v58 }
 0xa24   :  { %4859 = vmatpush1.bf16.msra.mxu0 %v9589_v57  ;;  %4902 = vmatpush1.bf16.msra.mxu1 %v9598_v62 }
 0xa25   :  { %4860 = vmatprep.subr.bf16.mxu0 %v9595_v60  ;;  %4903 = vmatprep.subr.bf16.mxu1 %v9601_v3 }
 0xa28   :  { %4861 = vmatpush1.bf16.msra.mxu0 %v9604_v24  ;;  %4904 = vmatpush1.bf16.msra.mxu1 %v9610_v2 }
 0xa29   :  { %4862 = vmatprep.subr.bf16.mxu0 %v9607_v63  ;;  %4905 = vmatprep.subr.bf16.mxu1 %v9613_v54 }
 0xa2c   :  { %4863 = vmatpush1.bf16.msra.mxu0 %v9616_v5  ;;  %4906 = vmatpush1.bf16.msra.mxu1 %v9622_v36 }
 0xa2d   :  { %4864 = vmatprep.subr.bf16.mxu0 %v9619_v4  ;;  %4907 = vmatprep.subr.bf16.mxu1 %v9634_v41 }
 0xa30   :  { %4865 = vmatpush1.bf16.msra.mxu0 %v9626_v37  ;;  %4908 = vmatpush1.bf16.msra.mxu1 %v9632_v9 }
 0xa31   :  { %4866 = vmatprep.subr.bf16.mxu0 %v9630_v40  ;;  %4909 = vmatprep.subr.bf16.mxu1 %v9636_v44 }
 0xa34   :  { %4867 = vmatpush1.bf16.msra.mxu0 %v9640_v31  ;;  %4910 = vmatpush1.bf16.msra.mxu1 %v9644_v32 }
 0xa35   :  { %5243 = vmatprep.subr.bf16.mxu1 %v9559_v29 }
 0xaea   :  { %v4538_v27 = vpop.f32.mrb[36].mxu0  ;;  %v4581_v45 = vpop.f32.mrb[36].mxu1 }
 0xaeb   :  { %v7620_v51 = vadd.f32 %v4538_v27, %v9702_v35  ;;  %v4540_v48 = vpop.f32.mrb[37].mxu0  ;;  %v4583_v30 = vpop.f32.mrb[37].mxu1  ;;  %v7652_v10 = vadd.f32 %v4581_v45, %v9713_v50 }
 0xaec   :  { %v7621_v7 = vadd.f32 %v4540_v48, %v9706_v6  ;;  %v4542_v20 = vpop.f32.mrb[38].mxu0  ;;  %v4585_v28 = vpop.f32.mrb[38].mxu1  ;;  %v7653_v26 = vadd.f32 %v4583_v30, %v9718_v18 }
 0xaed   :  { %v7248_v13 = vmul.f32 -1.442695, %v7620_v51  ;;  %v7622_v53 = vadd.f32 %v4542_v20, %v9702_v35  ;;  %v4544_v49 = vpop.f32.mrb[39].mxu0  ;;  %v4587_v15 = vpop.f32.mrb[39].mxu1  ;;  %v7654_v12 = vadd.f32 %v4585_v28, %v9713_v50  ;;  %v7250_v43 = vmul.f32 -1.442695, %v7652_v10 }
 0xaee   :  { %v7249_v55 = vmul.f32 -1.442695, %v7621_v7  ;;  %v7623_v17 = vadd.f32 %v4544_v49, %v9706_v6  ;;  %v7655_v59 = vadd.f32 %v4587_v15, %v9718_v18 }
 0xaef   :  { %8418 = vpow2.f32 %v7248_v13  ;;  %v7251_v29 = vmul.f32 -1.442695, %v7622_v53  ;;  %v7253_v19 = vmul.f32 -1.442695, %v7654_v12 }
 0xaf0   :  { %v7252_v23 = vmul.f32 -1.442695, %v7623_v17  ;;  %8420 = vpow2.f32 %v7249_v55 }
 0xaf1   :  { %8422 = vpow2.f32 %v7251_v29 }
 0xaf2   :  { %8424 = vpow2.f32 %v7252_v23 }
 0xaf3   :  { %8426 = vtanh.f32 %v7653_v26 }
 0xaf4   :  { %8428 = vpow2.f32 %v7250_v43 }
 0xaf5   :  { %8430 = vpow2.f32 %v7253_v19 }
 0xaf9   :  { %v8419_v61 = vpop.eup %8418 }
 0xafa   :  { %v4608_v33 = vadd.f32 1.0, %v8419_v61  ;;  %v8421_v1 = vpop.eup %8420 }
 0xafb   :  { %v8423_v16 = vpop.eup %8422  ;;  %v4609_v14 = vadd.f32 1.0, %v8421_v1 }
 0xafc   :  { %8432 = vrcp.f32 %v4608_v33  ;;  %v4611_v8 = vadd.f32 1.0, %v8423_v16  ;;  %v8425_v27 = vpop.eup %8424 }
 0xafd   :  { %8434 = vtanh.f32 %v7655_v59  ;;  %v4612_v45 = vadd.f32 1.0, %v8425_v27  ;;  %v8427_v51 = vpop.eup %8426 }
 0xafe   :  { %8436 = vrcp.f32 %v4609_v14  ;;  %v8429_v48 = vpop.eup %8428 }
 0xaff   :  { %8438 = vrcp.f32 %v4611_v8  ;;  %v8431_v30 = vpop.eup %8430  ;;  %v4610_v49 = vadd.f32 1.0, %v8429_v48 }
 0xb00   :  { %8440 = vrcp.f32 %v4612_v45  ;;  %v4613_v23 = vadd.f32 1.0, %v8431_v30 }
 0xb01   :  { %8442 = vrcp.f32 %v4610_v49 }
 0xb06   :  { %v8433_v7 = vpop.eup %8432 }
 0xb07   :  { %v8435_v20 = vpop.eup %8434  ;;  %v4630_v28 = vmul.f32 %v8433_v7, %v8427_v51 }
 0xb08   :  { %v8437_v13 = vpop.eup %8436 }
 0xb09   :  { %v8439_v53 = vpop.eup %8438  ;;  %v4628_v15 = vmul.f32 %v8437_v13, %v9724_v34 }
 0xb0a   :  { %v4631_v55 = vmul.f32 %v8439_v53, %v8435_v20  ;;  %v8441_v17 = vpop.eup %8440 }
 0xb0b   :  { %v9772_v29 = vadd.f32 %v4630_v28, %v4628_v15  ;;  %v4629_v10 = vmul.f32 %v8441_v17, %v9727_v52  ;;  %v8443_v26 = vpop.eup %8442 }
 0xb0d   :  { %8444 = vtanh.f32 %v9772_v29  ;;  %v9776_v12 = vadd.f32 %v4631_v55, %v4629_v10 }
 0xb0e   :  { %8446 = vrcp.f32 %v4613_v23 }
 0xb0f   :  { %8448 = vtanh.f32 %v9776_v12 }
 0xb17   :  { %v8445_v43 = vpop.eup %8444 }
 0xb18   :  { %v8447_v19 = vpop.eup %8446  ;;  %v4636_v34 = vmul.f32 %v8445_v43, %v8443_v26 }
 0xb19   :  { %v8449_v61 = vpop.eup %8448 }
 0xb1a   :  { %v4637_v59 = vmul.f32 %v8449_v61, %v8447_v19 }
 0xb1c   :  { %v4638_v33 = vpack.c.bf16 %v4637_v59, %v4636_v34  ;;  %v9838_v34 = vld [vmem:[#allocation13 + $0x108] ss:$16 sps:$4 sm:$0xff]   ;;  %v9842_v59 = vld [vmem:[#allocation13 + $0x124] ss:$16 sps:$4 sm:$0xff]  }
 0xb1e   :  { %7521 = vst [vmem:[#allocation15 + $0x8] sm:$0xff] %v4638_v33   ;;  %4885 = vmatmul.mubr.bf16.vlgmr.msra.gmra.mrb[40].mxu0 %v4638_v33  ;;  %4928 = vmatmul.mubr.bf16.vlgmr.msra.gmra.mrb[40].mxu1 %v4638_v33  ;;  %v9844_v33 = vld [vmem:[#allocation13 + $0x12c] ss:$16 sps:$4 sm:$0xff]  }
 0xb1f   :  { %5244 = vmatpush1.bf16.msra.mxu1 %v9561_v25  ;;  %5232 = vmatprep.mubr.bf16.mxu0 %v8818_v0  ;;  %v9796_v25 = vld [vmem:[#allocation13 + $0x104] ss:$16 sps:$4 sm:$0xff]  }
 0xb20   :  { %5245 = vmatprep.subr.bf16.mxu1 %v9567_v11  ;;  %5275 = vmatprep.mubr.bf16.mxu1 %v8818_v0  ;;  %v9798_v11 = vld [vmem:[#allocation13 + $0x100] ss:$16 sps:$4 sm:$0xff]  }
 0xb21   :  { %5200 = vmatprep.subr.bf16.mxu0 %v9796_v25 }
 0xb22   :  { %5201 = vmatpush1.bf16.msra.mxu0 %v9798_v11 }
 0xb23   :  { %5246 = vmatpush1.bf16.msra.mxu1 %v9571_v42  ;;  %5202 = vmatprep.subr.bf16.mxu0 %v9565_v56 }
 0xb24   :  { %5247 = vmatprep.subr.bf16.mxu1 %v9585_v47 }
 0xb26   :  { %5203 = vmatpush1.bf16.msra.mxu0 %v9569_v22 }
 0xb27   :  { %5248 = vmatpush1.bf16.msra.mxu1 %v9583_v21  ;;  %5204 = vmatprep.subr.bf16.mxu0 %v9579_v39 }
 0xb28   :  { %5249 = vmatprep.subr.bf16.mxu1 %v9592_v58 }
 0xb2a   :  { %5205 = vmatpush1.bf16.msra.mxu0 %v9577_v38 }
 0xb2b   :  { %5250 = vmatpush1.bf16.msra.mxu1 %v9598_v62  ;;  %5206 = vmatprep.subr.bf16.mxu0 %v9581_v46 }
 0xb2c   :  { %5251 = vmatprep.subr.bf16.mxu1 %v9601_v3 }
 0xb2e   :  { %5207 = vmatpush1.bf16.msra.mxu0 %v9589_v57 }
 0xb2f   :  { %5252 = vmatpush1.bf16.msra.mxu1 %v9610_v2  ;;  %5208 = vmatprep.subr.bf16.mxu0 %v9595_v60 }
 0xb30   :  { %5253 = vmatprep.subr.bf16.mxu1 %v9613_v54 }
 0xb32   :  { %5209 = vmatpush1.bf16.msra.mxu0 %v9604_v24 }
 0xb33   :  { %5254 = vmatpush1.bf16.msra.mxu1 %v9622_v36  ;;  %5210 = vmatprep.subr.bf16.mxu0 %v9607_v63 }
 0xb34   :  { %5255 = vmatprep.subr.bf16.mxu1 %v9634_v41 }
 0xb36   :  { %5211 = vmatpush1.bf16.msra.mxu0 %v9616_v5 }
 0xb37   :  { %5256 = vmatpush1.bf16.msra.mxu1 %v9632_v9  ;;  %5212 = vmatprep.subr.bf16.mxu0 %v9619_v4 }
 0xb38   :  { %5257 = vmatprep.subr.bf16.mxu1 %v9636_v44 }
 0xb3a   :  { %5213 = vmatpush1.bf16.msra.mxu0 %v9626_v37 }
 0xb3b   :  { %5258 = vmatpush1.bf16.msra.mxu1 %v9644_v32  ;;  %5214 = vmatprep.subr.bf16.mxu0 %v9630_v40 }
 0xb3e   :  { %5215 = vmatpush1.bf16.msra.mxu0 %v9640_v31 }
 0xb3f   :  { %5548 = vmatprep.subr.bf16.mxu0 %v9796_v25 }
 0xbf1   :  { %v4886_v56 = vpop.f32.mrb[40].mxu0  ;;  %v4929_v22 = vpop.f32.mrb[40].mxu1 }
 0xbf2   :  { %v7624_v42 = vadd.f32 %v4886_v56, %v9702_v35  ;;  %v4888_v38 = vpop.f32.mrb[41].mxu0  ;;  %v4931_v39 = vpop.f32.mrb[41].mxu1  ;;  %v7656_v54 = vadd.f32 %v4929_v22, %v9713_v50  ;;  %v9846_v56 = vld [vmem:[#allocation13 + $0x120] ss:$16 sps:$4 sm:$0xff]   ;;  %v9848_v22 = vld [vmem:[#allocation13 + $0x128] ss:$16 sps:$4 sm:$0xff]  }
 0xbf3   :  { %v7625_v46 = vadd.f32 %v4888_v38, %v9706_v6  ;;  %v4890_v21 = vpop.f32.mrb[42].mxu0  ;;  %v4933_v47 = vpop.f32.mrb[42].mxu1  ;;  %v7657_v4 = vadd.f32 %v4931_v39, %v9718_v18  ;;  %v9856_v38 = vld [vmem:[#allocation13 + $0x14c] ss:$16 sps:$4 sm:$0xff]   ;;  %v9858_v39 = vld [vmem:[#allocation13 + $0x140] ss:$16 sps:$4 sm:$0xff]  }
 0xbf4   :  { %v7288_v57 = vmul.f32 -1.442695, %v7624_v42  ;;  %v7626_v58 = vadd.f32 %v4890_v21, %v9702_v35  ;;  %v4892_v60 = vpop.f32.mrb[43].mxu0  ;;  %v4935_v62 = vpop.f32.mrb[43].mxu1  ;;  %v7658_v5 = vadd.f32 %v4933_v47, %v9713_v50  ;;  %v7290_v36 = vmul.f32 -1.442695, %v7656_v54 }
 0xbf5   :  { %v7289_v3 = vmul.f32 -1.442695, %v7625_v46  ;;  %v7627_v24 = vadd.f32 %v4892_v60, %v9706_v6  ;;  %v7659_v9 = vadd.f32 %v4935_v62, %v9718_v18  ;;  %v9854_v42 = vld [vmem:[#allocation13 + $0x144] ss:$16 sps:$4 sm:$0xff]   ;;  %v9860_v46 = vld [vmem:[#allocation13 + $0x148] ss:$16 sps:$4 sm:$0xff]  }
 0xbf6   :  { %8450 = vpow2.f32 %v7288_v57  ;;  %v7291_v63 = vmul.f32 -1.442695, %v7626_v58  ;;  %v7293_v37 = vmul.f32 -1.442695, %v7658_v5  ;;  %v9866_v21 = vld [vmem:[#allocation13 + $0x164] ss:$16 sps:$4 sm:$0xff]  }
 0xbf7   :  { %v7292_v2 = vmul.f32 -1.442695, %v7627_v24  ;;  %8452 = vpow2.f32 %v7289_v3  ;;  %v9868_v47 = vld [vmem:[#allocation13 + $0x16c] ss:$16 sps:$4 sm:$0xff]   ;;  %v9870_v57 = vld [vmem:[#allocation13 + $0x160] ss:$16 sps:$4 sm:$0xff]  }
 0xbf8   :  { %8454 = vpow2.f32 %v7291_v63  ;;  %v9872_v58 = vld [vmem:[#allocation13 + $0x168] ss:$16 sps:$4 sm:$0xff]   ;;  %v9878_v60 = vld [vmem:[#allocation13 + $0x180] ss:$16 sps:$4 sm:$0xff]   ;;  %v9880_v62 = vld [vmem:[#allocation13 + $0x184] ss:$16 sps:$4 sm:$0xff]  }
 0xbf9   :  { %8456 = vpow2.f32 %v7292_v2  ;;  %v9882_v3 = vld [vmem:[#allocation13 + $0x188] ss:$16 sps:$4 sm:$0xff]   ;;  %v9884_v24 = vld [vmem:[#allocation13 + $0x18c] ss:$16 sps:$4 sm:$0xff]   ;;  %v9886_v63 = vld [vmem:[#allocation13 + $0x1a4] ss:$16 sps:$4 sm:$0xff]  }
 0xbfa   :  { %8458 = vtanh.f32 %v7657_v4  ;;  %v9889_v2 = vld [vmem:[#allocation13 + $0x1ac] ss:$16 sps:$4 sm:$0xff]   ;;  %v9893_v54 = vld [vmem:[#allocation13 + $0x1a0] ss:$16 sps:$4 sm:$0xff]   ;;  %v9897_v5 = vld [vmem:[#allocation13 + $0x1a8] ss:$16 sps:$4 sm:$0xff]  }
 0xbfb   :  { %8460 = vpow2.f32 %v7290_v36  ;;  %v9899_v4 = vld [vmem:[#allocation13 + $0x1c4] ss:$16 sps:$4 sm:$0xff]   ;;  %v9902_v36 = vld [vmem:[#allocation13 + $0x1cc] ss:$16 sps:$4 sm:$0xff]  }
 0xbfc   :  { %8462 = vpow2.f32 %v7293_v37  ;;  %v9905_v37 = vld [vmem:[#allocation13 + $0x1c0] ss:$16 sps:$4 sm:$0xff]  }
 0xc00   :  { %v8451_v40 = vpop.eup %8450 }
 0xc01   :  { %v4956_v41 = vadd.f32 1.0, %v8451_v40  ;;  %v8453_v44 = vpop.eup %8452  ;;  %v9909_v40 = vld [vmem:[#allocation13 + $0x1c8] ss:$16 sps:$4 sm:$0xff]  }
 0xc02   :  { %v8455_v31 = vpop.eup %8454  ;;  %v4957_v32 = vadd.f32 1.0, %v8453_v44  ;;  %v9917_v44 = vld [vmem:[#allocation13 + $0x1e0] ss:$16 sps:$4 sm:$0xff]  }
 0xc03   :  { %8464 = vrcp.f32 %v4956_v41  ;;  %v4959_v52 = vadd.f32 1.0, %v8455_v31  ;;  %v8457_v1 = vpop.eup %8456  ;;  %v9914_v41 = vld [vmem:[#allocation13 + $0x1ec] ss:$16 sps:$4 sm:$0xff]   ;;  %v9921_v31 = vld [vmem:[#allocation13 + $0x1e8] ss:$16 sps:$4 sm:$0xff]  }
 0xc04   :  { %8466 = vtanh.f32 %v7659_v9  ;;  %v4960_v16 = vadd.f32 1.0, %v8457_v1  ;;  %v8459_v14 = vpop.eup %8458  ;;  %v9911_v9 = vld [vmem:[#allocation13 + $0x1e4] ss:$16 sps:$4 sm:$0xff]  }
 0xc05   :  { %8468 = vrcp.f32 %v4957_v32  ;;  %v8461_v8 = vpop.eup %8460 }
 0xc06   :  { %8470 = vrcp.f32 %v4959_v52  ;;  %v8463_v27 = vpop.eup %8462  ;;  %v4958_v20 = vadd.f32 1.0, %v8461_v8 }
 0xc07   :  { %8472 = vrcp.f32 %v4960_v16  ;;  %v4961_v15 = vadd.f32 1.0, %v8463_v27 }
 0xc08   :  { %8474 = vrcp.f32 %v4958_v20 }
 0xc0d   :  { %v8465_v45 = vpop.eup %8464 }
 0xc0e   :  { %v8467_v51 = vpop.eup %8466  ;;  %v4978_v48 = vmul.f32 %v8465_v45, %v8459_v14 }
 0xc0f   :  { %v8469_v30 = vpop.eup %8468 }
 0xc10   :  { %v8471_v7 = vpop.eup %8470  ;;  %v4976_v28 = vmul.f32 %v8469_v30, %v9772_v29 }
 0xc11   :  { %v4979_v13 = vmul.f32 %v8471_v7, %v8467_v51  ;;  %v8473_v53 = vpop.eup %8472 }
 0xc12   :  { %v9826_v49 = vadd.f32 %v4978_v48, %v4976_v28  ;;  %v4977_v55 = vmul.f32 %v8473_v53, %v9776_v12  ;;  %v8475_v23 = vpop.eup %8474  ;;  %v9836_v12 = vld [vmem:[#allocation13 + $0x10c] ss:$16 sps:$4 sm:$0xff]  }
 0xc13   :  { %5591 = vmatprep.subr.bf16.mxu1 %v9836_v12 }
 0xc14   :  { %8476 = vtanh.f32 %v9826_v49  ;;  %v9830_v17 = vadd.f32 %v4979_v13, %v4977_v55 }
 0xc15   :  { %8478 = vrcp.f32 %v4961_v15 }
 0xc16   :  { %8480 = vtanh.f32 %v9830_v17 }
 0xc1e   :  { %v8477_v10 = vpop.eup %8476 }
 0xc1f   :  { %v8479_v26 = vpop.eup %8478  ;;  %v4984_v29 = vmul.f32 %v8477_v10, %v8475_v23 }
 0xc20   :  { %v8481_v43 = vpop.eup %8480 }
 0xc21   :  { %v4985_v19 = vmul.f32 %v8481_v43, %v8479_v26 }
 0xc23   :  { %v4986_v61 = vpack.c.bf16 %v4985_v19, %v4984_v29 }
 0xc25   :  { %7526 = vst [vmem:[#allocation15 + $0x10] sm:$0xff] %v4986_v61   ;;  %5233 = vmatmul.mubr.bf16.vlgmr.msra.gmra.mrb[44].mxu0 %v4986_v61  ;;  %5276 = vmatmul.mubr.bf16.vlgmr.msra.gmra.mrb[44].mxu1 %v4986_v61 }
 0xc26   :  { %5549 = vmatpush1.bf16.msra.mxu0 %v9798_v11  ;;  %5580 = vmatprep.mubr.bf16.mxu0 %v8818_v0 }
 0xc27   :  { %5623 = vmatprep.mubr.bf16.mxu1 %v8818_v0  ;;  %5592 = vmatpush1.bf16.msra.mxu1 %v9838_v34 }
 0xc28   :  { %5550 = vmatprep.subr.bf16.mxu0 %v9842_v59  ;;  %5593 = vmatprep.subr.bf16.mxu1 %v9844_v33 }
 0xc2a   :  { %5551 = vmatpush1.bf16.msra.mxu0 %v9846_v56 }
 0xc2b   :  { %5594 = vmatpush1.bf16.msra.mxu1 %v9848_v22  ;;  %5552 = vmatprep.subr.bf16.mxu0 %v9854_v42 }
 0xc2c   :  { %5595 = vmatprep.subr.bf16.mxu1 %v9856_v38 }
 0xc2e   :  { %5553 = vmatpush1.bf16.msra.mxu0 %v9858_v39 }
 0xc2f   :  { %5596 = vmatpush1.bf16.msra.mxu1 %v9860_v46  ;;  %5554 = vmatprep.subr.bf16.mxu0 %v9866_v21 }
 0xc30   :  { %5597 = vmatprep.subr.bf16.mxu1 %v9868_v47 }
 0xc32   :  { %5555 = vmatpush1.bf16.msra.mxu0 %v9870_v57 }
 0xc33   :  { %5598 = vmatpush1.bf16.msra.mxu1 %v9872_v58  ;;  %5556 = vmatprep.subr.bf16.mxu0 %v9880_v62 }
 0xc34   :  { %5599 = vmatprep.subr.bf16.mxu1 %v9884_v24 }
 0xc36   :  { %5557 = vmatpush1.bf16.msra.mxu0 %v9878_v60 }
 0xc37   :  { %5600 = vmatpush1.bf16.msra.mxu1 %v9882_v3  ;;  %5558 = vmatprep.subr.bf16.mxu0 %v9886_v63 }
 0xc38   :  { %5601 = vmatprep.subr.bf16.mxu1 %v9889_v2 }
 0xc3a   :  { %5559 = vmatpush1.bf16.msra.mxu0 %v9893_v54 }
 0xc3b   :  { %5602 = vmatpush1.bf16.msra.mxu1 %v9897_v5  ;;  %5560 = vmatprep.subr.bf16.mxu0 %v9899_v4 }
 0xc3c   :  { %5603 = vmatprep.subr.bf16.mxu1 %v9902_v36 }
 0xc3e   :  { %5561 = vmatpush1.bf16.msra.mxu0 %v9905_v37 }
 0xc3f   :  { %5604 = vmatpush1.bf16.msra.mxu1 %v9909_v40  ;;  %5562 = vmatprep.subr.bf16.mxu0 %v9911_v9 }
 0xc40   :  { %5605 = vmatprep.subr.bf16.mxu1 %v9914_v41 }
 0xc42   :  { %5563 = vmatpush1.bf16.msra.mxu0 %v9917_v44 }
 0xc43   :  { %5606 = vmatpush1.bf16.msra.mxu1 %v9921_v31  ;;  %5896 = vmatprep.subr.bf16.mxu0 %v9796_v25 }
 0xc44   :  { %5939 = vmatprep.subr.bf16.mxu1 %v9836_v12 }
 0xcf8   :  { %v5234_v32 = vpop.f32.mrb[44].mxu0  ;;  %v5277_v52 = vpop.f32.mrb[44].mxu1 }
 0xcf9   :  { %v7628_v1 = vadd.f32 %v5234_v32, %v9702_v35  ;;  %v5236_v16 = vpop.f32.mrb[45].mxu0  ;;  %v5279_v14 = vpop.f32.mrb[45].mxu1  ;;  %v7660_v15 = vadd.f32 %v5277_v52, %v9713_v50 }
 0xcfa   :  { %v7629_v8 = vadd.f32 %v5236_v16, %v9706_v6  ;;  %v5238_v27 = vpop.f32.mrb[46].mxu0  ;;  %v5281_v45 = vpop.f32.mrb[46].mxu1  ;;  %v7661_v23 = vadd.f32 %v5279_v14, %v9718_v18 }
 0xcfb   :  { %v7328_v51 = vmul.f32 -1.442695, %v7628_v1  ;;  %v7630_v48 = vadd.f32 %v5238_v27, %v9702_v35  ;;  %v5240_v30 = vpop.f32.mrb[47].mxu0  ;;  %v5283_v7 = vpop.f32.mrb[47].mxu1  ;;  %v7662_v55 = vadd.f32 %v5281_v45, %v9713_v50  ;;  %v7330_v10 = vmul.f32 -1.442695, %v7660_v15 }
 0xcfc   :  { %v7329_v20 = vmul.f32 -1.442695, %v7629_v8  ;;  %v7631_v28 = vadd.f32 %v5240_v30, %v9706_v6  ;;  %v7663_v29 = vadd.f32 %v5283_v7, %v9718_v18 }
 0xcfd   :  { %8482 = vpow2.f32 %v7328_v51  ;;  %v7331_v13 = vmul.f32 -1.442695, %v7630_v48  ;;  %v7333_v26 = vmul.f32 -1.442695, %v7662_v55 }
 0xcfe   :  { %v7332_v53 = vmul.f32 -1.442695, %v7631_v28  ;;  %8484 = vpow2.f32 %v7329_v20 }
 0xcff   :  { %8486 = vpow2.f32 %v7331_v13 }
 0xd00   :  { %8488 = vpow2.f32 %v7332_v53 }
 0xd01   :  { %8490 = vtanh.f32 %v7661_v23 }
 0xd02   :  { %8492 = vpow2.f32 %v7330_v10 }
 0xd03   :  { %8494 = vpow2.f32 %v7333_v26 }
 0xd07   :  { %v8483_v43 = vpop.eup %8482 }
 0xd08   :  { %v5304_v19 = vadd.f32 1.0, %v8483_v43  ;;  %v8485_v61 = vpop.eup %8484 }
 0xd09   :  { %v8487_v32 = vpop.eup %8486  ;;  %v5305_v1 = vadd.f32 1.0, %v8485_v61 }
 0xd0a   :  { %8496 = vrcp.f32 %v5304_v19  ;;  %v5307_v52 = vadd.f32 1.0, %v8487_v32  ;;  %v8489_v16 = vpop.eup %8488 }
 0xd0b   :  { %8498 = vtanh.f32 %v7663_v29  ;;  %v5308_v8 = vadd.f32 1.0, %v8489_v16  ;;  %v8491_v14 = vpop.eup %8490 }
 0xd0c   :  { %8500 = vrcp.f32 %v5305_v1  ;;  %v8493_v27 = vpop.eup %8492 }
 0xd0d   :  { %8502 = vrcp.f32 %v5307_v52  ;;  %v8495_v45 = vpop.eup %8494  ;;  %v5306_v28 = vadd.f32 1.0, %v8493_v27 }
 0xd0e   :  { %8504 = vrcp.f32 %v5308_v8  ;;  %v5309_v23 = vadd.f32 1.0, %v8495_v45 }
 0xd0f   :  { %8506 = vrcp.f32 %v5306_v28 }
 0xd14   :  { %v8497_v51 = vpop.eup %8496 }
 0xd15   :  { %v8499_v48 = vpop.eup %8498  ;;  %v5326_v30 = vmul.f32 %v8497_v51, %v8491_v14 }
 0xd16   :  { %v8501_v7 = vpop.eup %8500 }
 0xd17   :  { %v8503_v20 = vpop.eup %8502  ;;  %v5324_v13 = vmul.f32 %v8501_v7, %v9826_v49 }
 0xd18   :  { %v5327_v53 = vmul.f32 %v8503_v20, %v8499_v48  ;;  %v8505_v15 = vpop.eup %8504 }
 0xd19   :  { %v9937_v55 = vadd.f32 %v5326_v30, %v5324_v13  ;;  %v5325_v10 = vmul.f32 %v8505_v15, %v9830_v17  ;;  %v8507_v43 = vpop.eup %8506 }
 0xd1b   :  { %8508 = vtanh.f32 %v9937_v55  ;;  %v9941_v26 = vadd.f32 %v5327_v53, %v5325_v10 }
 0xd1c   :  { %8510 = vrcp.f32 %v5309_v23 }
 0xd1d   :  { %8512 = vtanh.f32 %v9941_v26 }
 0xd25   :  { %v8509_v29 = vpop.eup %8508 }
 0xd26   :  { %v8511_v19 = vpop.eup %8510  ;;  %v5332_v49 = vmul.f32 %v8509_v29, %v8507_v43 }
 0xd27   :  { %v8513_v61 = vpop.eup %8512 }
 0xd28   :  { %v5333_v32 = vmul.f32 %v8513_v61, %v8511_v19 }
 0xd2a   :  { %v5334_v1 = vpack.c.bf16 %v5333_v32, %v5332_v49 }
 0xd2c   :  { %7531 = vst [vmem:[#allocation15 + $0x18] sm:$0xff] %v5334_v1   ;;  %5581 = vmatmul.mubr.bf16.vlgmr.msra.gmra.mrb[48].mxu0 %v5334_v1  ;;  %5624 = vmatmul.mubr.bf16.vlgmr.msra.gmra.mrb[48].mxu1 %v5334_v1 }
 0xd2d   :  { %5897 = vmatpush1.bf16.msra.mxu0 %v9798_v11  ;;  %5940 = vmatpush1.bf16.msra.mxu1 %v9838_v34 }
 0xd2e   :  { %5898 = vmatprep.subr.bf16.mxu0 %v9842_v59  ;;  %5941 = vmatprep.subr.bf16.mxu1 %v9844_v33 }
 0xd2f   :  { %5928 = vmatprep.mubr.bf16.mxu0 %v8818_v0  ;;  %5971 = vmatprep.mubr.bf16.mxu1 %v8818_v0 }
 0xd31   :  { %5899 = vmatpush1.bf16.msra.mxu0 %v9846_v56  ;;  %5942 = vmatpush1.bf16.msra.mxu1 %v9848_v22 }
 0xd32   :  { %5900 = vmatprep.subr.bf16.mxu0 %v9854_v42  ;;  %5943 = vmatprep.subr.bf16.mxu1 %v9856_v38 }
 0xd35   :  { %5901 = vmatpush1.bf16.msra.mxu0 %v9858_v39  ;;  %5944 = vmatpush1.bf16.msra.mxu1 %v9860_v46 }
 0xd36   :  { %5902 = vmatprep.subr.bf16.mxu0 %v9866_v21  ;;  %5945 = vmatprep.subr.bf16.mxu1 %v9868_v47 }
 0xd39   :  { %5903 = vmatpush1.bf16.msra.mxu0 %v9870_v57  ;;  %5946 = vmatpush1.bf16.msra.mxu1 %v9872_v58 }
 0xd3a   :  { %5904 = vmatprep.subr.bf16.mxu0 %v9880_v62  ;;  %5947 = vmatprep.subr.bf16.mxu1 %v9884_v24 }
 0xd3d   :  { %5905 = vmatpush1.bf16.msra.mxu0 %v9878_v60  ;;  %5948 = vmatpush1.bf16.msra.mxu1 %v9882_v3 }
 0xd3e   :  { %5906 = vmatprep.subr.bf16.mxu0 %v9886_v63  ;;  %5949 = vmatprep.subr.bf16.mxu1 %v9889_v2 }
 0xd41   :  { %5907 = vmatpush1.bf16.msra.mxu0 %v9893_v54  ;;  %5950 = vmatpush1.bf16.msra.mxu1 %v9897_v5 }
 0xd42   :  { %5908 = vmatprep.subr.bf16.mxu0 %v9899_v4  ;;  %5951 = vmatprep.subr.bf16.mxu1 %v9902_v36 }
 0xd45   :  { %5909 = vmatpush1.bf16.msra.mxu0 %v9905_v37  ;;  %5952 = vmatpush1.bf16.msra.mxu1 %v9909_v40 }
 0xd46   :  { %5910 = vmatprep.subr.bf16.mxu0 %v9911_v9  ;;  %5953 = vmatprep.subr.bf16.mxu1 %v9914_v41 }
 0xd49   :  { %5911 = vmatpush1.bf16.msra.mxu0 %v9917_v44  ;;  %5954 = vmatpush1.bf16.msra.mxu1 %v9921_v31 }
 0xd4a   :  { %6244 = vmatprep.subr.bf16.mxu0 %v9796_v25  ;;  %6287 = vmatprep.subr.bf16.mxu1 %v9836_v12 }
 0xdff   :  { %v5582_v17 = vpop.f32.mrb[48].mxu0  ;;  %v5625_v52 = vpop.f32.mrb[48].mxu1 }
 0xe00   :  { %v7632_v16 = vadd.f32 %v5582_v17, %v9702_v35  ;;  %v5584_v8 = vpop.f32.mrb[49].mxu0  ;;  %v5627_v14 = vpop.f32.mrb[49].mxu1  ;;  %v7664_v15 = vadd.f32 %v5625_v52, %v9713_v50 }
 0xe01   :  { %v7633_v27 = vadd.f32 %v5584_v8, %v9706_v6  ;;  %v5586_v45 = vpop.f32.mrb[50].mxu0  ;;  %v5629_v51 = vpop.f32.mrb[50].mxu1  ;;  %v7665_v10 = vadd.f32 %v5627_v14, %v9718_v18 }
 0xe02   :  { %v7368_v48 = vmul.f32 -1.442695, %v7632_v16  ;;  %v7634_v30 = vadd.f32 %v5586_v45, %v9702_v35  ;;  %v5588_v7 = vpop.f32.mrb[51].mxu0  ;;  %v5631_v20 = vpop.f32.mrb[51].mxu1  ;;  %v7666_v23 = vadd.f32 %v5629_v51, %v9713_v50  ;;  %v7370_v43 = vmul.f32 -1.442695, %v7664_v15 }
 0xe03   :  { %v7369_v28 = vmul.f32 -1.442695, %v7633_v27  ;;  %v7635_v25 = vadd.f32 %v5588_v7, %v9706_v6  ;;  %v7667_v61 = vadd.f32 %v5631_v20, %v9718_v18 }
 0xe04   :  { %8514 = vpow2.f32 %v7368_v48  ;;  %v7371_v13 = vmul.f32 -1.442695, %v7634_v30  ;;  %v7373_v29 = vmul.f32 -1.442695, %v7666_v23 }
 0xe05   :  { %v7372_v53 = vmul.f32 -1.442695, %v7635_v25  ;;  %8516 = vpow2.f32 %v7369_v28 }
 0xe06   :  { %8518 = vpow2.f32 %v7371_v13 }
 0xe07   :  { %8520 = vpow2.f32 %v7372_v53 }
 0xe08   :  { %8522 = vtanh.f32 %v7665_v10 }
 0xe09   :  { %8524 = vpow2.f32 %v7370_v43 }
 0xe0a   :  { %8526 = vpow2.f32 %v7373_v29 }
 0xe0e   :  { %v8515_v19 = vpop.eup %8514 }
 0xe0f   :  { %v5652_v49 = vadd.f32 1.0, %v8515_v19  ;;  %v8517_v32 = vpop.eup %8516 }
 0xe10   :  { %v8519_v1 = vpop.eup %8518  ;;  %v5653_v17 = vadd.f32 1.0, %v8517_v32 }
 0xe11   :  { %8528 = vrcp.f32 %v5652_v49  ;;  %v5655_v52 = vadd.f32 1.0, %v8519_v1  ;;  %v8521_v16 = vpop.eup %8520 }
 0xe12   :  { %8530 = vtanh.f32 %v7667_v61  ;;  %v5656_v8 = vadd.f32 1.0, %v8521_v16  ;;  %v8523_v14 = vpop.eup %8522 }
 0xe13   :  { %8532 = vrcp.f32 %v5653_v17  ;;  %v8525_v27 = vpop.eup %8524 }
 0xe14   :  { %8534 = vrcp.f32 %v5655_v52  ;;  %v8527_v45 = vpop.eup %8526  ;;  %v5654_v28 = vadd.f32 1.0, %v8525_v27 }
 0xe15   :  { %8536 = vrcp.f32 %v5656_v8  ;;  %v5657_v23 = vadd.f32 1.0, %v8527_v45 }
 0xe16   :  { %8538 = vrcp.f32 %v5654_v28 }
 0xe1b   :  { %v8529_v51 = vpop.eup %8528 }
 0xe1c   :  { %v8531_v48 = vpop.eup %8530  ;;  %v5674_v30 = vmul.f32 %v8529_v51, %v8523_v14 }
 0xe1d   :  { %v8533_v7 = vpop.eup %8532 }
 0xe1e   :  { %v8535_v20 = vpop.eup %8534  ;;  %v5672_v25 = vmul.f32 %v8533_v7, %v9937_v55 }
 0xe1f   :  { %v5675_v13 = vmul.f32 %v8535_v20, %v8531_v48  ;;  %v8537_v53 = vpop.eup %8536 }
 0xe20   :  { %v9987_v15 = vadd.f32 %v5674_v30, %v5672_v25  ;;  %v5673_v10 = vmul.f32 %v8537_v53, %v9941_v26  ;;  %v8539_v29 = vpop.eup %8538 }
 0xe22   :  { %8540 = vtanh.f32 %v9987_v15  ;;  %v9991_v43 = vadd.f32 %v5675_v13, %v5673_v10 }
 0xe23   :  { %8542 = vrcp.f32 %v5657_v23 }
 0xe24   :  { %8544 = vtanh.f32 %v9991_v43 }
 0xe2c   :  { %v8541_v19 = vpop.eup %8540 }
 0xe2d   :  { %v8543_v61 = vpop.eup %8542  ;;  %v5680_v55 = vmul.f32 %v8541_v19, %v8539_v29 }
 0xe2e   :  { %v8545_v49 = vpop.eup %8544 }
 0xe2f   :  { %v5681_v32 = vmul.f32 %v8545_v49, %v8543_v61 }
 0xe31   :  { %v5682_v1 = vpack.c.bf16 %v5681_v32, %v5680_v55 }
 0xe33   :  { %7536 = vst [vmem:[#allocation15 + $0x20] sm:$0xff] %v5682_v1   ;;  %5929 = vmatmul.mubr.bf16.vlgmr.msra.gmra.mrb[52].mxu0 %v5682_v1  ;;  %5972 = vmatmul.mubr.bf16.vlgmr.msra.gmra.mrb[52].mxu1 %v5682_v1 }
 0xe34   :  { %6245 = vmatpush1.bf16.msra.mxu0 %v9798_v11  ;;  %6288 = vmatpush1.bf16.msra.mxu1 %v9838_v34 }
 0xe35   :  { %6246 = vmatprep.subr.bf16.mxu0 %v9842_v59  ;;  %6289 = vmatprep.subr.bf16.mxu1 %v9844_v33 }
 0xe36   :  { %6276 = vmatprep.mubr.bf16.mxu0 %v8818_v0  ;;  %6319 = vmatprep.mubr.bf16.mxu1 %v8818_v0 }
 0xe38   :  { %6247 = vmatpush1.bf16.msra.mxu0 %v9846_v56  ;;  %6290 = vmatpush1.bf16.msra.mxu1 %v9848_v22 }
 0xe39   :  { %6248 = vmatprep.subr.bf16.mxu0 %v9854_v42  ;;  %6291 = vmatprep.subr.bf16.mxu1 %v9856_v38 }
 0xe3c   :  { %6249 = vmatpush1.bf16.msra.mxu0 %v9858_v39  ;;  %6292 = vmatpush1.bf16.msra.mxu1 %v9860_v46 }
 0xe3d   :  { %6250 = vmatprep.subr.bf16.mxu0 %v9866_v21  ;;  %6293 = vmatprep.subr.bf16.mxu1 %v9868_v47 }
 0xe40   :  { %6251 = vmatpush1.bf16.msra.mxu0 %v9870_v57  ;;  %6294 = vmatpush1.bf16.msra.mxu1 %v9872_v58 }
 0xe41   :  { %6252 = vmatprep.subr.bf16.mxu0 %v9880_v62  ;;  %6295 = vmatprep.subr.bf16.mxu1 %v9884_v24 }
 0xe44   :  { %6253 = vmatpush1.bf16.msra.mxu0 %v9878_v60  ;;  %6296 = vmatpush1.bf16.msra.mxu1 %v9882_v3 }
 0xe45   :  { %6254 = vmatprep.subr.bf16.mxu0 %v9886_v63  ;;  %6297 = vmatprep.subr.bf16.mxu1 %v9889_v2 }
 0xe48   :  { %6255 = vmatpush1.bf16.msra.mxu0 %v9893_v54  ;;  %6298 = vmatpush1.bf16.msra.mxu1 %v9897_v5 }
 0xe49   :  { %6256 = vmatprep.subr.bf16.mxu0 %v9899_v4  ;;  %6299 = vmatprep.subr.bf16.mxu1 %v9902_v36 }
 0xe4c   :  { %6257 = vmatpush1.bf16.msra.mxu0 %v9905_v37  ;;  %6300 = vmatpush1.bf16.msra.mxu1 %v9909_v40 }
 0xe4d   :  { %6258 = vmatprep.subr.bf16.mxu0 %v9911_v9  ;;  %6301 = vmatprep.subr.bf16.mxu1 %v9914_v41 }
 0xe50   :  { %6259 = vmatpush1.bf16.msra.mxu0 %v9917_v44  ;;  %6302 = vmatpush1.bf16.msra.mxu1 %v9921_v31 }
 0xe51   :  { %6635 = vmatprep.subr.bf16.mxu1 %v9836_v12 }
 0xf06   :  { %v5930_v11 = vpop.f32.mrb[52].mxu0  ;;  %v5973_v26 = vpop.f32.mrb[52].mxu1 }
 0xf07   :  { %v7636_v17 = vadd.f32 %v5930_v11, %v9702_v35  ;;  %v5932_v52 = vpop.f32.mrb[53].mxu0  ;;  %v5975_v16 = vpop.f32.mrb[53].mxu1  ;;  %v7668_v25 = vadd.f32 %v5973_v26, %v9713_v50 }
 0xf08   :  { %v7637_v8 = vadd.f32 %v5932_v52, %v9706_v6  ;;  %v5934_v14 = vpop.f32.mrb[54].mxu0  ;;  %v5977_v27 = vpop.f32.mrb[54].mxu1  ;;  %v7669_v53 = vadd.f32 %v5975_v16, %v9718_v18 }
 0xf09   :  { %v7408_v45 = vmul.f32 -1.442695, %v7636_v17  ;;  %v7638_v51 = vadd.f32 %v5934_v14, %v9702_v35  ;;  %v5936_v48 = vpop.f32.mrb[55].mxu0  ;;  %v5979_v30 = vpop.f32.mrb[55].mxu1  ;;  %v7670_v13 = vadd.f32 %v5977_v27, %v9713_v50  ;;  %v7410_v23 = vmul.f32 -1.442695, %v7668_v25 }
 0xf0a   :  { %v7409_v7 = vmul.f32 -1.442695, %v7637_v8  ;;  %v7639_v20 = vadd.f32 %v5936_v48, %v9706_v6  ;;  %v7671_v19 = vadd.f32 %v5979_v30, %v9718_v18 }
 0xf0b   :  { %8546 = vpow2.f32 %v7408_v45  ;;  %v7411_v12 = vmul.f32 -1.442695, %v7638_v51  ;;  %v7413_v10 = vmul.f32 -1.442695, %v7670_v13 }
 0xf0c   :  { %v7412_v28 = vmul.f32 -1.442695, %v7639_v20  ;;  %8548 = vpow2.f32 %v7409_v7 }
 0xf0d   :  { %8550 = vpow2.f32 %v7411_v12 }
 0xf0e   :  { %8552 = vpow2.f32 %v7412_v28 }
 0xf0f   :  { %8554 = vtanh.f32 %v7669_v53 }
 0xf10   :  { %8556 = vpow2.f32 %v7410_v23 }
 0xf11   :  { %8558 = vpow2.f32 %v7413_v10 }
 0xf15   :  { %v8547_v29 = vpop.eup %8546 }
 0xf16   :  { %v6000_v61 = vadd.f32 1.0, %v8547_v29  ;;  %v8549_v49 = vpop.eup %8548 }
 0xf17   :  { %v8551_v55 = vpop.eup %8550  ;;  %v6001_v32 = vadd.f32 1.0, %v8549_v49 }
 0xf18   :  { %8560 = vrcp.f32 %v6000_v61  ;;  %v6003_v1 = vadd.f32 1.0, %v8551_v55  ;;  %v8553_v11 = vpop.eup %8552 }
 0xf19   :  { %8562 = vtanh.f32 %v7671_v19  ;;  %v6004_v26 = vadd.f32 1.0, %v8553_v11  ;;  %v8555_v17 = vpop.eup %8554 }
 0xf1a   :  { %8564 = vrcp.f32 %v6001_v32  ;;  %v8557_v52 = vpop.eup %8556 }
 0xf1b   :  { %8566 = vrcp.f32 %v6003_v1  ;;  %v8559_v16 = vpop.eup %8558  ;;  %v6002_v48 = vadd.f32 1.0, %v8557_v52 }
 0xf1c   :  { %8568 = vrcp.f32 %v6004_v26  ;;  %v6005_v28 = vadd.f32 1.0, %v8559_v16 }
 0xf1d   :  { %8570 = vrcp.f32 %v6002_v48 }
 0xf22   :  { %v8561_v8 = vpop.eup %8560 }
 0xf23   :  { %v8563_v14 = vpop.eup %8562  ;;  %v6022_v27 = vmul.f32 %v8561_v8, %v8555_v17 }
 0xf24   :  { %v8565_v45 = vpop.eup %8564 }
 0xf25   :  { %v8567_v51 = vpop.eup %8566  ;;  %v6020_v30 = vmul.f32 %v8565_v45, %v9987_v15 }
 0xf26   :  { %v6023_v7 = vmul.f32 %v8567_v51, %v8563_v14  ;;  %v8569_v20 = vpop.eup %8568 }
 0xf27   :  { %v10036_v12 = vadd.f32 %v6022_v27, %v6020_v30  ;;  %v6021_v25 = vmul.f32 %v8569_v20, %v9991_v43  ;;  %v8571_v53 = vpop.eup %8570 }
 0xf29   :  { %8572 = vtanh.f32 %v10036_v12  ;;  %v10040_v13 = vadd.f32 %v6023_v7, %v6021_v25 }
 0xf2a   :  { %8574 = vrcp.f32 %v6005_v28 }
 0xf2b   :  { %8576 = vtanh.f32 %v10040_v13 }
 0xf33   :  { %v8573_v23 = vpop.eup %8572 }
 0xf34   :  { %v8575_v10 = vpop.eup %8574  ;;  %v6028_v15 = vmul.f32 %v8573_v23, %v8571_v53 }
 0xf35   :  { %v8577_v29 = vpop.eup %8576 }
 0xf36   :  { %v6029_v19 = vmul.f32 %v8577_v29, %v8575_v10 }
 0xf38   :  { %v6030_v61 = vpack.c.bf16 %v6029_v19, %v6028_v15 }
 0xf3a   :  { %7541 = vst [vmem:[#allocation15 + $0x28] sm:$0xff] %v6030_v61   ;;  %6277 = vmatmul.mubr.bf16.vlgmr.msra.gmra.mrb[56].mxu0 %v6030_v61  ;;  %6320 = vmatmul.mubr.bf16.vlgmr.msra.gmra.mrb[56].mxu1 %v6030_v61 }
 0xf3b   :  { %6636 = vmatpush1.bf16.msra.mxu1 %v9838_v34  ;;  %6624 = vmatprep.mubr.bf16.mxu0 %v8818_v0  ;;  %v8127_v34 = vld [vmem:[#allocation13 + $0x100] ss:$16 sps:$4 sm:$0xff]  }
 0xf3c   :  { %6637 = vmatprep.subr.bf16.mxu1 %v9844_v33  ;;  %6667 = vmatprep.mubr.bf16.mxu1 %v8818_v0  ;;  %v8129_v0 = vld [vmem:[#allocation13 + $0x104] ss:$16 sps:$4 sm:$0xff]  }
 0xf3d   :  { %6592 = vmatprep.subr.bf16.mxu0 %v8129_v0 }
 0xf3e   :  { %6593 = vmatpush1.bf16.msra.mxu0 %v8127_v34 }
 0xf3f   :  { %6638 = vmatpush1.bf16.msra.mxu1 %v9848_v22  ;;  %6594 = vmatprep.subr.bf16.mxu0 %v9842_v59 }
 0xf40   :  { %6639 = vmatprep.subr.bf16.mxu1 %v9856_v38 }
 0xf42   :  { %6595 = vmatpush1.bf16.msra.mxu0 %v9846_v56 }
 0xf43   :  { %6640 = vmatpush1.bf16.msra.mxu1 %v9860_v46  ;;  %6596 = vmatprep.subr.bf16.mxu0 %v9854_v42 }
 0xf44   :  { %6641 = vmatprep.subr.bf16.mxu1 %v9868_v47 }
 0xf46   :  { %6597 = vmatpush1.bf16.msra.mxu0 %v9858_v39 }
 0xf47   :  { %6642 = vmatpush1.bf16.msra.mxu1 %v9872_v58  ;;  %6598 = vmatprep.subr.bf16.mxu0 %v9866_v21 }
 0xf48   :  { %6643 = vmatprep.subr.bf16.mxu1 %v9884_v24 }
 0xf4a   :  { %6599 = vmatpush1.bf16.msra.mxu0 %v9870_v57 }
 0xf4b   :  { %6644 = vmatpush1.bf16.msra.mxu1 %v9882_v3  ;;  %6600 = vmatprep.subr.bf16.mxu0 %v9880_v62 }
 0xf4c   :  { %6645 = vmatprep.subr.bf16.mxu1 %v9889_v2 }
 0xf4e   :  { %6601 = vmatpush1.bf16.msra.mxu0 %v9878_v60 }
 0xf4f   :  { %6646 = vmatpush1.bf16.msra.mxu1 %v9897_v5  ;;  %6602 = vmatprep.subr.bf16.mxu0 %v9886_v63 }
 0xf50   :  { %6647 = vmatprep.subr.bf16.mxu1 %v9902_v36 }
 0xf52   :  { %6603 = vmatpush1.bf16.msra.mxu0 %v9893_v54 }
 0xf53   :  { %6648 = vmatpush1.bf16.msra.mxu1 %v9909_v40  ;;  %6604 = vmatprep.subr.bf16.mxu0 %v9899_v4 }
 0xf54   :  { %6649 = vmatprep.subr.bf16.mxu1 %v9914_v41 }
 0xf56   :  { %6605 = vmatpush1.bf16.msra.mxu0 %v9905_v37 }
 0xf57   :  { %6650 = vmatpush1.bf16.msra.mxu1 %v9921_v31  ;;  %6606 = vmatprep.subr.bf16.mxu0 %v9911_v9 }
 0xf5a   :  { %6607 = vmatpush1.bf16.msra.mxu0 %v9917_v44 }
0x100d   :  { %v6278_v59 = vpop.f32.mrb[56].mxu0  ;;  %v6321_v33 = vpop.f32.mrb[56].mxu1 }
0x100e   :  { %v7640_v56 = vadd.f32 %v6278_v59, %v9702_v35  ;;  %v6280_v22 = vpop.f32.mrb[57].mxu0  ;;  %v6323_v42 = vpop.f32.mrb[57].mxu1  ;;  %v7672_v63 = vadd.f32 %v6321_v33, %v9713_v50 }
0x100f   :  { %v7641_v38 = vadd.f32 %v6280_v22, %v9706_v6  ;;  %v6282_v39 = vpop.f32.mrb[58].mxu0  ;;  %v6325_v46 = vpop.f32.mrb[58].mxu1  ;;  %v7673_v54 = vadd.f32 %v6323_v42, %v9718_v18 }
0x1010   :  { %v7448_v21 = vmul.f32 -1.442695, %v7640_v56  ;;  %v7642_v47 = vadd.f32 %v6282_v39, %v9702_v35  ;;  %v6284_v57 = vpop.f32.mrb[59].mxu0  ;;  %v6327_v58 = vpop.f32.mrb[59].mxu1  ;;  %v7674_v2 = vadd.f32 %v6325_v46, %v9713_v50  ;;  %v7450_v5 = vmul.f32 -1.442695, %v7672_v63 }
0x1011   :  { %v7449_v60 = vmul.f32 -1.442695, %v7641_v38  ;;  %v7643_v62 = vadd.f32 %v6284_v57, %v9706_v6  ;;  %v7675_v37 = vadd.f32 %v6327_v58, %v9718_v18 }
0x1012   :  { %8578 = vpow2.f32 %v7448_v21  ;;  %v7451_v3 = vmul.f32 -1.442695, %v7642_v47  ;;  %v7453_v4 = vmul.f32 -1.442695, %v7674_v2 }
0x1013   :  { %v7452_v24 = vmul.f32 -1.442695, %v7643_v62  ;;  %8580 = vpow2.f32 %v7449_v60 }
0x1014   :  { %8582 = vpow2.f32 %v7451_v3 }
0x1015   :  { %8584 = vpow2.f32 %v7452_v24 }
0x1016   :  { %8586 = vtanh.f32 %v7673_v54 }
0x1017   :  { %8588 = vpow2.f32 %v7450_v5 }
0x1018   :  { %8590 = vpow2.f32 %v7453_v4 }
0x101c   :  { %v8579_v36 = vpop.eup %8578 }
0x101d   :  { %v6348_v40 = vadd.f32 1.0, %v8579_v36  ;;  %v8581_v9 = vpop.eup %8580 }
0x101e   :  { %v8583_v41 = vpop.eup %8582  ;;  %v6349_v44 = vadd.f32 1.0, %v8581_v9 }
0x101f   :  { %8592 = vrcp.f32 %v6348_v40  ;;  %v6351_v31 = vadd.f32 1.0, %v8583_v41  ;;  %v8585_v43 = vpop.eup %8584 }
0x1020   :  { %8594 = vtanh.f32 %v7675_v37  ;;  %v6352_v49 = vadd.f32 1.0, %v8585_v43  ;;  %v8587_v55 = vpop.eup %8586 }
0x1021   :  { %8596 = vrcp.f32 %v6349_v44  ;;  %v8589_v32 = vpop.eup %8588 }
0x1022   :  { %8598 = vrcp.f32 %v6351_v31  ;;  %v8591_v1 = vpop.eup %8590  ;;  %v6350_v8 = vadd.f32 1.0, %v8589_v32 }
0x1023   :  { %8600 = vrcp.f32 %v6352_v49  ;;  %v6353_v48 = vadd.f32 1.0, %v8591_v1 }
0x1024   :  { %8602 = vrcp.f32 %v6350_v8 }
0x1029   :  { %v8593_v11 = vpop.eup %8592 }
0x102a   :  { %v8595_v26 = vpop.eup %8594  ;;  %v6370_v17 = vmul.f32 %v8593_v11, %v8587_v55 }
0x102b   :  { %v8597_v52 = vpop.eup %8596 }
0x102c   :  { %v8599_v16 = vpop.eup %8598  ;;  %v6368_v14 = vmul.f32 %v8597_v52, %v10036_v12 }
0x102d   :  { %v6371_v27 = vmul.f32 %v8599_v16, %v8595_v26  ;;  %v8601_v45 = vpop.eup %8600 }
0x102e   :  { %v10083_v51 = vadd.f32 %v6370_v17, %v6368_v14  ;;  %v6369_v30 = vmul.f32 %v8601_v45, %v10040_v13  ;;  %v8603_v20 = vpop.eup %8602 }
0x1030   :  { %8604 = vtanh.f32 %v10083_v51  ;;  %v10087_v7 = vadd.f32 %v6371_v27, %v6369_v30 }
0x1031   :  { %8606 = vrcp.f32 %v6353_v48 }
0x1032   :  { %8608 = vtanh.f32 %v10087_v7 }
0x103a   :  { %v8605_v28 = vpop.eup %8604 }
0x103b   :  { %v8607_v25 = vpop.eup %8606  ;;  %v6376_v12 = vmul.f32 %v8605_v28, %v8603_v20 }
0x103c   :  { %v8609_v53 = vpop.eup %8608 }
0x103d   :  { %v6377_v23 = vmul.f32 %v8609_v53, %v8607_v25 }
0x103f   :  { %v6378_v10 = vpack.c.bf16 %v6377_v23, %v6376_v12 }
0x1041   :  { %7546 = vst [vmem:[#allocation15 + $0x30] sm:$0xff] %v6378_v10   ;;  %6625 = vmatmul.mubr.bf16.vlgmr.msra.gmra.mrb[60].mxu0 %v6378_v10  ;;  %6668 = vmatmul.mubr.bf16.vlgmr.msra.gmra.mrb[60].mxu1 %v6378_v10 }
0x1114   :  { %v6626_v29 = vpop.f32.mrb[60].mxu0  ;;  %v6669_v13 = vpop.f32.mrb[60].mxu1 }
0x1115   :  { %v7644_v15 = vadd.f32 %v6626_v29, %v9702_v35  ;;  %v6628_v19 = vpop.f32.mrb[61].mxu0  ;;  %v6671_v61 = vpop.f32.mrb[61].mxu1  ;;  %v7676_v47 = vadd.f32 %v6669_v13, %v9713_v50 }
0x1116   :  { %v7645_v0 = vadd.f32 %v6628_v19, %v9706_v6  ;;  %v6630_v34 = vpop.f32.mrb[62].mxu0  ;;  %v6673_v59 = vpop.f32.mrb[62].mxu1  ;;  %v7677_v58 = vadd.f32 %v6671_v61, %v9718_v18 }
0x1117   :  { %v7488_v33 = vmul.f32 -1.442695, %v7644_v15  ;;  %v7646_v56 = vadd.f32 %v6630_v34, %v9702_v35  ;;  %v6632_v22 = vpop.f32.mrb[63].mxu0  ;;  %v6675_v42 = vpop.f32.mrb[63].mxu1  ;;  %v7678_v57 = vadd.f32 %v6673_v59, %v9713_v50  ;;  %v7490_v60 = vmul.f32 -1.442695, %v7676_v47 }
0x1118   :  { %v7489_v38 = vmul.f32 -1.442695, %v7645_v0  ;;  %v7647_v39 = vadd.f32 %v6632_v22, %v9706_v6  ;;  %v7679_v3 = vadd.f32 %v6675_v42, %v9718_v18 }
0x1119   :  { %8610 = vpow2.f32 %v7488_v33  ;;  %v7491_v46 = vmul.f32 -1.442695, %v7646_v56  ;;  %v7493_v62 = vmul.f32 -1.442695, %v7678_v57 }
0x111a   :  { %v7492_v21 = vmul.f32 -1.442695, %v7647_v39  ;;  %8612 = vpow2.f32 %v7489_v38 }
0x111b   :  { %8614 = vpow2.f32 %v7491_v46 }
0x111c   :  { %8616 = vpow2.f32 %v7492_v21 }
0x111d   :  { %8618 = vtanh.f32 %v7677_v58 }
0x111e   :  { %8620 = vpow2.f32 %v7490_v60 }
0x111f   :  { %8622 = vpow2.f32 %v7493_v62 }
0x1123   :  { %v8611_v35 = vpop.eup %8610 }
0x1124   :  { %v6696_v24 = vadd.f32 1.0, %v8611_v35  ;;  %v8613_v6 = vpop.eup %8612 }
0x1125   :  { %v8615_v63 = vpop.eup %8614  ;;  %v6697_v2 = vadd.f32 1.0, %v8613_v6 }
0x1126   :  { %8624 = vrcp.f32 %v6696_v24  ;;  %v6699_v54 = vadd.f32 1.0, %v8615_v63  ;;  %v8617_v5 = vpop.eup %8616 }
0x1127   :  { %8626 = vtanh.f32 %v7679_v3  ;;  %v6700_v50 = vadd.f32 1.0, %v8617_v5  ;;  %v8619_v4 = vpop.eup %8618 }
0x1128   :  { %8628 = vrcp.f32 %v6697_v2  ;;  %v8621_v36 = vpop.eup %8620 }
0x1129   :  { %8630 = vrcp.f32 %v6699_v54  ;;  %v8623_v37 = vpop.eup %8622  ;;  %v6698_v44 = vadd.f32 1.0, %v8621_v36 }
0x112a   :  { %8632 = vrcp.f32 %v6700_v50  ;;  %v6701_v1 = vadd.f32 1.0, %v8623_v37 }
0x112b   :  { %8634 = vrcp.f32 %v6698_v44 }
0x1130   :  { %v8625_v40 = vpop.eup %8624 }
0x1131   :  { %v8627_v9 = vpop.eup %8626  ;;  %v6718_v18 = vmul.f32 %v8625_v40, %v8619_v4 }
0x1132   :  { %v8629_v41 = vpop.eup %8628 }
0x1133   :  { %v8631_v31 = vpop.eup %8630  ;;  %v6716_v43 = vmul.f32 %v8629_v41, %v10083_v51 }
0x1134   :  { %v6719_v49 = vmul.f32 %v8631_v31, %v8627_v9  ;;  %v8633_v55 = vpop.eup %8632 }
0x1135   :  { %v6720_v32 = vadd.f32 %v6718_v18, %v6716_v43  ;;  %v6717_v11 = vmul.f32 %v8633_v55, %v10087_v7  ;;  %v8635_v17 = vpop.eup %8634 }
0x1137   :  { %8636 = vtanh.f32 %v6720_v32  ;;  %v6721_v26 = vadd.f32 %v6719_v49, %v6717_v11 }
0x1138   :  { %8638 = vrcp.f32 %v6701_v1 }
0x1139   :  { %8640 = vtanh.f32 %v6721_v26 }
0x1141   :  { %v8637_v52 = vpop.eup %8636 }
0x1142   :  { %v6724_v16 = vmul.f32 %v8637_v52, %v8635_v17  ;;  %v8639_v8 = vpop.eup %8638 }
0x1143   :  { %v8641_v14 = vpop.eup %8640 }
0x1144   :  { %v6725_v27 = vmul.f32 %v8641_v14, %v8639_v8 }
0x1146   :  { %v7550_v45 = vpack.c.bf16 %v6725_v27, %v6724_v16 }
0x1148   :  { %7551 = vst [vmem:[#allocation15 + $0x38] sm:$0xff] %v7550_v45  }
0x1149   :  { %8785 = shalt.err (!%p8782_p10)
}
0x114a   :  { %s8786_s17 = scalar_lea.hbm %s10122_s7, 1024 }
0x114b   :  { %p8787_p11 = scmp.ne.s32.totalorder %s10122_s7, %s8786_s17  ;;  %p8790_p12 = scmp.lt.u32.totalorder %s8786_s17, %s10122_s7 }
0x114d   :  { %p8792_p13 = pnand %p8790_p12, %p8787_p11 }
0x114f   :  { %8795 = shalt.err (!%p8792_p13)
}
0x1150   :  { %6751 = dma.vmem_to_hbm [thread:$0]  %s6746_s10, 1024, %s10122_s7, [#allocation6], %s8813_s3, %s8813_s3, %s8814_s16  }
0x1151   :  { %8804 = dma.done.wait [#allocation6], 1024  }
0x1152   :  { %8805 = vsyncadd [#allocation6], 4294966272 }
0x1153   :  { %6755 = vsyncpa [#allocation5], 1 }
0x1154   :  { %6756 = vsyncpa [#allocation8], 1 }
0x1155   :  { %6757 = vsyncpa [#allocation11], 1 }
0x1156   :  { %6758 = vsyncpa [#allocation14], 1 }
0x1157   :  { %6759 = vsyncpa [#allocation6], 1 }

</bundles_post_ra>
